<compile_context>
chip_gen: v6e
topology: v6e:2x2x1
jax: 0.10.0
libtpu: 0.0.40
codegen_flags: <defaults>
</compile_context>

<pallas_src>
import functools

import jax
import jax.numpy as jnp
from jax.experimental import pallas as pl
from jax.experimental.pallas import tpu as pltpu


H1_PAD = 512   # layer-1 width 400, zero-padded to a lane multiple
H2_PAD = 384   # layer-2 width 300, zero-padded to a lane multiple


def _critic_kernel(s_ref, a_ref,
                   w1s_ref, w1a_ref, b1_ref,
                   w2_ref, b2_ref,
                   w3_ref, b3_ref,
                   q_ref, *, use_bf16):
    cdt = jnp.bfloat16 if use_bf16 else jnp.float32
    s = s_ref[...].astype(cdt)
    a = a_ref[...].astype(cdt)

    # Layer 1: split matmul (state/action halves of W1) replaces
    # concat([state, action], 1) @ W1.  f32 accumulation on the MXU.
    h1 = (jnp.dot(s, w1s_ref[...].astype(cdt), preferred_element_type=jnp.float32)
          + jnp.dot(a, w1a_ref[...].astype(cdt), preferred_element_type=jnp.float32)
          + b1_ref[...])
    h1 = jnp.maximum(h1, 0.0)

    # Layer 2: (TB, 512) @ (512, 384) + bias, ReLU.
    h2 = jnp.dot(h1.astype(cdt), w2_ref[...].astype(cdt),
                 preferred_element_type=jnp.float32) + b2_ref[...]
    h2 = jnp.maximum(h2, 0.0)

    # Layer 3: single output column -> VPU multiply + XLU lane reduction
    # instead of a 1-column MXU matmul.  w3_ref is stored as a (1, H2_PAD) row.
    q_ref[...] = jnp.sum(h2 * w3_ref[...], axis=-1, keepdims=True) + b3_ref[...]


def _batch_dimension_semantics():
    """Pick grid semantics for the batch axis based on the local TPU."""
    try:
        kind = jax.devices()[0].device_kind.lower()
    except Exception:  # pragma: no cover - non-TPU fallback
        kind = ""
    if "v7" in kind:
        # v7x has 2 TensorCores per chip: shard the batch grid across them.
        return (pltpu.CORE_PARALLEL,), True
    return ("parallel",), False


def critic_forward(state, action, packed_params, tb=512, use_bf16=False):
    """state: (B, state_dim), action: (B, action_dim) -> q: (B, 1)."""
    w1s, w1a, b1, w2, b2, w3, b3 = packed_params
    state = state.astype(jnp.float32)
    action = action.astype(jnp.float32)
    B, sdim = state.shape
    adim = action.shape[1]

    semantics, two_cores = _batch_dimension_semantics()

    # Batch tile: whole batch if it fits in one tile, else `tb` rows.
    TB = B if B <= tb else tb
    if two_cores and B > 128:
        # Keep at least two grid steps so both TensorCores get work.
        half = max(128, (((B + 1) // 2) + 7) // 8 * 8)
        TB = min(TB, half)
    grid = (pl.cdiv(B, TB),)

    batch_spec = lambda cols: pl.BlockSpec((TB, cols), lambda i: (i, 0))
    # Untiled VMEM placement: copied in once, resident across all grid steps,
    # no double-buffering (single-buffer intent of the review's Buffered(1)).
    resident = pl.BlockSpec(memory_space=pltpu.MemorySpace.VMEM)

    kernel = functools.partial(_critic_kernel, use_bf16=use_bf16)

    return pl.pallas_call(
        kernel,
        out_shape=jax.ShapeDtypeStruct((B, 1), jnp.float32),
        grid=grid,
        in_specs=[
            batch_spec(sdim),
            batch_spec(adim),
            resident, resident, resident,   # w1s, w1a, b1
            resident, resident,             # w2, b2
            resident, resident,             # w3 (row), b3
        ],
        out_specs=pl.BlockSpec((TB, 1), lambda i: (i, 0)),
        compiler_params=pltpu.CompilerParams(dimension_semantics=semantics),
    )(state, action, w1s, w1a, b1, w2, b2, w3, b3)


def init_critic_params(key, state_dim, action_dim):
    """nn.Linear-style init (U[-1/sqrt(fan_in), +1/sqrt(fan_in)]).
    Returns PyTorch-faithful (unpadded) params, stored pre-transposed as
    (in, out) weights and (1, out) biases: (w1, b1, w2, b2, w3, b3)."""
    dims = [(state_dim + action_dim, 400), (400, 300), (300, 1)]
    params = []
    for fan_in, fan_out in dims:
        key, kw, kb = jax.random.split(key, 3)
        bound = 1.0 / float(fan_in) ** 0.5
        w = jax.random.uniform(kw, (fan_in, fan_out), jnp.float32,
                               minval=-bound, maxval=bound)
        b = jax.random.uniform(kb, (1, fan_out), jnp.float32,
                               minval=-bound, maxval=bound)
        params += [w, b]
    return tuple(params)


def pack_params(params, state_dim):
    """One-time repacking for the kernel: split W1 into state/action halves,
    zero-pad hidden dims to lane multiples (400->512, 300->384), store W3 as a
    (1, H2_PAD) row.  Zero padding is bit-exact for the forward pass."""
    w1, b1, w2, b2, w3, b3 = params
    pad1 = H1_PAD - w1.shape[1]
    pad2 = H2_PAD - w2.shape[1]
    w1p = jnp.pad(w1, ((0, 0), (0, pad1)))
    b1p = jnp.pad(b1, ((0, 0), (0, pad1)))
    w2p = jnp.pad(w2, ((0, pad1), (0, pad2)))
    b2p = jnp.pad(b2, ((0, 0), (0, pad2)))
    w3p = jnp.pad(w3, ((0, pad2), (0, 0)))
    w1s, w1a = w1p[:state_dim], w1p[state_dim:]
    return (w1s, w1a, b1p, w2p, b2p, w3p.T, b3)


def critic_ref(state, action, params):
    """Pure-JAX reference (unpadded params, mirrors the PyTorch forward)."""
    w1, b1, w2, b2, w3, b3 = params
    sa = jnp.concatenate([state, action], axis=1)
    h1 = jnp.maximum(sa @ w1 + b1, 0.0)
    h2 = jnp.maximum(h1 @ w2 + b2, 0.0)
    return h2 @ w3 + b3


if __name__ == "__main__":
    key = jax.random.PRNGKey(0)
    state_dim, action_dim = 17, 6

    kp, ks, ka = jax.random.split(key, 3)
    params = init_critic_params(kp, state_dim, action_dim)
    packed = pack_params(params, state_dim)   # done once, reused every call

    # Exercise single-tile (256), multi-tile (1024) and ragged-last-tile (640).
    for batch in (256, 1024, 640):
        kbs = jax.random.fold_in(ks, batch)
        kba = jax.random.fold_in(ka, batch)
        state = jax.random.normal(kbs, (batch, state_dim), jnp.float32)
        action = jax.random.normal(kba, (batch, action_dim), jnp.float32)

        q = jax.block_until_ready(critic_forward(state, action, packed))
        q_ref = jax.block_until_ready(critic_ref(state, action, params))

        assert q.shape == (batch, 1), q.shape
        assert jnp.allclose(q, q_ref, atol=1e-4, rtol=1e-4), (
            batch, jnp.max(jnp.abs(q - q_ref)))

    print("KERNEL_OK")
</pallas_src>

<mosaic_0001>
module attributes {stable_mosaic.version = 11 : i64} {
  func.func @_critic_kernel(%arg0: i32, %arg1: memref<256x17xf32, #tpu.memory_space<vmem>>, %arg2: memref<256x6xf32, #tpu.memory_space<vmem>>, %arg3: memref<17x512xf32, #tpu.memory_space<vmem>>, %arg4: memref<6x512xf32, #tpu.memory_space<vmem>>, %arg5: memref<1x512xf32, #tpu.memory_space<vmem>>, %arg6: memref<512x384xf32, #tpu.memory_space<vmem>>, %arg7: memref<1x384xf32, #tpu.memory_space<vmem>>, %arg8: memref<1x384xf32, #tpu.memory_space<vmem>>, %arg9: memref<1x1xf32, #tpu.memory_space<vmem>>, %arg10: memref<256x1xf32, #tpu.memory_space<vmem>>) attributes {dimension_semantics = [#tpu.dimension_semantics<parallel>], iteration_bounds = array<i64: 1>, scalar_prefetch = 0 : i64, scratch_operands = 0 : i64, tpu.core_type = #tpu.core_type<tc>, window_params = [{transform_indices = @transform_0, window_bounds = array<i64: 256, 17>}, {transform_indices = @transform_1, window_bounds = array<i64: 256, 6>}, {pipeline_mode = #tpu.pipeline_mode<synchronous>, transform_indices = @transform_2, window_bounds = array<i64: 17, 512>}, {pipeline_mode = #tpu.pipeline_mode<synchronous>, transform_indices = @transform_3, window_bounds = array<i64: 6, 512>}, {pipeline_mode = #tpu.pipeline_mode<synchronous>, transform_indices = @transform_4, window_bounds = array<i64: 1, 512>}, {pipeline_mode = #tpu.pipeline_mode<synchronous>, transform_indices = @transform_5, window_bounds = array<i64: 512, 384>}, {pipeline_mode = #tpu.pipeline_mode<synchronous>, transform_indices = @transform_6, window_bounds = array<i64: 1, 384>}, {pipeline_mode = #tpu.pipeline_mode<synchronous>, transform_indices = @transform_7, window_bounds = array<i64: 1, 384>}, {pipeline_mode = #tpu.pipeline_mode<synchronous>, transform_indices = @transform_8, window_bounds = array<i64: 1, 1>}, {transform_indices = @transform_9, window_bounds = array<i64: 256, 1>}]} {
    %c0 = arith.constant 0 : index
    %c0_0 = arith.constant 0 : index
    %0 = vector.load %arg1[%c0, %c0_0] : memref<256x17xf32, #tpu.memory_space<vmem>>, vector<256x17xf32>
    %c0_1 = arith.constant 0 : index
    %c0_2 = arith.constant 0 : index
    %1 = vector.load %arg2[%c0_1, %c0_2] : memref<256x6xf32, #tpu.memory_space<vmem>>, vector<256x6xf32>
    %c0_3 = arith.constant 0 : index
    %c0_4 = arith.constant 0 : index
    %2 = vector.load %arg3[%c0_3, %c0_4] : memref<17x512xf32, #tpu.memory_space<vmem>>, vector<17x512xf32>
    %cst = arith.constant dense<0.000000e+00> : vector<256x512xf32>
    %3 = tpu.matmul %0, %2, %cst {dimension_numbers = #tpu.dot_dimension_numbers<[1], [0], [0], [1], [0, 0, 1, 1], [], []>} : vector<256x17xf32>, vector<17x512xf32>, vector<256x512xf32> -> vector<256x512xf32>
    %c0_5 = arith.constant 0 : index
    %c0_6 = arith.constant 0 : index
    %4 = vector.load %arg4[%c0_5, %c0_6] : memref<6x512xf32, #tpu.memory_space<vmem>>, vector<6x512xf32>
    %cst_7 = arith.constant dense<0.000000e+00> : vector<256x512xf32>
    %5 = tpu.matmul %1, %4, %cst_7 {dimension_numbers = #tpu.dot_dimension_numbers<[1], [0], [0], [1], [0, 0, 1, 1], [], []>} : vector<256x6xf32>, vector<6x512xf32>, vector<256x512xf32> -> vector<256x512xf32>
    %6 = arith.addf %3, %5 : vector<256x512xf32>
    %c0_8 = arith.constant 0 : index
    %c0_9 = arith.constant 0 : index
    %7 = vector.load %arg5[%c0_8, %c0_9] : memref<1x512xf32, #tpu.memory_space<vmem>>, vector<1x512xf32>
    %8 = vector.broadcast %7 : vector<1x512xf32> to vector<256x512xf32>
    %9 = arith.addf %6, %8 : vector<256x512xf32>
    %cst_10 = arith.constant 0.000000e+00 : f32
    %10 = vector.broadcast %cst_10 : f32 to vector<256x512xf32>
    %11 = arith.maximumf %9, %10 : vector<256x512xf32>
    %c0_11 = arith.constant 0 : index
    %c0_12 = arith.constant 0 : index
    %12 = vector.load %arg6[%c0_11, %c0_12] : memref<512x384xf32, #tpu.memory_space<vmem>>, vector<512x384xf32>
    %cst_13 = arith.constant dense<0.000000e+00> : vector<256x384xf32>
    %13 = tpu.matmul %11, %12, %cst_13 {dimension_numbers = #tpu.dot_dimension_numbers<[1], [0], [0], [1], [0, 0, 1, 1], [], []>} : vector<256x512xf32>, vector<512x384xf32>, vector<256x384xf32> -> vector<256x384xf32>
    %c0_14 = arith.constant 0 : index
    %c0_15 = arith.constant 0 : index
    %14 = vector.load %arg7[%c0_14, %c0_15] : memref<1x384xf32, #tpu.memory_space<vmem>>, vector<1x384xf32>
    %15 = vector.broadcast %14 : vector<1x384xf32> to vector<256x384xf32>
    %16 = arith.addf %13, %15 : vector<256x384xf32>
    %cst_16 = arith.constant 0.000000e+00 : f32
    %17 = vector.broadcast %cst_16 : f32 to vector<256x384xf32>
    %18 = arith.maximumf %16, %17 : vector<256x384xf32>
    %c0_17 = arith.constant 0 : index
    %c0_18 = arith.constant 0 : index
    %19 = vector.load %arg8[%c0_17, %c0_18] : memref<1x384xf32, #tpu.memory_space<vmem>>, vector<1x384xf32>
    %20 = vector.broadcast %19 : vector<1x384xf32> to vector<256x384xf32>
    %21 = arith.mulf %18, %20 : vector<256x384xf32>
    %cst_19 = arith.constant dense<0.000000e+00> : vector<256xf32>
    %22 = vector.multi_reduction <add>, %21, %cst_19 [1] : vector<256x384xf32> to vector<256xf32>
    %23 = vector.shape_cast %22 : vector<256xf32> to vector<256x1xf32>
    %c0_20 = arith.constant 0 : index
    %c0_21 = arith.constant 0 : index
    %24 = vector.load %arg9[%c0_20, %c0_21] : memref<1x1xf32, #tpu.memory_space<vmem>>, vector<1x1xf32>
    %25 = vector.broadcast %24 : vector<1x1xf32> to vector<256x1xf32>
    %26 = arith.addf %23, %25 : vector<256x1xf32>
    %c0_22 = arith.constant 0 : index
    %c0_23 = arith.constant 0 : index
    %27 = vector.load %arg10[%c0_22, %c0_23] : memref<256x1xf32, #tpu.memory_space<vmem>>, vector<256x1xf32>
    tpu.vector_store %arg10[%c0_22, %c0_23], %26 {strides = array<i32>} : memref<256x1xf32, #tpu.memory_space<vmem>>, vector<256x1xf32>,
    return
  }
  func.func @transform_0(%arg0: i32) -> (i32, i32) {
    %c0_i32 = arith.constant 0 : i32
    %c0_i32_0 = arith.constant 0 : i32
    return %arg0, %c0_i32 : i32, i32
  }
  func.func @transform_1(%arg0: i32) -> (i32, i32) {
    %c0_i32 = arith.constant 0 : i32
    %c0_i32_0 = arith.constant 0 : i32
    return %arg0, %c0_i32 : i32, i32
  }
  func.func @transform_2(%arg0: i32) -> (i32, i32) {
    %c0_i32 = arith.constant 0 : i32
    %c0_i32_0 = arith.constant 0 : i32
    %c0_i32_1 = arith.constant 0 : i32
    return %c0_i32, %c0_i32_0 : i32, i32
  }
  func.func @transform_3(%arg0: i32) -> (i32, i32) {
    %c0_i32 = arith.constant 0 : i32
    %c0_i32_0 = arith.constant 0 : i32
    %c0_i32_1 = arith.constant 0 : i32
    return %c0_i32, %c0_i32_0 : i32, i32
  }
  func.func @transform_4(%arg0: i32) -> (i32, i32) {
    %c0_i32 = arith.constant 0 : i32
    %c0_i32_0 = arith.constant 0 : i32
    %c0_i32_1 = arith.constant 0 : i32
    return %c0_i32, %c0_i32_0 : i32, i32
  }
  func.func @transform_5(%arg0: i32) -> (i32, i32) {
    %c0_i32 = arith.constant 0 : i32
    %c0_i32_0 = arith.constant 0 : i32
    %c0_i32_1 = arith.constant 0 : i32
    return %c0_i32, %c0_i32_0 : i32, i32
  }
  func.func @transform_6(%arg0: i32) -> (i32, i32) {
    %c0_i32 = arith.constant 0 : i32
    %c0_i32_0 = arith.constant 0 : i32
    %c0_i32_1 = arith.constant 0 : i32
    return %c0_i32, %c0_i32_0 : i32, i32
  }
  func.func @transform_7(%arg0: i32) -> (i32, i32) {
    %c0_i32 = arith.constant 0 : i32
    %c0_i32_0 = arith.constant 0 : i32
    %c0_i32_1 = arith.constant 0 : i32
    return %c0_i32, %c0_i32_0 : i32, i32
  }
  func.func @transform_8(%arg0: i32) -> (i32, i32) {
    %c0_i32 = arith.constant 0 : i32
    %c0_i32_0 = arith.constant 0 : i32
    %c0_i32_1 = arith.constant 0 : i32
    return %c0_i32, %c0_i32_0 : i32, i32
  }
  func.func @transform_9(%arg0: i32) -> (i32, i32) {
    %c0_i32 = arith.constant 0 : i32
    %c0_i32_0 = arith.constant 0 : i32
    return %arg0, %c0_i32 : i32, i32
  }
}

</mosaic_0001>

<bundles_post_ra>
// kernel: tpu_custom_call.1
= control target key start
LH: loop header
LB: loop body
LE: loop exit
PB: predicated region body
PF: predicated region fallthrough
CT: control target
= control target key end

     0   :  { %s5936_s0 = inlined_call_operand.vmem [shape: f32[256,17], index: 0, kind: input, shape index: {}]   ;;  %s5937_s1 = inlined_call_operand.vmem [shape: f32[256,6], index: 1, kind: input, shape index: {}]   ;;  %s5938_s2 = inlined_call_operand.vmem [shape: f32[17,512], index: 2, kind: input, shape index: {}]   ;;  %s5939_s3 = inlined_call_operand.vmem [shape: f32[6,512], index: 3, kind: input, shape index: {}]   ;;  %s5940_s4 = inlined_call_operand.vmem [shape: f32[1,512], index: 4, kind: input, shape index: {}]   ;;  %s5941_s5 = inlined_call_operand.hbm [shape: f32[512,384], index: 5, kind: input, shape index: {}]   ;;  %s5942_s6 = inlined_call_operand.vmem [shape: f32[1,384], index: 6, kind: input, shape index: {}]   ;;  %s5943_s7 = inlined_call_operand.vmem [shape: f32[1,384], index: 7, kind: input, shape index: {}]   ;;  %s5944_s8 = inlined_call_operand.<no memory space> [shape: f32[1,1], index: 8, kind: input, shape index: {}]   ;;  %s5945_s9 = inlined_call_operand.vmem [shape: f32[256,1], index: 9, kind: output, shape index: {}]  }
   0x1   :  { %v14_v0 = vstv %s5944_s8 }
   0x2   :  { %15 = vst [vmem:[#allocation2] sm:$0x1] %v14_v0 }
   0x3   :  { %16 = vsyncpa [#allocation4], 0  ;;  %s3404_s11 = smov [#allocation3]  }
   0x4   :  { %s32_s12 = sshll.u32 %s3404_s11, 4  ;;  %s33_s12 = int_to_ptr.vmem [resolvable:$true] %s32_s12 }
   0x5   :  { %s3390_s13 = scalar_lea.vmem %s33_s12, 24576  ;;  %p3395_p1 = scmp.lt.s32.totalorder %s33_s12, %s33_s12 }
   0x6   :  { %p3391_p0 = scmp.ne.s32.totalorder %s33_s12, %s3390_s13  ;;  %p3396_p2 = scmp.lt.s32.totalorder %s3390_s13, %s3390_s13 }
   0x8   :  { %p3397_p3 = por %p3396_p2, %p3395_p1 }
   0xa   :  { %p3398_p4 = pnand %p3397_p3, %p3391_p0 }
   0xc   :  { %3401 = shalt.err (!%p3398_p4)
}
   0xd   :  { %s3405_s14 = smov 384   ;;  %s3406_s15 = smov 24  }
   0xe   :  { %38 = dma.hbm_to_vmem [thread:$0]  %s5941_s5, 24576, %s33_s12, [#allocation4], %s3405_s14, %s3405_s14, %s3406_s15  }
   0xf   :  { %3402 = dma.done.wait [#allocation4], 24576  }
  0x10   :  { %3403 = vsyncadd [#allocation4], 4294942720  ;;  %v5946_v1 = vmov 0.0   ;;  %vm225_vm0 = vcmask 1045504   ;;  %vm128_vm1 = vcmask 48128   ;;  %v80_v6 = vld [vmem:[%s5937_s1] sm:$0xff] }
  0x11   :  { %302 = vmatprep.mubr.f32.mxu0 %v5946_v1  ;;  %559 = vmatprep.mubr.f32.mxu1 %v5946_v1  ;;  %v125_v2 = vld [vmem:[%s5939_s3 + $0x8] sm:$0x3f]  ;;  %v127_v3 = vld [vmem:[%s5939_s3 + $0x18] sm:$0x3f]  ;;  %v124_v4 = vld [vmem:[%s5939_s3] sm:$0x3f] }
  0x12   :  { %3241 = vmatprep.subr.msk.mxu0 %vm225_vm0, %v125_v2  ;;  %3275 = vmatprep.subr.msk.mxu1 %vm225_vm0, %v127_v3  ;;  %v126_v5 = vld [vmem:[%s5939_s3 + $0x10] sm:$0x3f]  ;;  %v121_v7 = vld [vmem:[%s5938_s2 + $0x48] sm:$0x1]  ;;  %vm849_vm2 = vcmask 1040384   ;;  %v116_v13 = vld [vmem:[%s5938_s2 + $0x20] sm:$0xff] }
  0x13   :  { %3242 = vmatpush1.msk.msra.mxu0 %vm225_vm0, %v124_v4  ;;  %3276 = vmatpush1.msk.msra.mxu1 %vm225_vm0, %v126_v5  ;;  %v120_v8 = vld [vmem:[%s5938_s2 + $0x40] sm:$0x1]  ;;  %v123_v9 = vld [vmem:[%s5938_s2 + $0x58] sm:$0x1]  ;;  %v122_v10 = vld [vmem:[%s5938_s2 + $0x50] sm:$0x1] }
  0x14   :  { %3243 = vmatmul.mubr.msk.f32.vlgmr.msra.gmra.mxu0 %vm128_vm1, %v80_v6  ;;  %3277 = vmatmul.mubr.msk.f32.vlgmr.msra.gmra.mxu1 %vm128_vm1, %v80_v6  ;;  %v81_v11 = vld [vmem:[%s5937_s1 + $0x8] sm:$0xff]  ;;  %v119_v14 = vld [vmem:[%s5938_s2 + $0x38] sm:$0xff]  ;;  %v118_v15 = vld [vmem:[%s5938_s2 + $0x30] sm:$0xff]  ;;  %vm752_vm3 = vcmask 138240   ;;  %vm3203_vm4 = vcmask 7168  }
  0x15   :  { %3309 = vmatprep.subr.msk.mxu0 %vm849_vm2, %v121_v7  ;;  %3343 = vmatprep.subr.msk.mxu1 %vm849_vm2, %v123_v9  ;;  %v117_v12 = vld [vmem:[%s5938_s2 + $0x28] sm:$0xff]  ;;  %v82_v16 = vld [vmem:[%s5937_s1 + $0x10] sm:$0xff]  ;;  %v112_v18 = vld [vmem:[%s5938_s2] sm:$0xff] }
  0x16   :  { %3310 = vmatpush1.msk.msra.mxu0 %vm849_vm2, %v120_v8  ;;  %308 = vmatprep.mubr.f32.mxu0 %v5946_v1  ;;  %v113_v17 = vld [vmem:[%s5938_s2 + $0x8] sm:$0xff]  ;;  %v83_v19 = vld [vmem:[%s5937_s1 + $0x18] sm:$0xff]  ;;  %v114_v21 = vld [vmem:[%s5938_s2 + $0x10] sm:$0xff] }
  0x17   :  { %565 = vmatprep.mubr.f32.mxu1 %v5946_v1  ;;  %3344 = vmatpush1.msk.msra.mxu1 %vm849_vm2, %v122_v10  ;;  %v115_v20 = vld [vmem:[%s5938_s2 + $0x18] sm:$0xff]  ;;  %v84_v22 = vld [vmem:[%s5937_s1 + $0x20] sm:$0xff]  ;;  %v85_v23 = vld [vmem:[%s5937_s1 + $0x28] sm:$0xff] }
  0x18   :  { %3244 = vmatmul.mubr.msk.f32.gmra.mxu0 %vm128_vm1, %v81_v11  ;;  %3278 = vmatmul.mubr.msk.f32.gmra.mxu1 %vm128_vm1, %v81_v11  ;;  %v86_v24 = vld [vmem:[%s5937_s1 + $0x30] sm:$0xff]  ;;  %v87_v25 = vld [vmem:[%s5937_s1 + $0x38] sm:$0xff]  ;;  %v88_v26 = vld [vmem:[%s5937_s1 + $0x40] sm:$0xff] }
  0x19   :  { %314 = vmatprep.mubr.f32.mxu0 %v5946_v1  ;;  %571 = vmatprep.mubr.f32.mxu1 %v5946_v1  ;;  %v89_v27 = vld [vmem:[%s5937_s1 + $0x48] sm:$0xff]  ;;  %v90_v28 = vld [vmem:[%s5937_s1 + $0x50] sm:$0xff]  ;;  %v91_v29 = vld [vmem:[%s5937_s1 + $0x58] sm:$0xff] }
  0x1a   :  { %890 = vmatprep.subr.mxu0 %v117_v12  ;;  %1147 = vmatprep.subr.mxu1 %v119_v14  ;;  %v92_v30 = vld [vmem:[%s5937_s1 + $0x60] sm:$0xff]  ;;  %v93_v31 = vld [vmem:[%s5937_s1 + $0x68] sm:$0xff]  ;;  %v94_v32 = vld [vmem:[%s5937_s1 + $0x70] sm:$0xff] }
  0x1b   :  { %891 = vmatpush1.msra.mxu0 %v116_v13  ;;  %1148 = vmatpush1.msra.mxu1 %v118_v15  ;;  %v95_v33 = vld [vmem:[%s5937_s1 + $0x78] sm:$0xff]  ;;  %v96_v34 = vld [vmem:[%s5937_s1 + $0x80] sm:$0xff]  ;;  %v97_v35 = vld [vmem:[%s5937_s1 + $0x88] sm:$0xff] }
  0x1c   :  { %3245 = vmatmul.mubr.msk.f32.gmra.mxu0 %vm128_vm1, %v82_v16  ;;  %3279 = vmatmul.mubr.msk.f32.gmra.mxu1 %vm128_vm1, %v82_v16  ;;  %v98_v36 = vld [vmem:[%s5937_s1 + $0x90] sm:$0xff]  ;;  %v99_v37 = vld [vmem:[%s5937_s1 + $0x98] sm:$0xff]  ;;  %v100_v40 = vld [vmem:[%s5937_s1 + $0xa0] sm:$0xff] }
  0x1d   :  { %320 = vmatprep.mubr.f32.mxu0 %v5946_v1  ;;  %577 = vmatprep.mubr.f32.mxu1 %v5946_v1  ;;  %v1700_v38 = vld [vmem:[#allocation3 + $0x170] sm:$0xff]  ;;  %v101_v41 = vld [vmem:[%s5937_s1 + $0xa8] sm:$0xff]  ;;  %v104_v44 = vld [vmem:[%s5937_s1 + $0xc0] sm:$0xff] }
  0x1e   :  { %892 = vmatprep.subr.mxu0 %v113_v17  ;;  %1149 = vmatprep.subr.mxu1 %v115_v20  ;;  %v1796_v39 = vld [vmem:[#allocation3 + $0x470] sm:$0xff]  ;;  %v105_v45 = vld [vmem:[%s5937_s1 + $0xc8] sm:$0xff]  ;;  %v108_v48 = vld [vmem:[%s5937_s1 + $0xe0] sm:$0xff] }
  0x1f   :  { %893 = vmatpush1.msra.mxu0 %v112_v18  ;;  %1150 = vmatpush1.msra.mxu1 %v114_v21  ;;  %v102_v42 = vld [vmem:[%s5937_s1 + $0xb0] sm:$0xff]  ;;  %v103_v43 = vld [vmem:[%s5937_s1 + $0xb8] sm:$0xff]  ;;  %v109_v49 = vld [vmem:[%s5937_s1 + $0xe8] sm:$0xff] }
  0x20   :  { %3246 = vmatmul.mubr.msk.f32.gmra.mxu0 %vm128_vm1, %v83_v19  ;;  %3280 = vmatmul.mubr.msk.f32.gmra.mxu1 %vm128_vm1, %v83_v19  ;;  %v106_v46 = vld [vmem:[%s5937_s1 + $0xd0] sm:$0xff]  ;;  %v107_v47 = vld [vmem:[%s5937_s1 + $0xd8] sm:$0xff]  ;;  %v48_v52 = vld [vmem:[%s5936_s0] sm:$0xff] }
  0x21   :  { %326 = vmatprep.mubr.f32.mxu0 %v5946_v1  ;;  %583 = vmatprep.mubr.f32.mxu1 %v5946_v1  ;;  %v110_v50 = vld [vmem:[%s5937_s1 + $0xf0] sm:$0xff]  ;;  %v111_v51 = vld [vmem:[%s5937_s1 + $0xf8] sm:$0xff]  ;;  %v49_v57 = vld [vmem:[%s5936_s0 + $0x8] sm:$0xff] }
  0x22   :  { %1863 = vmatprep.subr.mxu0 %v1700_v38  ;;  %2120 = vmatprep.subr.mxu1 %v1796_v39  ;;  %v1699_v53 = vld [vmem:[#allocation3 + $0x168] sm:$0xff]  ;;  %v1697_v55 = vld [vmem:[#allocation3 + $0x158] sm:$0xff]  ;;  %v1696_v58 = vld [vmem:[#allocation3 + $0x150] sm:$0xff] }
  0x23   :  { %v1795_v54 = vld [vmem:[#allocation3 + $0x468] sm:$0xff]  ;;  %v1793_v56 = vld [vmem:[#allocation3 + $0x458] sm:$0xff]  ;;  %v1792_v59 = vld [vmem:[#allocation3 + $0x450] sm:$0xff] }
  0x24   :  { %3247 = vmatmul.mubr.msk.f32.gmra.mxu0 %vm128_vm1, %v84_v22  ;;  %3281 = vmatmul.mubr.msk.f32.gmra.mxu1 %vm128_vm1, %v84_v22  ;;  %v1694_v60 = vld [vmem:[#allocation3 + $0x140] sm:$0xff]  ;;  %v50_v62 = vld [vmem:[%s5936_s0 + $0x10] sm:$0xff]  ;;  %v1693_v63 = vld [vmem:[#allocation3 + $0x138] sm:$0xff] }
  0x25   :  { %332 = vmatprep.mubr.f32.mxu0 %v5946_v1  ;;  %589 = vmatprep.mubr.f32.mxu1 %v5946_v1  ;;  %v1790_v61 = vld [vmem:[#allocation3 + $0x440] sm:$0xff]  ;;  %v1789_v0 = vld [vmem:[#allocation3 + $0x438] sm:$0xff]  ;;  %v1691_v2 = vld [vmem:[#allocation3 + $0x128] sm:$0xff] }
  0x26   :  { %v1787_v3 = vld [vmem:[#allocation3 + $0x428] sm:$0xff]  ;;  %v51_v4 = vld [vmem:[%s5936_s0 + $0x18] sm:$0xff]  ;;  %v1690_v5 = vld [vmem:[#allocation3 + $0x120] sm:$0xff] }
  0x27   :  { %v1786_v6 = vld [vmem:[#allocation3 + $0x420] sm:$0xff]  ;;  %v1688_v7 = vld [vmem:[#allocation3 + $0x110] sm:$0xff]  ;;  %v1687_v10 = vld [vmem:[#allocation3 + $0x108] sm:$0xff] }
  0x28   :  { %3248 = vmatmul.mubr.msk.f32.gmra.mxu0 %vm128_vm1, %v85_v23  ;;  %3282 = vmatmul.mubr.msk.f32.gmra.mxu1 %vm128_vm1, %v85_v23  ;;  %v1784_v8 = vld [vmem:[#allocation3 + $0x410] sm:$0xff]  ;;  %v52_v9 = vld [vmem:[%s5936_s0 + $0x20] sm:$0xff]  ;;  %v1783_v11 = vld [vmem:[#allocation3 + $0x408] sm:$0xff] }
  0x29   :  { %338 = vmatprep.mubr.f32.mxu0 %v5946_v1  ;;  %595 = vmatprep.mubr.f32.mxu1 %v5946_v1  ;;  %v1685_v12 = vld [vmem:[#allocation3 + $0xf8] sm:$0xff]  ;;  %v53_v14 = vld [vmem:[%s5936_s0 + $0x28] sm:$0xff]  ;;  %v1684_v15 = vld [vmem:[#allocation3 + $0xf0] sm:$0xff] }
  0x2a   :  { %v1781_v13 = vld [vmem:[#allocation3 + $0x3f8] sm:$0xff]  ;;  %v1780_v16 = vld [vmem:[#allocation3 + $0x3f0] sm:$0xff]  ;;  %v1682_v17 = vld [vmem:[#allocation3 + $0xe0] sm:$0xff] }
  0x2b   :  { %v1778_v18 = vld [vmem:[#allocation3 + $0x3e0] sm:$0xff]  ;;  %v54_v19 = vld [vmem:[%s5936_s0 + $0x30] sm:$0xff]  ;;  %v1681_v20 = vld [vmem:[#allocation3 + $0xd8] sm:$0xff] }
  0x2c   :  { %3249 = vmatmul.mubr.msk.f32.gmra.mxu0 %vm128_vm1, %v86_v24  ;;  %3283 = vmatmul.mubr.msk.f32.gmra.mxu1 %vm128_vm1, %v86_v24  ;;  %v1777_v21 = vld [vmem:[#allocation3 + $0x3d8] sm:$0xff]  ;;  %v1679_v22 = vld [vmem:[#allocation3 + $0xc8] sm:$0xff]  ;;  %v1766_v38 = vld [vmem:[#allocation3 + $0x380] sm:$0xff] }
  0x2d   :  { %344 = vmatprep.mubr.f32.mxu0 %v5946_v1  ;;  %601 = vmatprep.mubr.f32.mxu1 %v5946_v1  ;;  %v1775_v23 = vld [vmem:[#allocation3 + $0x3c8] sm:$0xff]  ;;  %v55_v24 = vld [vmem:[%s5936_s0 + $0x38] sm:$0xff] }
  0x2e   :  { %v58_v39 = vld [vmem:[%s5936_s0 + $0x50] sm:$0xff] }
  0x30   :  { %3250 = vmatmul.mubr.msk.f32.gmra.mxu0 %vm128_vm1, %v87_v25  ;;  %3284 = vmatmul.mubr.msk.f32.gmra.mxu1 %vm128_vm1, %v87_v25  ;;  %v1678_v25 = vld [vmem:[#allocation3 + $0xc0] sm:$0xff] }
  0x31   :  { %350 = vmatprep.mubr.f32.mxu0 %v5946_v1  ;;  %607 = vmatprep.mubr.f32.mxu1 %v5946_v1 }
  0x34   :  { %3251 = vmatmul.mubr.msk.f32.gmra.mxu0 %vm128_vm1, %v88_v26  ;;  %3285 = vmatmul.mubr.msk.f32.gmra.mxu1 %vm128_vm1, %v88_v26  ;;  %v1774_v26 = vld [vmem:[#allocation3 + $0x3c0] sm:$0xff] }
  0x35   :  { %356 = vmatprep.mubr.f32.mxu0 %v5946_v1  ;;  %613 = vmatprep.mubr.f32.mxu1 %v5946_v1 }
  0x38   :  { %3252 = vmatmul.mubr.msk.f32.gmra.mxu0 %vm128_vm1, %v89_v27  ;;  %3286 = vmatmul.mubr.msk.f32.gmra.mxu1 %vm128_vm1, %v89_v27  ;;  %v1676_v27 = vld [vmem:[#allocation3 + $0xb0] sm:$0xff] }
  0x39   :  { %362 = vmatprep.mubr.f32.mxu0 %v5946_v1  ;;  %619 = vmatprep.mubr.f32.mxu1 %v5946_v1 }
  0x3c   :  { %3253 = vmatmul.mubr.msk.f32.gmra.mxu0 %vm128_vm1, %v90_v28  ;;  %3287 = vmatmul.mubr.msk.f32.gmra.mxu1 %vm128_vm1, %v90_v28  ;;  %v1772_v28 = vld [vmem:[#allocation3 + $0x3b0] sm:$0xff] }
  0x3d   :  { %368 = vmatprep.mubr.f32.mxu0 %v5946_v1  ;;  %625 = vmatprep.mubr.f32.mxu1 %v5946_v1 }
  0x40   :  { %3254 = vmatmul.mubr.msk.f32.gmra.mxu0 %vm128_vm1, %v91_v29  ;;  %3288 = vmatmul.mubr.msk.f32.gmra.mxu1 %vm128_vm1, %v91_v29  ;;  %v56_v29 = vld [vmem:[%s5936_s0 + $0x40] sm:$0xff] }
  0x41   :  { %374 = vmatprep.mubr.f32.mxu0 %v5946_v1  ;;  %631 = vmatprep.mubr.f32.mxu1 %v5946_v1 }
  0x44   :  { %3255 = vmatmul.mubr.msk.f32.gmra.mxu0 %vm128_vm1, %v92_v30  ;;  %3289 = vmatmul.mubr.msk.f32.gmra.mxu1 %vm128_vm1, %v92_v30  ;;  %v1675_v30 = vld [vmem:[#allocation3 + $0xa8] sm:$0xff] }
  0x45   :  { %380 = vmatprep.mubr.f32.mxu0 %v5946_v1  ;;  %637 = vmatprep.mubr.f32.mxu1 %v5946_v1 }
  0x48   :  { %3256 = vmatmul.mubr.msk.f32.gmra.mxu0 %vm128_vm1, %v93_v31  ;;  %3290 = vmatmul.mubr.msk.f32.gmra.mxu1 %vm128_vm1, %v93_v31  ;;  %v1771_v31 = vld [vmem:[#allocation3 + $0x3a8] sm:$0xff] }
  0x49   :  { %386 = vmatprep.mubr.f32.mxu0 %v5946_v1  ;;  %643 = vmatprep.mubr.f32.mxu1 %v5946_v1 }
  0x4c   :  { %3257 = vmatmul.mubr.msk.f32.gmra.mxu0 %vm128_vm1, %v94_v32  ;;  %3291 = vmatmul.mubr.msk.f32.gmra.mxu1 %vm128_vm1, %v94_v32  ;;  %v1673_v32 = vld [vmem:[#allocation3 + $0x98] sm:$0xff] }
  0x4d   :  { %392 = vmatprep.mubr.f32.mxu0 %v5946_v1  ;;  %649 = vmatprep.mubr.f32.mxu1 %v5946_v1 }
  0x50   :  { %3258 = vmatmul.mubr.msk.f32.gmra.mxu0 %vm128_vm1, %v95_v33  ;;  %3292 = vmatmul.mubr.msk.f32.gmra.mxu1 %vm128_vm1, %v95_v33  ;;  %v1769_v33 = vld [vmem:[#allocation3 + $0x398] sm:$0xff] }
  0x51   :  { %398 = vmatprep.mubr.f32.mxu0 %v5946_v1  ;;  %655 = vmatprep.mubr.f32.mxu1 %v5946_v1 }
  0x54   :  { %3259 = vmatmul.mubr.msk.f32.gmra.mxu0 %vm128_vm1, %v96_v34  ;;  %3293 = vmatmul.mubr.msk.f32.gmra.mxu1 %vm128_vm1, %v96_v34  ;;  %v57_v34 = vld [vmem:[%s5936_s0 + $0x48] sm:$0xff] }
  0x55   :  { %404 = vmatprep.mubr.f32.mxu0 %v5946_v1  ;;  %661 = vmatprep.mubr.f32.mxu1 %v5946_v1 }
  0x58   :  { %3260 = vmatmul.mubr.msk.f32.gmra.mxu0 %vm128_vm1, %v97_v35  ;;  %3294 = vmatmul.mubr.msk.f32.gmra.mxu1 %vm128_vm1, %v97_v35  ;;  %v1672_v35 = vld [vmem:[#allocation3 + $0x90] sm:$0xff] }
  0x59   :  { %410 = vmatprep.mubr.f32.mxu0 %v5946_v1  ;;  %667 = vmatprep.mubr.f32.mxu1 %v5946_v1 }
  0x5c   :  { %3261 = vmatmul.mubr.msk.f32.gmra.mxu0 %vm128_vm1, %v98_v36  ;;  %3295 = vmatmul.mubr.msk.f32.gmra.mxu1 %vm128_vm1, %v98_v36  ;;  %v1768_v36 = vld [vmem:[#allocation3 + $0x390] sm:$0xff] }
  0x5d   :  { %416 = vmatprep.mubr.f32.mxu0 %v5946_v1  ;;  %673 = vmatprep.mubr.f32.mxu1 %v5946_v1 }
  0x60   :  { %3262 = vmatmul.mubr.msk.f32.gmra.mxu0 %vm128_vm1, %v99_v37  ;;  %3296 = vmatmul.mubr.msk.f32.gmra.mxu1 %vm128_vm1, %v99_v37  ;;  %v1670_v37 = vld [vmem:[#allocation3 + $0x80] sm:$0xff] }
  0x61   :  { %422 = vmatprep.mubr.f32.mxu0 %v5946_v1  ;;  %679 = vmatprep.mubr.f32.mxu1 %v5946_v1 }
  0x64   :  { %3263 = vmatmul.mubr.msk.f32.gmra.mxu0 %vm128_vm1, %v100_v40  ;;  %3297 = vmatmul.mubr.msk.f32.gmra.mxu1 %vm128_vm1, %v100_v40  ;;  %v1669_v40 = vld [vmem:[#allocation3 + $0x78] sm:$0xff] }
  0x65   :  { %428 = vmatprep.mubr.f32.mxu0 %v5946_v1  ;;  %685 = vmatprep.mubr.f32.mxu1 %v5946_v1 }
  0x68   :  { %3264 = vmatmul.mubr.msk.f32.gmra.mxu0 %vm128_vm1, %v101_v41  ;;  %3298 = vmatmul.mubr.msk.f32.gmra.mxu1 %vm128_vm1, %v101_v41  ;;  %v1765_v41 = vld [vmem:[#allocation3 + $0x378] sm:$0xff] }
  0x69   :  { %434 = vmatprep.mubr.f32.mxu0 %v5946_v1  ;;  %691 = vmatprep.mubr.f32.mxu1 %v5946_v1 }
  0x6c   :  { %3265 = vmatmul.mubr.msk.f32.gmra.mxu0 %vm128_vm1, %v102_v42  ;;  %3299 = vmatmul.mubr.msk.f32.gmra.mxu1 %vm128_vm1, %v102_v42  ;;  %v1667_v42 = vld [vmem:[#allocation3 + $0x68] sm:$0xff] }
  0x6d   :  { %440 = vmatprep.mubr.f32.mxu0 %v5946_v1  ;;  %697 = vmatprep.mubr.f32.mxu1 %v5946_v1 }
  0x70   :  { %3266 = vmatmul.mubr.msk.f32.gmra.mxu0 %vm128_vm1, %v103_v43  ;;  %3300 = vmatmul.mubr.msk.f32.gmra.mxu1 %vm128_vm1, %v103_v43  ;;  %v1763_v43 = vld [vmem:[#allocation3 + $0x368] sm:$0xff] }
  0x71   :  { %446 = vmatprep.mubr.f32.mxu0 %v5946_v1  ;;  %703 = vmatprep.mubr.f32.mxu1 %v5946_v1 }
  0x74   :  { %3267 = vmatmul.mubr.msk.f32.gmra.mxu0 %vm128_vm1, %v104_v44  ;;  %3301 = vmatmul.mubr.msk.f32.gmra.mxu1 %vm128_vm1, %v104_v44  ;;  %v59_v44 = vld [vmem:[%s5936_s0 + $0x58] sm:$0xff] }
  0x75   :  { %452 = vmatprep.mubr.f32.mxu0 %v5946_v1  ;;  %709 = vmatprep.mubr.f32.mxu1 %v5946_v1 }
  0x78   :  { %3268 = vmatmul.mubr.msk.f32.gmra.mxu0 %vm128_vm1, %v105_v45  ;;  %3302 = vmatmul.mubr.msk.f32.gmra.mxu1 %vm128_vm1, %v105_v45  ;;  %v1666_v45 = vld [vmem:[#allocation3 + $0x60] sm:$0xff] }
  0x79   :  { %458 = vmatprep.mubr.f32.mxu0 %v5946_v1  ;;  %715 = vmatprep.mubr.f32.mxu1 %v5946_v1 }
  0x7c   :  { %3269 = vmatmul.mubr.msk.f32.gmra.mxu0 %vm128_vm1, %v106_v46  ;;  %3303 = vmatmul.mubr.msk.f32.gmra.mxu1 %vm128_vm1, %v106_v46  ;;  %v1762_v46 = vld [vmem:[#allocation3 + $0x360] sm:$0xff] }
  0x7d   :  { %464 = vmatprep.mubr.f32.mxu0 %v5946_v1  ;;  %721 = vmatprep.mubr.f32.mxu1 %v5946_v1 }
  0x80   :  { %3270 = vmatmul.mubr.msk.f32.gmra.mxu0 %vm128_vm1, %v107_v47  ;;  %3304 = vmatmul.mubr.msk.f32.gmra.mxu1 %vm128_vm1, %v107_v47  ;;  %v1664_v47 = vld [vmem:[#allocation3 + $0x50] sm:$0xff] }
  0x81   :  { %470 = vmatprep.mubr.f32.mxu0 %v5946_v1  ;;  %727 = vmatprep.mubr.f32.mxu1 %v5946_v1 }
  0x84   :  { %3271 = vmatmul.mubr.msk.f32.gmra.mxu0 %vm128_vm1, %v108_v48  ;;  %3305 = vmatmul.mubr.msk.f32.gmra.mxu1 %vm128_vm1, %v108_v48  ;;  %v1760_v48 = vld [vmem:[#allocation3 + $0x350] sm:$0xff] }
  0x85   :  { %476 = vmatprep.mubr.f32.mxu0 %v5946_v1  ;;  %733 = vmatprep.mubr.f32.mxu1 %v5946_v1 }
  0x88   :  { %3272 = vmatmul.mubr.msk.f32.gmra.mxu0 %vm128_vm1, %v109_v49  ;;  %3306 = vmatmul.mubr.msk.f32.gmra.mxu1 %vm128_vm1, %v109_v49  ;;  %v60_v49 = vld [vmem:[%s5936_s0 + $0x60] sm:$0xff] }
  0x89   :  { %482 = vmatprep.mubr.f32.mxu0 %v5946_v1  ;;  %739 = vmatprep.mubr.f32.mxu1 %v5946_v1 }
  0x8c   :  { %3273 = vmatmul.mubr.msk.f32.gmra.mxu0 %vm128_vm1, %v110_v50  ;;  %3307 = vmatmul.mubr.msk.f32.gmra.mxu1 %vm128_vm1, %v110_v50  ;;  %v1663_v50 = vld [vmem:[#allocation3 + $0x48] sm:$0xff] }
  0x8d   :  { %488 = vmatprep.mubr.f32.mxu0 %v5946_v1  ;;  %745 = vmatprep.mubr.f32.mxu1 %v5946_v1 }
  0x90   :  { %3274 = vmatmul.mubr.msk.f32.gmra.mxu0 %vm128_vm1, %v111_v51  ;;  %3308 = vmatmul.mubr.msk.f32.gmra.mxu1 %vm128_vm1, %v111_v51  ;;  %v1759_v51 = vld [vmem:[#allocation3 + $0x348] sm:$0xff] }
  0x91   :  { %926 = vmatprep.mubr.f32.mxu0 %v5946_v1  ;;  %1183 = vmatprep.mubr.f32.mxu1 %v5946_v1 }
  0x94   :  { %3311 = vmatmul.mubr.msk.f32.vlgmr.msra.gmra.mxu0 %vm752_vm3, %v48_v52  ;;  %3345 = vmatmul.mubr.msk.f32.vlgmr.msra.gmra.mxu1 %vm752_vm3, %v48_v52  ;;  %v1661_v52 = vld [vmem:[#allocation3 + $0x38] sm:$0xff] }
  0x95   :  { %932 = vmatprep.mubr.f32.mxu0 %v5946_v1  ;;  %1189 = vmatprep.mubr.f32.mxu1 %v5946_v1 }
  0x96   :  { %1864 = vmatpush1.msra.mxu0 %v1699_v53  ;;  %2121 = vmatpush1.msra.mxu1 %v1795_v54  ;;  %v1757_v53 = vld [vmem:[#allocation3 + $0x338] sm:$0xff]  ;;  %v61_v54 = vld [vmem:[%s5936_s0 + $0x68] sm:$0xff] }
  0x97   :  { %1865 = vmatprep.subr.mxu0 %v1697_v55  ;;  %2122 = vmatprep.subr.mxu1 %v1793_v56  ;;  %v1660_v55 = vld [vmem:[#allocation3 + $0x30] sm:$0xff] }
  0x98   :  { %3312 = vmatmul.mubr.msk.f32.gmra.mxu0 %vm752_vm3, %v49_v57  ;;  %3346 = vmatmul.mubr.msk.f32.gmra.mxu1 %vm752_vm3, %v49_v57  ;;  %v1756_v56 = vld [vmem:[#allocation3 + $0x330] sm:$0xff]  ;;  %v1658_v57 = vld [vmem:[#allocation3 + $0x20] sm:$0xff] }
  0x99   :  { %938 = vmatprep.mubr.f32.mxu0 %v5946_v1  ;;  %1195 = vmatprep.mubr.f32.mxu1 %v5946_v1 }
  0x9a   :  { %1866 = vmatpush1.msra.mxu0 %v1696_v58  ;;  %2123 = vmatpush1.msra.mxu1 %v1792_v59  ;;  %v1754_v58 = vld [vmem:[#allocation3 + $0x320] sm:$0xff]  ;;  %v62_v59 = vld [vmem:[%s5936_s0 + $0x70] sm:$0xff] }
  0x9b   :  { %1867 = vmatprep.subr.mxu0 %v1694_v60  ;;  %2124 = vmatprep.subr.mxu1 %v1790_v61  ;;  %v1657_v60 = vld [vmem:[#allocation3 + $0x18] sm:$0xff] }
  0x9c   :  { %3313 = vmatmul.mubr.msk.f32.gmra.mxu0 %vm752_vm3, %v50_v62  ;;  %3347 = vmatmul.mubr.msk.f32.gmra.mxu1 %vm752_vm3, %v50_v62  ;;  %v1753_v61 = vld [vmem:[#allocation3 + $0x318] sm:$0xff]  ;;  %v1655_v62 = vld [vmem:[#allocation3 + $0x8] sm:$0xff] }
  0x9d   :  { %944 = vmatprep.mubr.f32.mxu0 %v5946_v1  ;;  %1201 = vmatprep.mubr.f32.mxu1 %v5946_v1 }
  0x9e   :  { %1868 = vmatpush1.msra.mxu0 %v1693_v63  ;;  %2125 = vmatpush1.msra.mxu1 %v1789_v0  ;;  %v1751_v63 = vld [vmem:[#allocation3 + $0x308] sm:$0xff]  ;;  %v63_v0 = vld [vmem:[%s5936_s0 + $0x78] sm:$0xff] }
  0x9f   :  { %1869 = vmatprep.subr.mxu0 %v1691_v2  ;;  %2126 = vmatprep.subr.mxu1 %v1787_v3  ;;  %v1654_v2 = vld [vmem:[#allocation3] sm:$0xff] }
  0xa0   :  { %3314 = vmatmul.mubr.msk.f32.gmra.mxu0 %vm752_vm3, %v51_v4  ;;  %3348 = vmatmul.mubr.msk.f32.gmra.mxu1 %vm752_vm3, %v51_v4  ;;  %v1750_v3 = vld [vmem:[#allocation3 + $0x300] sm:$0xff]  ;;  %v1748_v4 = vld [vmem:[#allocation3 + $0x2f0] sm:$0xff] }
  0xa1   :  { %950 = vmatprep.mubr.f32.mxu0 %v5946_v1  ;;  %1207 = vmatprep.mubr.f32.mxu1 %v5946_v1 }
  0xa2   :  { %1870 = vmatpush1.msra.mxu0 %v1690_v5  ;;  %2127 = vmatpush1.msra.mxu1 %v1786_v6  ;;  %v1844_v5 = vld [vmem:[#allocation3 + $0x5f0] sm:$0xff]  ;;  %v64_v6 = vld [vmem:[%s5936_s0 + $0x80] sm:$0xff] }
  0xa3   :  { %1871 = vmatprep.subr.mxu0 %v1688_v7  ;;  %2128 = vmatprep.subr.mxu1 %v1784_v8  ;;  %v1747_v7 = vld [vmem:[#allocation3 + $0x2e8] sm:$0xff] }
  0xa4   :  { %3315 = vmatmul.mubr.msk.f32.gmra.mxu0 %vm752_vm3, %v52_v9  ;;  %3349 = vmatmul.mubr.msk.f32.gmra.mxu1 %vm752_vm3, %v52_v9  ;;  %v1843_v8 = vld [vmem:[#allocation3 + $0x5e8] sm:$0xff] }
  0xa5   :  { %956 = vmatprep.mubr.f32.mxu0 %v5946_v1  ;;  %1213 = vmatprep.mubr.f32.mxu1 %v5946_v1 }
  0xa6   :  { %1872 = vmatpush1.msra.mxu0 %v1687_v10  ;;  %2129 = vmatpush1.msra.mxu1 %v1783_v11  ;;  %v1745_v11 = vld [vmem:[#allocation3 + $0x2d8] sm:$0xff] }
  0xa7   :  { %1873 = vmatprep.subr.mxu0 %v1685_v12  ;;  %2130 = vmatprep.subr.mxu1 %v1781_v13  ;;  %v1841_v12 = vld [vmem:[#allocation3 + $0x5d8] sm:$0xff]  ;;  %v65_v13 = vld [vmem:[%s5936_s0 + $0x88] sm:$0xff] }
  0xa8   :  { %3316 = vmatmul.mubr.msk.f32.gmra.mxu0 %vm752_vm3, %v53_v14  ;;  %3350 = vmatmul.mubr.msk.f32.gmra.mxu1 %vm752_vm3, %v53_v14 }
  0xa9   :  { %962 = vmatprep.mubr.f32.mxu0 %v5946_v1  ;;  %1219 = vmatprep.mubr.f32.mxu1 %v5946_v1 }
  0xaa   :  { %1874 = vmatpush1.msra.mxu0 %v1684_v15  ;;  %2131 = vmatpush1.msra.mxu1 %v1780_v16  ;;  %v1744_v16 = vld [vmem:[#allocation3 + $0x2d0] sm:$0xff] }
  0xab   :  { %1875 = vmatprep.subr.mxu0 %v1682_v17  ;;  %2132 = vmatprep.subr.mxu1 %v1778_v18  ;;  %v1840_v17 = vld [vmem:[#allocation3 + $0x5d0] sm:$0xff] }
  0xac   :  { %3317 = vmatmul.mubr.msk.f32.gmra.mxu0 %vm752_vm3, %v54_v19  ;;  %3351 = vmatmul.mubr.msk.f32.gmra.mxu1 %vm752_vm3, %v54_v19 }
  0xad   :  { %968 = vmatprep.mubr.f32.mxu0 %v5946_v1  ;;  %1225 = vmatprep.mubr.f32.mxu1 %v5946_v1 }
  0xae   :  { %1876 = vmatpush1.msra.mxu0 %v1681_v20  ;;  %2133 = vmatpush1.msra.mxu1 %v1777_v21  ;;  %v1742_v20 = vld [vmem:[#allocation3 + $0x2c0] sm:$0xff] }
  0xaf   :  { %1877 = vmatprep.subr.mxu0 %v1679_v22  ;;  %2134 = vmatprep.subr.mxu1 %v1775_v23  ;;  %v1838_v21 = vld [vmem:[#allocation3 + $0x5c0] sm:$0xff]  ;;  %v66_v22 = vld [vmem:[%s5936_s0 + $0x90] sm:$0xff] }
  0xb0   :  { %3318 = vmatmul.mubr.msk.f32.gmra.mxu0 %vm752_vm3, %v55_v24  ;;  %3352 = vmatmul.mubr.msk.f32.gmra.mxu1 %vm752_vm3, %v55_v24 }
  0xb1   :  { %974 = vmatprep.mubr.f32.mxu0 %v5946_v1  ;;  %1231 = vmatprep.mubr.f32.mxu1 %v5946_v1 }
  0xb2   :  { %1878 = vmatpush1.msra.mxu0 %v1678_v25  ;;  %2135 = vmatpush1.msra.mxu1 %v1774_v26  ;;  %v1741_v25 = vld [vmem:[#allocation3 + $0x2b8] sm:$0xff] }
  0xb3   :  { %1879 = vmatprep.subr.mxu0 %v1676_v27  ;;  %2136 = vmatprep.subr.mxu1 %v1772_v28  ;;  %v1837_v26 = vld [vmem:[#allocation3 + $0x5b8] sm:$0xff] }
  0xb4   :  { %3319 = vmatmul.mubr.msk.f32.gmra.mxu0 %vm752_vm3, %v56_v29  ;;  %3353 = vmatmul.mubr.msk.f32.gmra.mxu1 %vm752_vm3, %v56_v29  ;;  %v1739_v29 = vld [vmem:[#allocation3 + $0x2a8] sm:$0xff] }
  0xb5   :  { %980 = vmatprep.mubr.f32.mxu0 %v5946_v1  ;;  %1237 = vmatprep.mubr.f32.mxu1 %v5946_v1 }
  0xb6   :  { %1880 = vmatpush1.msra.mxu0 %v1675_v30  ;;  %2137 = vmatpush1.msra.mxu1 %v1771_v31  ;;  %v1835_v30 = vld [vmem:[#allocation3 + $0x5a8] sm:$0xff]  ;;  %v67_v31 = vld [vmem:[%s5936_s0 + $0x98] sm:$0xff] }
  0xb7   :  { %1881 = vmatprep.subr.mxu0 %v1673_v32  ;;  %2138 = vmatprep.subr.mxu1 %v1769_v33 }
  0xb8   :  { %3320 = vmatmul.mubr.msk.f32.gmra.mxu0 %vm752_vm3, %v57_v34  ;;  %3354 = vmatmul.mubr.msk.f32.gmra.mxu1 %vm752_vm3, %v57_v34  ;;  %v1738_v34 = vld [vmem:[#allocation3 + $0x2a0] sm:$0xff] }
  0xb9   :  { %986 = vmatprep.mubr.f32.mxu0 %v5946_v1  ;;  %1243 = vmatprep.mubr.f32.mxu1 %v5946_v1 }
  0xba   :  { %1882 = vmatpush1.msra.mxu0 %v1672_v35  ;;  %2139 = vmatpush1.msra.mxu1 %v1768_v36  ;;  %v1834_v35 = vld [vmem:[#allocation3 + $0x5a0] sm:$0xff] }
  0xbb   :  { %1883 = vmatprep.subr.mxu0 %v1670_v37  ;;  %2140 = vmatprep.subr.mxu1 %v1766_v38  ;;  %v1736_v38 = vld [vmem:[#allocation3 + $0x290] sm:$0xff] }
  0xbc   :  { %3321 = vmatmul.mubr.msk.f32.gmra.mxu0 %vm752_vm3, %v58_v39  ;;  %3355 = vmatmul.mubr.msk.f32.gmra.mxu1 %vm752_vm3, %v58_v39  ;;  %v1832_v39 = vld [vmem:[#allocation3 + $0x590] sm:$0xff] }
  0xbd   :  { %992 = vmatprep.mubr.f32.mxu0 %v5946_v1  ;;  %1249 = vmatprep.mubr.f32.mxu1 %v5946_v1 }
  0xbe   :  { %1884 = vmatpush1.msra.mxu0 %v1669_v40  ;;  %2141 = vmatpush1.msra.mxu1 %v1765_v41  ;;  %v68_v40 = vld [vmem:[%s5936_s0 + $0xa0] sm:$0xff] }
  0xbf   :  { %1885 = vmatprep.subr.mxu0 %v1667_v42  ;;  %2142 = vmatprep.subr.mxu1 %v1763_v43  ;;  %v1735_v43 = vld [vmem:[#allocation3 + $0x288] sm:$0xff] }
  0xc0   :  { %3322 = vmatmul.mubr.msk.f32.gmra.mxu0 %vm752_vm3, %v59_v44  ;;  %3356 = vmatmul.mubr.msk.f32.gmra.mxu1 %vm752_vm3, %v59_v44  ;;  %v1831_v44 = vld [vmem:[#allocation3 + $0x588] sm:$0xff] }
  0xc1   :  { %998 = vmatprep.mubr.f32.mxu0 %v5946_v1  ;;  %1255 = vmatprep.mubr.f32.mxu1 %v5946_v1 }
  0xc2   :  { %1886 = vmatpush1.msra.mxu0 %v1666_v45  ;;  %2143 = vmatpush1.msra.mxu1 %v1762_v46 }
  0xc3   :  { %1887 = vmatprep.subr.mxu0 %v1664_v47  ;;  %2144 = vmatprep.subr.mxu1 %v1760_v48  ;;  %v1733_v47 = vld [vmem:[#allocation3 + $0x278] sm:$0xff] }
  0xc4   :  { %3323 = vmatmul.mubr.msk.f32.gmra.mxu0 %vm752_vm3, %v60_v49  ;;  %3357 = vmatmul.mubr.msk.f32.gmra.mxu1 %vm752_vm3, %v60_v49  ;;  %v1829_v48 = vld [vmem:[#allocation3 + $0x578] sm:$0xff]  ;;  %v69_v49 = vld [vmem:[%s5936_s0 + $0xa8] sm:$0xff] }
  0xc5   :  { %1004 = vmatprep.mubr.f32.mxu0 %v5946_v1  ;;  %1261 = vmatprep.mubr.f32.mxu1 %v5946_v1 }
  0xc6   :  { %1888 = vmatpush1.msra.mxu0 %v1663_v50  ;;  %2145 = vmatpush1.msra.mxu1 %v1759_v51 }
  0xc7   :  { %1889 = vmatprep.subr.mxu0 %v1661_v52  ;;  %2146 = vmatprep.subr.mxu1 %v1757_v53  ;;  %v1732_v52 = vld [vmem:[#allocation3 + $0x270] sm:$0xff] }
  0xc8   :  { %3324 = vmatmul.mubr.msk.f32.gmra.mxu0 %vm752_vm3, %v61_v54  ;;  %3358 = vmatmul.mubr.msk.f32.gmra.mxu1 %vm752_vm3, %v61_v54  ;;  %v1828_v53 = vld [vmem:[#allocation3 + $0x570] sm:$0xff] }
  0xc9   :  { %1010 = vmatprep.mubr.f32.mxu0 %v5946_v1  ;;  %1267 = vmatprep.mubr.f32.mxu1 %v5946_v1 }
  0xca   :  { %1890 = vmatpush1.msra.mxu0 %v1660_v55  ;;  %2147 = vmatpush1.msra.mxu1 %v1756_v56  ;;  %v1730_v56 = vld [vmem:[#allocation3 + $0x260] sm:$0xff] }
  0xcb   :  { %1891 = vmatprep.subr.mxu0 %v1658_v57  ;;  %2148 = vmatprep.subr.mxu1 %v1754_v58  ;;  %v1826_v57 = vld [vmem:[#allocation3 + $0x560] sm:$0xff]  ;;  %v70_v58 = vld [vmem:[%s5936_s0 + $0xb0] sm:$0xff] }
  0xcc   :  { %3325 = vmatmul.mubr.msk.f32.gmra.mxu0 %vm752_vm3, %v62_v59  ;;  %3359 = vmatmul.mubr.msk.f32.gmra.mxu1 %vm752_vm3, %v62_v59 }
  0xcd   :  { %1016 = vmatprep.mubr.f32.mxu0 %v5946_v1  ;;  %1273 = vmatprep.mubr.f32.mxu1 %v5946_v1 }
  0xce   :  { %1892 = vmatpush1.msra.mxu0 %v1657_v60  ;;  %2149 = vmatpush1.msra.mxu1 %v1753_v61  ;;  %v1729_v61 = vld [vmem:[#allocation3 + $0x258] sm:$0xff] }
  0xcf   :  { %1893 = vmatprep.subr.mxu0 %v1655_v62  ;;  %2150 = vmatprep.subr.mxu1 %v1751_v63  ;;  %v1825_v62 = vld [vmem:[#allocation3 + $0x558] sm:$0xff] }
  0xd0   :  { %3326 = vmatmul.mubr.msk.f32.gmra.mxu0 %vm752_vm3, %v63_v0  ;;  %3360 = vmatmul.mubr.msk.f32.gmra.mxu1 %vm752_vm3, %v63_v0 }
  0xd1   :  { %1022 = vmatprep.mubr.f32.mxu0 %v5946_v1  ;;  %1279 = vmatprep.mubr.f32.mxu1 %v5946_v1 }
  0xd2   :  { %1894 = vmatpush1.msra.mxu0 %v1654_v2  ;;  %2151 = vmatpush1.msra.mxu1 %v1750_v3  ;;  %v1727_v2 = vld [vmem:[#allocation3 + $0x248] sm:$0xff] }
  0xd3   :  { %1895 = vmatprep.subr.mxu0 %v1748_v4  ;;  %2152 = vmatprep.subr.mxu1 %v1844_v5  ;;  %v1823_v3 = vld [vmem:[#allocation3 + $0x548] sm:$0xff]  ;;  %v71_v4 = vld [vmem:[%s5936_s0 + $0xb8] sm:$0xff] }
  0xd4   :  { %v3853_v9 = vpop.f32.mrf.mxu0  ;;  %v3855_v10 = vpop.f32.mrf.mxu1  ;;  %3327 = vmatmul.mubr.msk.f32.gmra.mxu0 %vm752_vm3, %v64_v6  ;;  %3361 = vmatmul.mubr.msk.f32.gmra.mxu1 %vm752_vm3, %v64_v6 }
  0xd5   :  { %1028 = vmatprep.mubr.f32.mxu0 %v5946_v1  ;;  %1285 = vmatprep.mubr.f32.mxu1 %v5946_v1 }
  0xd6   :  { %v3864_v14 = vpop.f32.mrf.mxu0  ;;  %v3866_v15 = vpop.f32.mrf.mxu1  ;;  %1896 = vmatpush2.msra.mxu0 %v1747_v7  ;;  %2153 = vmatpush2.msra.mxu1 %v1843_v8  ;;  %v1726_v7 = vld [vmem:[#allocation3 + $0x240] sm:$0xff] }
  0xd7   :  { %1897 = vmatprep.subr.mxu0 %v1745_v11  ;;  %2154 = vmatprep.subr.mxu1 %v1841_v12  ;;  %v1822_v8 = vld [vmem:[#allocation3 + $0x540] sm:$0xff] }
  0xd8   :  { %v3868_v18 = vpop.f32.mrf.mxu0  ;;  %v3870_v19 = vpop.f32.mrf.mxu1  ;;  %3328 = vmatmul.mubr.msk.f32.gmra.mxu0 %vm752_vm3, %v65_v13  ;;  %3362 = vmatmul.mubr.msk.f32.gmra.mxu1 %vm752_vm3, %v65_v13  ;;  %v1724_v13 = vld [vmem:[#allocation3 + $0x230] sm:$0xff] }
  0xd9   :  { %1034 = vmatprep.mubr.f32.mxu0 %v5946_v1  ;;  %1291 = vmatprep.mubr.f32.mxu1 %v5946_v1 }
  0xda   :  { %v3879_v23 = vpop.f32.mrf.mxu0  ;;  %v3881_v24 = vpop.f32.mrf.mxu1  ;;  %1898 = vmatpush2.msra.mxu0 %v1744_v16  ;;  %2155 = vmatpush2.msra.mxu1 %v1840_v17  ;;  %v1820_v16 = vld [vmem:[#allocation3 + $0x530] sm:$0xff]  ;;  %v72_v17 = vld [vmem:[%s5936_s0 + $0xc0] sm:$0xff] }
  0xdb   :  { %1899 = vmatprep.subr.mxu0 %v1742_v20  ;;  %2156 = vmatprep.subr.mxu1 %v1838_v21 }
  0xdc   :  { %v3883_v27 = vpop.f32.mrf.mxu0  ;;  %v3885_v28 = vpop.f32.mrf.mxu1  ;;  %3329 = vmatmul.mubr.msk.f32.gmra.mxu0 %vm752_vm3, %v66_v22  ;;  %3363 = vmatmul.mubr.msk.f32.gmra.mxu1 %vm752_vm3, %v66_v22  ;;  %v1723_v22 = vld [vmem:[#allocation3 + $0x228] sm:$0xff] }
  0xdd   :  { %1040 = vmatprep.mubr.f32.mxu0 %v5946_v1  ;;  %1297 = vmatprep.mubr.f32.mxu1 %v5946_v1 }
  0xde   :  { %v3894_v32 = vpop.f32.mrf.mxu0  ;;  %v3896_v33 = vpop.f32.mrf.mxu1  ;;  %1900 = vmatpush2.msra.mxu0 %v1741_v25  ;;  %2157 = vmatpush2.msra.mxu1 %v1837_v26  ;;  %v1819_v25 = vld [vmem:[#allocation3 + $0x528] sm:$0xff] }
  0xdf   :  { %1901 = vmatprep.subr.mxu0 %v1739_v29  ;;  %2158 = vmatprep.subr.mxu1 %v1835_v30  ;;  %v1721_v30 = vld [vmem:[#allocation3 + $0x218] sm:$0xff] }
  0xe0   :  { %v3898_v36 = vpop.f32.mrf.mxu0  ;;  %v3900_v37 = vpop.f32.mrf.mxu1  ;;  %3330 = vmatmul.mubr.msk.f32.gmra.mxu0 %vm752_vm3, %v67_v31  ;;  %3364 = vmatmul.mubr.msk.f32.gmra.mxu1 %vm752_vm3, %v67_v31  ;;  %v1817_v31 = vld [vmem:[#allocation3 + $0x518] sm:$0xff] }
  0xe1   :  { %1046 = vmatprep.mubr.f32.mxu0 %v5946_v1  ;;  %1303 = vmatprep.mubr.f32.mxu1 %v5946_v1 }
  0xe2   :  { %v3909_v41 = vpop.f32.mrf.mxu0  ;;  %v3911_v42 = vpop.f32.mrf.mxu1  ;;  %1902 = vmatpush2.msra.mxu0 %v1738_v34  ;;  %2159 = vmatpush2.msra.mxu1 %v1834_v35  ;;  %v73_v34 = vld [vmem:[%s5936_s0 + $0xc8] sm:$0xff] }
  0xe3   :  { %1903 = vmatprep.subr.mxu0 %v1736_v38  ;;  %2160 = vmatprep.subr.mxu1 %v1832_v39  ;;  %v1720_v39 = vld [vmem:[#allocation3 + $0x210] sm:$0xff] }
  0xe4   :  { %v3913_v45 = vpop.f32.mrf.mxu0  ;;  %v3915_v46 = vpop.f32.mrf.mxu1  ;;  %3331 = vmatmul.mubr.msk.f32.gmra.mxu0 %vm752_vm3, %v68_v40  ;;  %3365 = vmatmul.mubr.msk.f32.gmra.mxu1 %vm752_vm3, %v68_v40  ;;  %v1816_v40 = vld [vmem:[#allocation3 + $0x510] sm:$0xff] }
  0xe5   :  { %1052 = vmatprep.mubr.f32.mxu0 %v5946_v1  ;;  %1309 = vmatprep.mubr.f32.mxu1 %v5946_v1 }
  0xe6   :  { %v3924_v50 = vpop.f32.mrf.mxu0  ;;  %v3926_v51 = vpop.f32.mrf.mxu1  ;;  %1904 = vmatpush2.msra.mxu0 %v1735_v43  ;;  %2161 = vmatpush2.msra.mxu1 %v1831_v44 }
  0xe7   :  { %1905 = vmatprep.subr.mxu0 %v1733_v47  ;;  %2162 = vmatprep.subr.mxu1 %v1829_v48  ;;  %v1718_v47 = vld [vmem:[#allocation3 + $0x200] sm:$0xff] }
  0xe8   :  { %v3928_v54 = vpop.f32.mrf.mxu0  ;;  %v3930_v55 = vpop.f32.mrf.mxu1  ;;  %3332 = vmatmul.mubr.msk.f32.gmra.mxu0 %vm752_vm3, %v69_v49  ;;  %3366 = vmatmul.mubr.msk.f32.gmra.mxu1 %vm752_vm3, %v69_v49  ;;  %v1814_v48 = vld [vmem:[#allocation3 + $0x500] sm:$0xff]  ;;  %v74_v49 = vld [vmem:[%s5936_s0 + $0xd0] sm:$0xff] }
  0xe9   :  { %1058 = vmatprep.mubr.f32.mxu0 %v5946_v1  ;;  %1315 = vmatprep.mubr.f32.mxu1 %v5946_v1 }
  0xea   :  { %v3939_v59 = vpop.f32.mrf.mxu0  ;;  %v3941_v60 = vpop.f32.mrf.mxu1  ;;  %1906 = vmatpush2.msra.mxu0 %v1732_v52  ;;  %2163 = vmatpush2.msra.mxu1 %v1828_v53 }
  0xeb   :  { %1907 = vmatprep.subr.mxu0 %v1730_v56  ;;  %2164 = vmatprep.subr.mxu1 %v1826_v57  ;;  %v1717_v56 = vld [vmem:[#allocation3 + $0x1f8] sm:$0xff] }
  0xec   :  { %v3943_v63 = vpop.f32.mrf.mxu0  ;;  %v3945_v0 = vpop.f32.mrf.mxu1  ;;  %3333 = vmatmul.mubr.msk.f32.gmra.mxu0 %vm752_vm3, %v70_v58  ;;  %3367 = vmatmul.mubr.msk.f32.gmra.mxu1 %vm752_vm3, %v70_v58  ;;  %v1813_v57 = vld [vmem:[#allocation3 + $0x4f8] sm:$0xff] }
  0xed   :  { %1064 = vmatprep.mubr.f32.mxu0 %v5946_v1  ;;  %1321 = vmatprep.mubr.f32.mxu1 %v5946_v1 }
  0xee   :  { %v3954_v5 = vpop.f32.mrf.mxu0  ;;  %v3956_v6 = vpop.f32.mrf.mxu1  ;;  %1908 = vmatpush2.msra.mxu0 %v1729_v61  ;;  %2165 = vmatpush2.msra.mxu1 %v1825_v62  ;;  %v1715_v62 = vld [vmem:[#allocation3 + $0x1e8] sm:$0xff] }
  0xef   :  { %1909 = vmatprep.subr.mxu0 %v1727_v2  ;;  %2166 = vmatprep.subr.mxu1 %v1823_v3  ;;  %v1811_v2 = vld [vmem:[#allocation3 + $0x4e8] sm:$0xff]  ;;  %v75_v3 = vld [vmem:[%s5936_s0 + $0xd8] sm:$0xff] }
  0xf0   :  { %v3958_v11 = vpop.f32.mrf.mxu0  ;;  %v3960_v12 = vpop.f32.mrf.mxu1  ;;  %3334 = vmatmul.mubr.msk.f32.gmra.mxu0 %vm752_vm3, %v71_v4  ;;  %3368 = vmatmul.mubr.msk.f32.gmra.mxu1 %vm752_vm3, %v71_v4 }
  0xf1   :  { %1070 = vmatprep.mubr.f32.mxu0 %v5946_v1  ;;  %1327 = vmatprep.mubr.f32.mxu1 %v5946_v1 }
  0xf2   :  { %v3969_v20 = vpop.f32.mrf.mxu0  ;;  %v3971_v21 = vpop.f32.mrf.mxu1  ;;  %1910 = vmatpush2.msra.mxu0 %v1726_v7  ;;  %2167 = vmatpush2.msra.mxu1 %v1822_v8  ;;  %v1714_v8 = vld [vmem:[#allocation3 + $0x1e0] sm:$0xff] }
  0xf3   :  { %1911 = vmatprep.subr.mxu0 %v1724_v13  ;;  %2168 = vmatprep.subr.mxu1 %v1820_v16  ;;  %v1810_v13 = vld [vmem:[#allocation3 + $0x4e0] sm:$0xff] }
  0xf4   :  { %v3973_v26 = vpop.f32.mrf.mxu0  ;;  %v3975_v29 = vpop.f32.mrf.mxu1  ;;  %3335 = vmatmul.mubr.msk.f32.gmra.mxu0 %vm752_vm3, %v72_v17  ;;  %3369 = vmatmul.mubr.msk.f32.gmra.mxu1 %vm752_vm3, %v72_v17 }
  0xf5   :  { %1076 = vmatprep.mubr.f32.mxu0 %v5946_v1  ;;  %1333 = vmatprep.mubr.f32.mxu1 %v5946_v1 }
  0xf6   :  { %v3984_v35 = vpop.f32.mrf.mxu0  ;;  %v3986_v38 = vpop.f32.mrf.mxu1  ;;  %1912 = vmatpush2.msra.mxu0 %v1723_v22  ;;  %2169 = vmatpush2.msra.mxu1 %v1819_v25  ;;  %v1712_v22 = vld [vmem:[#allocation3 + $0x1d0] sm:$0xff] }
  0xf7   :  { %1913 = vmatprep.subr.mxu0 %v1721_v30  ;;  %2170 = vmatprep.subr.mxu1 %v1817_v31  ;;  %v1808_v25 = vld [vmem:[#allocation3 + $0x4d0] sm:$0xff]  ;;  %v76_v30 = vld [vmem:[%s5936_s0 + $0xe0] sm:$0xff] }
  0xf8   :  { %v3988_v43 = vpop.f32.mrf.mxu0  ;;  %v3990_v44 = vpop.f32.mrf.mxu1  ;;  %3336 = vmatmul.mubr.msk.f32.gmra.mxu0 %vm752_vm3, %v73_v34  ;;  %3370 = vmatmul.mubr.msk.f32.gmra.mxu1 %vm752_vm3, %v73_v34 }
  0xf9   :  { %1082 = vmatprep.mubr.f32.mxu0 %v5946_v1  ;;  %1339 = vmatprep.mubr.f32.mxu1 %v5946_v1 }
  0xfa   :  { %v3999_v52 = vpop.f32.mrf.mxu0  ;;  %v4001_v53 = vpop.f32.mrf.mxu1  ;;  %1914 = vmatpush2.msra.mxu0 %v1720_v39  ;;  %2171 = vmatpush2.msra.mxu1 %v1816_v40  ;;  %v1711_v39 = vld [vmem:[#allocation3 + $0x1c8] sm:$0xff] }
  0xfb   :  { %1915 = vmatprep.subr.mxu0 %v1718_v47  ;;  %2172 = vmatprep.subr.mxu1 %v1814_v48  ;;  %v1807_v40 = vld [vmem:[#allocation3 + $0x4c8] sm:$0xff] }
  0xfc   :  { %v4003_v58 = vpop.f32.mrf.mxu0  ;;  %v4005_v61 = vpop.f32.mrf.mxu1  ;;  %3337 = vmatmul.mubr.msk.f32.gmra.mxu0 %vm752_vm3, %v74_v49  ;;  %3371 = vmatmul.mubr.msk.f32.gmra.mxu1 %vm752_vm3, %v74_v49  ;;  %v1709_v49 = vld [vmem:[#allocation3 + $0x1b8] sm:$0xff] }
  0xfd   :  { %1088 = vmatprep.mubr.f32.mxu0 %v5946_v1  ;;  %1345 = vmatprep.mubr.f32.mxu1 %v5946_v1 }
  0xfe   :  { %v4014_v4 = vpop.f32.mrf.mxu0  ;;  %v4016_v7 = vpop.f32.mrf.mxu1  ;;  %1916 = vmatpush2.msra.mxu0 %v1717_v56  ;;  %2173 = vmatpush2.msra.mxu1 %v1813_v57  ;;  %v1805_v56 = vld [vmem:[#allocation3 + $0x4b8] sm:$0xff]  ;;  %v77_v57 = vld [vmem:[%s5936_s0 + $0xe8] sm:$0xff] }
  0xff   :  { %1917 = vmatprep.subr.mxu0 %v1715_v62  ;;  %2174 = vmatprep.subr.mxu1 %v1811_v2 }
 0x100   :  { %v4018_v16 = vpop.f32.mrf.mxu0  ;;  %v4020_v17 = vpop.f32.mrf.mxu1  ;;  %3338 = vmatmul.mubr.msk.f32.gmra.mxu0 %vm752_vm3, %v75_v3  ;;  %3372 = vmatmul.mubr.msk.f32.gmra.mxu1 %vm752_vm3, %v75_v3  ;;  %v1708_v3 = vld [vmem:[#allocation3 + $0x1b0] sm:$0xff] }
 0x101   :  { %1094 = vmatprep.mubr.f32.mxu0 %v5946_v1  ;;  %1351 = vmatprep.mubr.f32.mxu1 %v5946_v1 }
 0x102   :  { %v4029_v31 = vpop.f32.mrf.mxu0  ;;  %v4031_v34 = vpop.f32.mrf.mxu1  ;;  %1918 = vmatpush2.msra.mxu0 %v1714_v8  ;;  %2175 = vmatpush2.msra.mxu1 %v1810_v13  ;;  %v1804_v8 = vld [vmem:[#allocation3 + $0x4b0] sm:$0xff] }
 0x103   :  { %6074 = vst [vmem:[#allocation6_spill] sm:$0xff] %v4029_v31  ;;  %6075 = vst [vmem:[#allocation7_spill] sm:$0xff] %v4031_v34  ;;  %1919 = vmatprep.subr.mxu0 %v1712_v22  ;;  %2176 = vmatprep.subr.mxu1 %v1808_v25  ;;  %v1706_v25 = vld [vmem:[#allocation3 + $0x1a0] sm:$0xff] }
 0x104   :  { %v4033_v47 = vpop.f32.mrf.mxu0  ;;  %v4035_v48 = vpop.f32.mrf.mxu1  ;;  %3339 = vmatmul.mubr.msk.f32.gmra.mxu0 %vm752_vm3, %v76_v30  ;;  %3373 = vmatmul.mubr.msk.f32.gmra.mxu1 %vm752_vm3, %v76_v30  ;;  %v1802_v30 = vld [vmem:[#allocation3 + $0x4a0] sm:$0xff] }
 0x105   :  { %6076 = vst [vmem:[#allocation8_spill] sm:$0xff] %v4033_v47  ;;  %6077 = vst [vmem:[#allocation9_spill] sm:$0xff] %v4035_v48  ;;  %1100 = vmatprep.mubr.f32.mxu0 %v5946_v1  ;;  %1357 = vmatprep.mubr.f32.mxu1 %v5946_v1 }
 0x106   :  { %v4044_v62 = vpop.f32.mrf.mxu0  ;;  %v4046_v2 = vpop.f32.mrf.mxu1  ;;  %1920 = vmatpush2.msra.mxu0 %v1711_v39  ;;  %2177 = vmatpush2.msra.mxu1 %v1807_v40  ;;  %v78_v39 = vld [vmem:[%s5936_s0 + $0xf0] sm:$0xff] }
 0x107   :  { %6078 = vst [vmem:[#allocation10_spill] sm:$0xff] %v4044_v62  ;;  %6079 = vst [vmem:[#allocation11_spill] sm:$0xff] %v4046_v2  ;;  %1921 = vmatprep.subr.mxu0 %v1709_v49  ;;  %2178 = vmatprep.subr.mxu1 %v1805_v56  ;;  %v1705_v56 = vld [vmem:[#allocation3 + $0x198] sm:$0xff]  ;;  %v1799_v2 = vld [vmem:[#allocation3 + $0x488] sm:$0xff]  ;;  %v6086_v62 = vmov 0.0  }
 0x108   :  { %v4048_v13 = vpop.f32.mrf.mxu0  ;;  %v4050_v22 = vpop.f32.mrf.mxu1  ;;  %3340 = vmatmul.mubr.msk.f32.gmra.mxu0 %vm752_vm3, %v77_v57  ;;  %3374 = vmatmul.mubr.msk.f32.gmra.mxu1 %vm752_vm3, %v77_v57  ;;  %v1801_v57 = vld [vmem:[#allocation3 + $0x498] sm:$0xff] }
 0x109   :  { %6080 = vst [vmem:[#allocation12_spill] sm:$0xff] %v4048_v13  ;;  %6081 = vst [vmem:[#allocation13_spill] sm:$0xff] %v4050_v22  ;;  %1106 = vmatprep.mubr.f32.mxu0 %v5946_v1  ;;  %1363 = vmatprep.mubr.f32.mxu1 %v5946_v1  ;;  %v1703_v1 = vld [vmem:[#allocation3 + $0x188] sm:$0xff] }
 0x10a   :  { %v4059_v40 = vpop.f32.mrf.mxu0  ;;  %v4061_v49 = vpop.f32.mrf.mxu1  ;;  %1922 = vmatpush2.msra.mxu0 %v1708_v3  ;;  %2179 = vmatpush2.msra.mxu1 %v1804_v8  ;;  %v79_v3 = vld [vmem:[%s5936_s0 + $0xf8] sm:$0xff] }
 0x10b   :  { %6082 = vst [vmem:[#allocation14_spill] sm:$0xff] %v4059_v40  ;;  %6083 = vst [vmem:[#allocation15_spill] sm:$0xff] %v4061_v49  ;;  %1923 = vmatprep.subr.mxu0 %v1706_v25  ;;  %2180 = vmatprep.subr.mxu1 %v1802_v30  ;;  %v1702_v30 = vld [vmem:[#allocation3 + $0x180] sm:$0xff] }
 0x10c   :  { %v4063_v22 = vpop.f32.mrf.mxu0  ;;  %v4065_v13 = vpop.f32.mrf.mxu1  ;;  %3341 = vmatmul.mubr.msk.f32.gmra.mxu0 %vm752_vm3, %v78_v39  ;;  %3375 = vmatmul.mubr.msk.f32.gmra.mxu1 %vm752_vm3, %v78_v39 }
 0x10d   :  { %6084 = vst [vmem:[#allocation16_spill] sm:$0xff] %v4063_v22  ;;  %6085 = vst [vmem:[#allocation17_spill] sm:$0xff] %v4065_v13  ;;  %1112 = vmatprep.mubr.f32.mxu0 %v6086_v62  ;;  %1369 = vmatprep.mubr.f32.mxu1 %v6086_v62  ;;  %v1798_v13 = vld [vmem:[#allocation3 + $0x480] sm:$0xff] }
 0x10e   :  { %v4074_v8 = vpop.f32.mrf.mxu0  ;;  %v4076_v25 = vpop.f32.mrf.mxu1  ;;  %1924 = vmatpush2.msra.mxu0 %v1705_v56  ;;  %2181 = vmatpush2.msra.mxu1 %v1801_v57 }
 0x10f   :  { %6087 = vst [vmem:[#allocation18_spill] sm:$0xff] %v4074_v8  ;;  %6088 = vst [vmem:[#allocation19_spill] sm:$0xff] %v4076_v25  ;;  %1925 = vmatprep.subr.mxu0 %v1703_v1  ;;  %2182 = vmatprep.subr.mxu1 %v1799_v2 }
 0x110   :  { %v4078_v39 = vpop.f32.mrf.mxu0  ;;  %v4080_v22 = vpop.f32.mrf.mxu1  ;;  %3342 = vmatmul.mubr.msk.f32.gmra.mxu0 %vm752_vm3, %v79_v3  ;;  %3376 = vmatmul.mubr.msk.f32.gmra.mxu1 %vm752_vm3, %v79_v3 }
 0x111   :  { %6089 = vst [vmem:[#allocation20_spill] sm:$0xff] %v4078_v39  ;;  %6090 = vst [vmem:[#allocation21_spill] sm:$0xff] %v4080_v22  ;;  %1926 = vmatpush2.msra.mxu0 %v1702_v30  ;;  %2183 = vmatpush2.msra.mxu1 %v1798_v13 }
 0x112   :  { %v4084_v49 = vpop.f32.mrf.mxu0  ;;  %v4086_v8 = vpop.f32.mrf.mxu1  ;;  %2377 = vmatprep.subr.mxu0 %v6086_v62  ;;  %2602 = vmatprep.subr.mxu1 %v6086_v62 }
 0x113   :  { %6091 = vst [vmem:[#allocation22_spill] sm:$0xff] %v4084_v49  ;;  %6092 = vst [vmem:[#allocation23_spill] sm:$0xff] %v4086_v8 }
 0x114   :  { %v4090_v1 = vpop.f32.mrf.mxu0  ;;  %v4092_v2 = vpop.f32.mrf.mxu1 }
 0x115   :  { %6093 = vst [vmem:[#allocation24_spill] sm:$0xff] %v4090_v1  ;;  %6094 = vst [vmem:[#allocation25_spill] sm:$0xff] %v4092_v2 }
 0x116   :  { %v4094_v56 = vpop.f32.mrf.mxu0  ;;  %v4096_v57 = vpop.f32.mrf.mxu1 }
 0x117   :  { %6095 = vst [vmem:[#allocation26_spill] sm:$0xff] %v4094_v56  ;;  %6096 = vst [vmem:[#allocation27_spill] sm:$0xff] %v4096_v57 }
 0x118   :  { %v4098_v22 = vpop.f32.mrf.mxu0  ;;  %v4100_v3 = vpop.f32.mrf.mxu1 }
 0x119   :  { %6097 = vst [vmem:[#allocation28_spill] sm:$0xff] %v4098_v22  ;;  %6098 = vst [vmem:[#allocation29_spill] sm:$0xff] %v4100_v3 }
 0x11a   :  { %v4102_v13 = vpop.f32.mrf.mxu0  ;;  %v4104_v30 = vpop.f32.mrf.mxu1 }
 0x11b   :  { %6099 = vst [vmem:[#allocation30_spill] sm:$0xff] %v4102_v13  ;;  %6100 = vst [vmem:[#allocation31_spill] sm:$0xff] %v4104_v30 }
 0x11c   :  { %v4106_v8 = vpop.f32.mrf.mxu0  ;;  %v4108_v49 = vpop.f32.mrf.mxu1 }
 0x11d   :  { %6101 = vst [vmem:[#allocation32_spill] sm:$0xff] %v4106_v8  ;;  %6102 = vst [vmem:[#allocation33_spill] sm:$0xff] %v4108_v49 }
 0x11e   :  { %v4110_v39 = vpop.f32.mrf.mxu0  ;;  %v4112_v1 = vpop.f32.mrf.mxu1 }
 0x11f   :  { %6103 = vst [vmem:[#allocation34_spill] sm:$0xff] %v4110_v39  ;;  %6104 = vst [vmem:[#allocation35_spill] sm:$0xff] %v4112_v1 }
 0x120   :  { %v4114_v2 = vpop.f32.mrf.mxu0  ;;  %v4116_v56 = vpop.f32.mrf.mxu1 }
 0x121   :  { %6105 = vst [vmem:[#allocation36_spill] sm:$0xff] %v4114_v2  ;;  %6106 = vst [vmem:[#allocation37_spill] sm:$0xff] %v4116_v56 }
 0x122   :  { %v4118_v57 = vpop.f32.mrf.mxu0  ;;  %v4120_v22 = vpop.f32.mrf.mxu1 }
 0x123   :  { %6107 = vst [vmem:[#allocation38_spill] sm:$0xff] %v4118_v57  ;;  %6108 = vst [vmem:[#allocation39_spill] sm:$0xff] %v4120_v22 }
 0x124   :  { %v4122_v3 = vpop.f32.mrf.mxu0  ;;  %v4124_v13 = vpop.f32.mrf.mxu1 }
 0x125   :  { %6109 = vst [vmem:[#allocation40_spill] sm:$0xff] %v4122_v3  ;;  %6110 = vst [vmem:[#allocation41_spill] sm:$0xff] %v4124_v13 }
 0x126   :  { %v4126_v30 = vpop.f32.mrf.mxu0  ;;  %v4128_v8 = vpop.f32.mrf.mxu1 }
 0x127   :  { %6111 = vst [vmem:[#allocation42_spill] sm:$0xff] %v4126_v30  ;;  %6112 = vst [vmem:[#allocation43_spill] sm:$0xff] %v4128_v8 }
 0x128   :  { %v4130_v49 = vpop.f32.mrf.mxu0  ;;  %v4132_v39 = vpop.f32.mrf.mxu1 }
 0x129   :  { %6113 = vst [vmem:[#allocation44_spill] sm:$0xff] %v4130_v49  ;;  %6114 = vst [vmem:[#allocation45_spill] sm:$0xff] %v4132_v39 }
 0x12a   :  { %v4134_v1 = vpop.f32.mrf.mxu0  ;;  %v4136_v2 = vpop.f32.mrf.mxu1 }
 0x12b   :  { %6115 = vst [vmem:[#allocation46_spill] sm:$0xff] %v4134_v1  ;;  %6116 = vst [vmem:[#allocation47_spill] sm:$0xff] %v4136_v2 }
 0x12c   :  { %v4138_v56 = vpop.f32.mrf.mxu0  ;;  %v4140_v57 = vpop.f32.mrf.mxu1 }
 0x12d   :  { %6117 = vst [vmem:[#allocation48_spill] sm:$0xff] %v4138_v56  ;;  %6118 = vst [vmem:[#allocation49_spill] sm:$0xff] %v4140_v57 }
 0x12e   :  { %v4142_v22 = vpop.f32.mrf.mxu0  ;;  %v4144_v3 = vpop.f32.mrf.mxu1 }
 0x12f   :  { %6119 = vst [vmem:[#allocation50_spill] sm:$0xff] %v4142_v22  ;;  %6120 = vst [vmem:[#allocation51_spill] sm:$0xff] %v4144_v3 }
 0x130   :  { %v4146_v13 = vpop.f32.mrf.mxu0  ;;  %v4148_v30 = vpop.f32.mrf.mxu1 }
 0x131   :  { %6121 = vst [vmem:[#allocation52_spill] sm:$0xff] %v4146_v13  ;;  %6122 = vst [vmem:[#allocation53_spill] sm:$0xff] %v4148_v30 }
 0x132   :  { %v4150_v8 = vpop.f32.mrf.mxu0  ;;  %v4152_v49 = vpop.f32.mrf.mxu1 }
 0x133   :  { %6123 = vst [vmem:[#allocation54_spill] sm:$0xff] %v4150_v8  ;;  %6124 = vst [vmem:[#allocation55_spill] sm:$0xff] %v4152_v49 }
 0x134   :  { %v4154_v39 = vpop.f32.mrf.mxu0  ;;  %v4156_v1 = vpop.f32.mrf.mxu1 }
 0x135   :  { %6125 = vst [vmem:[#allocation56_spill] sm:$0xff] %v4154_v39  ;;  %6126 = vst [vmem:[#allocation57_spill] sm:$0xff] %v4156_v1 }
 0x136   :  { %v4158_v2 = vpop.f32.mrf.mxu0  ;;  %v4160_v56 = vpop.f32.mrf.mxu1 }
 0x137   :  { %6127 = vst [vmem:[#allocation58_spill] sm:$0xff] %v4158_v2  ;;  %6128 = vst [vmem:[#allocation59_spill] sm:$0xff] %v4160_v56 }
 0x138   :  { %v4162_v57 = vpop.f32.mrf.mxu0  ;;  %v4164_v22 = vpop.f32.mrf.mxu1 }
 0x139   :  { %6129 = vst [vmem:[#allocation60_spill] sm:$0xff] %v4162_v57  ;;  %6130 = vst [vmem:[#allocation61_spill] sm:$0xff] %v4164_v22 }
 0x13a   :  { %v4166_v3 = vpop.f32.mrf.mxu0  ;;  %v4168_v13 = vpop.f32.mrf.mxu1 }
 0x13b   :  { %6131 = vst [vmem:[#allocation62_spill] sm:$0xff] %v4166_v3  ;;  %6132 = vst [vmem:[#allocation63_spill] sm:$0xff] %v4168_v13 }
 0x13c   :  { %v4170_v30 = vpop.f32.mrf.mxu0  ;;  %v4172_v8 = vpop.f32.mrf.mxu1 }
 0x13d   :  { %6133 = vst [vmem:[#allocation64_spill] sm:$0xff] %v4170_v30  ;;  %6134 = vst [vmem:[#allocation65_spill] sm:$0xff] %v4172_v8 }
 0x13e   :  { %v4174_v49 = vpop.f32.mrf.mxu0  ;;  %v4176_v39 = vpop.f32.mrf.mxu1 }
 0x13f   :  { %6135 = vst [vmem:[#allocation66_spill] sm:$0xff] %v4174_v49  ;;  %6136 = vst [vmem:[#allocation67_spill] sm:$0xff] %v4176_v39  ;;  %v1378_v39 = vlaneseq }
 0x140   :  { %v4178_v1 = vpop.f32.mrf.mxu0  ;;  %v4180_v2 = vpop.f32.mrf.mxu1 }
 0x141   :  { %6137 = vst [vmem:[#allocation68_spill] sm:$0xff] %v4178_v1  ;;  %6138 = vst [vmem:[#allocation69_spill] sm:$0xff] %v4180_v2 }
 0x142   :  { %v4182_v56 = vpop.f32.mrf.mxu0  ;;  %v4184_v57 = vpop.f32.mrf.mxu1 }
 0x143   :  { %6139 = vst [vmem:[#allocation70_spill] sm:$0xff] %v4182_v56  ;;  %6140 = vst [vmem:[#allocation71_spill] sm:$0xff] %v4184_v57 }
 0x144   :  { %v4186_v22 = vpop.f32.mrf.mxu0  ;;  %v4188_v3 = vpop.f32.mrf.mxu1 }
 0x145   :  { %6141 = vst [vmem:[#allocation72_spill] sm:$0xff] %v4186_v22  ;;  %6142 = vst [vmem:[#allocation73_spill] sm:$0xff] %v4188_v3  ;;  %v1379_v22 = vshrl.u32 %v1378_v39, 7 }
 0x146   :  { %v4190_v13 = vpop.f32.mrf.mxu0  ;;  %v4192_v30 = vpop.f32.mrf.mxu1 }
 0x147   :  { %6143 = vst [vmem:[#allocation74_spill] sm:$0xff] %v4190_v13  ;;  %6144 = vst [vmem:[#allocation75_spill] sm:$0xff] %v4192_v30 }
 0x148   :  { %v4194_v8 = vpop.f32.mrf.mxu0  ;;  %v4196_v49 = vpop.f32.mrf.mxu1 }
 0x149   :  { %6145 = vst [vmem:[#allocation76_spill] sm:$0xff] %v4194_v8  ;;  %6146 = vst [vmem:[#allocation77_spill] sm:$0xff] %v4196_v49  ;;  %v4214_v8 = vsub.s32 0, %v1379_v22  ;;  %v4216_v49 = vsub.s32 2, %v1379_v22 }
 0x14a   :  { %v4198_v1 = vpop.f32.mrf.mxu0  ;;  %v4200_v2 = vpop.f32.mrf.mxu1 }
 0x14b   :  { %6147 = vst [vmem:[#allocation78_spill] sm:$0xff] %v4198_v1  ;;  %6148 = vst [vmem:[#allocation79_spill] sm:$0xff] %v4200_v2  ;;  %v1376_v2 = vld [vmem:[%s5940_s4] sm:$0xf] }
 0x14c   :  { %v4202_v56 = vpop.f32.mrf.mxu0  ;;  %v4204_v57 = vpop.f32.mrf.mxu1  ;;  %6155 = vst [vmem:[#allocation86_spill] sm:$0xff] %v4214_v8  ;;  %6156 = vst [vmem:[#allocation87_spill] sm:$0xff] %v4216_v49  ;;  %v4231_v1 = vrot.slane %v1376_v2, %v4216_v49 }
 0x14d   :  { %6149 = vst [vmem:[#allocation80_spill] sm:$0xff] %v4202_v56  ;;  %6150 = vst [vmem:[#allocation81_spill] sm:$0xff] %v4204_v57  ;;  %v4221_v56 = vsub.s32 1, %v1379_v22  ;;  %v1392_v57 = vsub.s32 3, %v1379_v22 }
 0x14e   :  { %v4206_v25 = vpop.f32.mrf.mxu0  ;;  %v4208_v3 = vpop.f32.mrf.mxu1 }
 0x14f   :  { %6151 = vst [vmem:[#allocation82_spill] sm:$0xff] %v4206_v25  ;;  %6152 = vst [vmem:[#allocation83_spill] sm:$0xff] %v4208_v3  ;;  %v4236_v47 = vrot.slane %v1376_v2, %v4221_v56  ;;  %v4238_v22 = vrot.slane %v1376_v2, %v1392_v57 }
 0x150   :  { %v4210_v13 = vpop.f32.mrf.mxu0  ;;  %v4212_v30 = vpop.f32.mrf.mxu1  ;;  %6157 = vst [vmem:[#allocation88_spill] sm:$0xff] %v4221_v56 }
 0x151   :  { %6153 = vst [vmem:[#allocation84_spill] sm:$0xff] %v4210_v13  ;;  %6154 = vst [vmem:[#allocation85_spill] sm:$0xff] %v4212_v30  ;;  %v4228_v13 = vrot.slane %v1376_v2, %v4214_v8 }
 0x152   :  { %v4223_v39 = vpop.f32.mrf.mxu0  ;;  %v4225_v25 = vpop.f32.mrf.mxu1 }
 0x153   :  { %6158 = vst [vmem:[#allocation89_spill] sm:$0xff] %v4223_v39  ;;  %6159 = vst [vmem:[#allocation90_spill] sm:$0xff] %v4225_v25 }
 0x154   :  { %v928_v3 = vpop.f32.mrf.mxu0  ;;  %v1185_v30 = vpop.f32.mrf.mxu1 }
 0x155   :  { %v929_v40 = vadd.f32 %v928_v3, %v3853_v9  ;;  %v1186_v48 = vadd.f32 %v1185_v30, %v3855_v10 }
 0x156   :  { %v930_v39 = vpop.f32.mrf.mxu0  ;;  %v1187_v34 = vpop.f32.mrf.mxu1 }
 0x157   :  { %v931_v25 = vadd.f32 %v930_v39, %v3864_v14  ;;  %v1188_v8 = vadd.f32 %v1187_v34, %v3866_v15  ;;  %v4243_v31 = vadd.f32 %v4228_v13, %v929_v40  ;;  %v4246_v49 = vadd.f32 %v4231_v1, %v1186_v48 }
 0x158   :  { %v934_v9 = vpop.f32.mrf.mxu0  ;;  %v1191_v3 = vpop.f32.mrf.mxu1 }
 0x159   :  { %6160 = vst [vmem:[#allocation91_spill] sm:$0xff] %v4246_v49  ;;  %v4249_v10 = vadd.f32 %v4236_v47, %v931_v25  ;;  %v4252_v2 = vadd.f32 %v4238_v22, %v1188_v8  ;;  %v935_v57 = vadd.f32 %v934_v9, %v3868_v18  ;;  %v1192_v14 = vadd.f32 %v1191_v3, %v3870_v19 }
 0x15a   :  { %v936_v30 = vpop.f32.mrf.mxu0  ;;  %v1193_v15 = vpop.f32.mrf.mxu1  ;;  %v5956_v25 = vmax.f32 %v4243_v31, 0.0 }
 0x15b   :  { %v937_v34 = vadd.f32 %v936_v30, %v3879_v23  ;;  %v1194_v40 = vadd.f32 %v1193_v15, %v3881_v24  ;;  %v5955_v48 = vmax.f32 %v4249_v10, 0.0  ;;  %v5954_v39 = vmax.f32 %v4252_v2, 0.0  ;;  %v1701_v30 = vld [vmem:[#allocation3 + $0x178] sm:$0xff] }
 0x15c   :  { %v4263_v8 = vadd.f32 %v4228_v13, %v935_v57  ;;  %v940_v18 = vpop.f32.mrf.mxu0  ;;  %v1197_v9 = vpop.f32.mrf.mxu1  ;;  %v4266_v19 = vadd.f32 %v4231_v1, %v1192_v14  ;;  %v1797_v15 = vld [vmem:[#allocation3 + $0x478] sm:$0xff] }
 0x15d   :  { %v4269_v23 = vadd.f32 %v4236_v47, %v937_v34  ;;  %v4272_v24 = vadd.f32 %v4238_v22, %v1194_v40  ;;  %v941_v3 = vadd.f32 %v940_v18, %v3883_v27  ;;  %1927 = vmatprep.mubr.f32.mxu0 %v5955_v48  ;;  %v1198_v57 = vadd.f32 %v1197_v9, %v3885_v28 }
 0x15e   :  { %2184 = vmatprep.mubr.f32.mxu1 %v5954_v39  ;;  %v942_v14 = vpop.f32.mrf.mxu0  ;;  %v1199_v56 = vpop.f32.mrf.mxu1  ;;  %1928 = vmatmul.mubr.f32.vlgmr.msra.gmra.mxu0 %v5956_v25  ;;  %v6161_v27 = vmax.f32 %v4246_v49, 0.0  ;;  %v6162_v49 = vmax.f32 %v4263_v8, 0.0 }
 0x15f   :  { %v943_v34 = vadd.f32 %v942_v14, %v3894_v32  ;;  %v1200_v40 = vadd.f32 %v1199_v56, %v3896_v33  ;;  %v4287_v18 = vadd.f32 %v4228_v13, %v941_v3  ;;  %2378 = vmatpush1.msra.mxu0 %v1701_v30  ;;  %v5963_v39 = vmax.f32 %v4269_v23, 0.0  ;;  %v1698_v3 = vld [vmem:[#allocation3 + $0x160] sm:$0xff] }
 0x160   :  { %2185 = vmatmul.mubr.f32.vlgmr.msra.gmra.mxu1 %v6161_v27  ;;  %v946_v28 = vpop.f32.mrf.mxu0  ;;  %v1203_v9 = vpop.f32.mrf.mxu1  ;;  %v5958_v48 = vmax.f32 %v4272_v24, 0.0  ;;  %2379 = vmatprep.subr.mxu0 %v6086_v62  ;;  %v1794_v30 = vld [vmem:[#allocation3 + $0x460] sm:$0xff]  ;;  %v4302_v14 = vadd.f32 %v4231_v1, %v1198_v57  ;;  %v6163_v57 = vmax.f32 %v4266_v19, 0.0 }
 0x161   :  { %2603 = vmatpush1.msra.mxu1 %v1797_v15  ;;  %v4294_v33 = vadd.f32 %v4236_v47, %v943_v34  ;;  %v4297_v56 = vadd.f32 %v4238_v22, %v1200_v40  ;;  %v947_v15 = vadd.f32 %v946_v28, %v3898_v36  ;;  %v1204_v27 = vadd.f32 %v1203_v9, %v3900_v37 }
 0x162   :  { %2604 = vmatprep.subr.mxu1 %v6086_v62  ;;  %1933 = vmatprep.mubr.f32.mxu0 %v5963_v39  ;;  %v948_v34 = vpop.f32.mrf.mxu0  ;;  %v1205_v40 = vpop.f32.mrf.mxu1  ;;  %v5962_v28 = vmax.f32 %v4287_v18, 0.0 }
 0x163   :  { %2190 = vmatprep.mubr.f32.mxu1 %v5958_v48  ;;  %v949_v32 = vadd.f32 %v948_v34, %v3909_v41  ;;  %v1206_v25 = vadd.f32 %v1205_v40, %v3911_v42  ;;  %1934 = vmatmul.mubr.f32.gmra.mxu0 %v6162_v49  ;;  %v5960_v36 = vmax.f32 %v4294_v33, 0.0  ;;  %v5959_v37 = vmax.f32 %v4297_v56, 0.0  ;;  %v1695_v40 = vld [vmem:[#allocation3 + $0x148] sm:$0xff] }
 0x164   :  { %2191 = vmatmul.mubr.f32.gmra.mxu1 %v6163_v57  ;;  %2380 = vmatpush1.msra.mxu0 %v1698_v3  ;;  %v952_v9 = vpop.f32.mrf.mxu0  ;;  %v1209_v48 = vpop.f32.mrf.mxu1  ;;  %v4320_v41 = vadd.f32 %v4228_v13, %v947_v15  ;;  %v5961_v3 = vmax.f32 %v4302_v14, 0.0  ;;  %v4333_v57 = vadd.f32 %v4231_v1, %v1204_v27 }
 0x165   :  { %2605 = vmatpush1.msra.mxu1 %v1794_v30  ;;  %v4323_v42 = vadd.f32 %v4236_v47, %v949_v32  ;;  %v4326_v49 = vadd.f32 %v4238_v22, %v1206_v25  ;;  %v953_v34 = vadd.f32 %v952_v9, %v3913_v45  ;;  %1939 = vmatprep.mubr.f32.mxu0 %v5960_v36 }
 0x166   :  { %v1210_v30 = vadd.f32 %v1209_v48, %v3915_v46  ;;  %2196 = vmatprep.mubr.f32.mxu1 %v5959_v37  ;;  %v954_v32 = vpop.f32.mrf.mxu0  ;;  %v1211_v15 = vpop.f32.mrf.mxu1  ;;  %2381 = vmatprep.subr.mxu0 %v6086_v62  ;;  %v1791_v37 = vld [vmem:[#allocation3 + $0x448] sm:$0xff]  ;;  %v5965_v36 = vmax.f32 %v4320_v41, 0.0 }
 0x167   :  { %v955_v45 = vadd.f32 %v954_v32, %v3924_v50  ;;  %v1212_v25 = vadd.f32 %v1211_v15, %v3926_v51  ;;  %1940 = vmatmul.mubr.f32.gmra.mxu0 %v5962_v28  ;;  %v5970_v48 = vmax.f32 %v4323_v42, 0.0  ;;  %v5964_v9 = vmax.f32 %v4326_v49, 0.0  ;;  %2606 = vmatprep.subr.mxu1 %v6086_v62 }
 0x168   :  { %2197 = vmatmul.mubr.f32.gmra.mxu1 %v5961_v3  ;;  %2382 = vmatpush1.msra.mxu0 %v1695_v40  ;;  %v958_v27 = vpop.f32.mrf.mxu0  ;;  %v1215_v46 = vpop.f32.mrf.mxu1  ;;  %v4349_v50 = vadd.f32 %v4228_v13, %v953_v34  ;;  %v1692_v40 = vld [vmem:[#allocation3 + $0x130] sm:$0xff]  ;;  %v4361_v3 = vadd.f32 %v4231_v1, %v1210_v30  ;;  %v6164_v30 = vmax.f32 %v4333_v57, 0.0 }
 0x169   :  { %v4352_v51 = vadd.f32 %v4236_v47, %v955_v45  ;;  %v4355_v32 = vadd.f32 %v4238_v22, %v1212_v25  ;;  %2383 = vmatprep.subr.mxu0 %v6086_v62  ;;  %v959_v28 = vadd.f32 %v958_v27, %v3928_v54  ;;  %v1216_v34 = vadd.f32 %v1215_v46, %v3930_v55 }
 0x16a   :  { %1945 = vmatprep.mubr.f32.mxu0 %v5970_v48  ;;  %2202 = vmatprep.mubr.f32.mxu1 %v5964_v9  ;;  %v960_v45 = vpop.f32.mrf.mxu0  ;;  %v1217_v25 = vpop.f32.mrf.mxu1  ;;  %v1788_v9 = vld [vmem:[#allocation3 + $0x430] sm:$0xff] }
 0x16b   :  { %2607 = vmatpush1.msra.mxu1 %v1791_v37  ;;  %v961_v39 = vadd.f32 %v960_v45, %v3939_v59  ;;  %v1218_v15 = vadd.f32 %v1217_v25, %v3941_v60  ;;  %1946 = vmatmul.mubr.f32.gmra.mxu0 %v5965_v36  ;;  %v5967_v54 = vmax.f32 %v4352_v51, 0.0  ;;  %v5966_v55 = vmax.f32 %v4355_v32, 0.0  ;;  %v1689_v36 = vld [vmem:[#allocation3 + $0x118] sm:$0xff] }
 0x16c   :  { %2203 = vmatmul.mubr.f32.gmra.mxu1 %v6164_v30  ;;  %2384 = vmatpush1.msra.mxu0 %v1692_v40  ;;  %v964_v27 = vpop.f32.mrf.mxu0  ;;  %v1221_v46 = vpop.f32.mrf.mxu1  ;;  %v4378_v37 = vadd.f32 %v4228_v13, %v959_v28  ;;  %v5969_v25 = vmax.f32 %v4349_v50, 0.0  ;;  %v5968_v40 = vmax.f32 %v4361_v3, 0.0  ;;  %v4391_v30 = vadd.f32 %v4231_v1, %v1216_v34 }
 0x16d   :  { %v4381_v59 = vadd.f32 %v4236_v47, %v961_v39  ;;  %v4384_v60 = vadd.f32 %v4238_v22, %v1218_v15  ;;  %v965_v45 = vadd.f32 %v964_v27, %v3943_v63  ;;  %2608 = vmatprep.subr.mxu1 %v6086_v62  ;;  %v1222_v28 = vadd.f32 %v1221_v46, %v3945_v0 }
 0x16e   :  { %1951 = vmatprep.mubr.f32.mxu0 %v5967_v54  ;;  %2208 = vmatprep.mubr.f32.mxu1 %v5966_v55  ;;  %v966_v39 = vpop.f32.mrf.mxu0  ;;  %v1223_v15 = vpop.f32.mrf.mxu1  ;;  %v1785_v54 = vld [vmem:[#allocation3 + $0x418] sm:$0xff] }
 0x16f   :  { %2609 = vmatpush1.msra.mxu1 %v1788_v9  ;;  %v967_v63 = vadd.f32 %v966_v39, %v3954_v5  ;;  %v1224_v27 = vadd.f32 %v1223_v15, %v3956_v6  ;;  %1952 = vmatmul.mubr.f32.gmra.mxu0 %v5969_v25  ;;  %v5973_v46 = vmax.f32 %v4381_v59, 0.0  ;;  %v5971_v55 = vmax.f32 %v4384_v60, 0.0 }
 0x170   :  { %2209 = vmatmul.mubr.f32.gmra.mxu1 %v5968_v40  ;;  %v970_v0 = vpop.f32.mrf.mxu0  ;;  %v1227_v34 = vpop.f32.mrf.mxu1  ;;  %v5972_v9 = vmax.f32 %v4378_v37, 0.0  ;;  %v4408_v5 = vadd.f32 %v4228_v13, %v965_v45  ;;  %2385 = vmatprep.subr.mxu0 %v6086_v62  ;;  %v4420_v40 = vadd.f32 %v4231_v1, %v1222_v28  ;;  %v1686_v28 = vld [vmem:[#allocation3 + $0x100] sm:$0xff] }
 0x171   :  { %v4411_v6 = vadd.f32 %v4236_v47, %v967_v63  ;;  %v4414_v39 = vadd.f32 %v4238_v22, %v1224_v27  ;;  %2610 = vmatprep.subr.mxu1 %v6086_v62  ;;  %2386 = vmatpush1.msra.mxu0 %v1689_v36  ;;  %v971_v25 = vadd.f32 %v970_v0, %v3958_v11 }
 0x172   :  { %v1228_v45 = vadd.f32 %v1227_v34, %v3960_v12  ;;  %1957 = vmatprep.mubr.f32.mxu0 %v5973_v46  ;;  %v972_v63 = vpop.f32.mrf.mxu0  ;;  %v1229_v27 = vpop.f32.mrf.mxu1  ;;  %2214 = vmatprep.mubr.f32.mxu1 %v5971_v55  ;;  %v6165_v12 = vmax.f32 %v4391_v30, 0.0 }
 0x173   :  { %2611 = vmatpush1.msra.mxu1 %v1785_v54  ;;  %v973_v48 = vadd.f32 %v972_v63, %v3969_v20  ;;  %v1230_v15 = vadd.f32 %v1229_v27, %v3971_v21  ;;  %v5974_v36 = vmax.f32 %v4411_v6, 0.0  ;;  %v5975_v11 = vmax.f32 %v4414_v39, 0.0  ;;  %1958 = vmatmul.mubr.f32.gmra.mxu0 %v5972_v9  ;;  %v1782_v63 = vld [vmem:[#allocation3 + $0x400] sm:$0xff] }
 0x174   :  { %2215 = vmatmul.mubr.f32.gmra.mxu1 %v6165_v12  ;;  %v976_v0 = vpop.f32.mrf.mxu0  ;;  %v1233_v34 = vpop.f32.mrf.mxu1  ;;  %2387 = vmatprep.subr.mxu0 %v6086_v62  ;;  %v5976_v27 = vmax.f32 %v4408_v5, 0.0  ;;  %v4447_v9 = vadd.f32 %v4228_v13, %v971_v25  ;;  %v4452_v46 = vadd.f32 %v4231_v1, %v1228_v45 }
 0x175   :  { %v4437_v55 = vadd.f32 %v4236_v47, %v973_v48  ;;  %v4440_v20 = vadd.f32 %v4238_v22, %v1230_v15  ;;  %v977_v21 = vadd.f32 %v976_v0, %v3973_v26  ;;  %v1234_v54 = vadd.f32 %v1233_v34, %v3975_v29  ;;  %2388 = vmatpush1.msra.mxu0 %v1686_v28  ;;  %v1683_v29 = vld [vmem:[#allocation3 + $0xe8] sm:$0xff] }
 0x176   :  { %2612 = vmatprep.subr.mxu1 %v6086_v62  ;;  %v978_v48 = vpop.f32.mrf.mxu0  ;;  %v1235_v12 = vpop.f32.mrf.mxu1  ;;  %v5977_v15 = vmax.f32 %v4420_v40, 0.0  ;;  %1963 = vmatprep.mubr.f32.mxu0 %v5974_v36 }
 0x177   :  { %2220 = vmatprep.mubr.f32.mxu1 %v5975_v11  ;;  %v979_v26 = vadd.f32 %v978_v48, %v3984_v35  ;;  %v5978_v25 = vmax.f32 %v4437_v55, 0.0  ;;  %2613 = vmatpush1.msra.mxu1 %v1782_v63  ;;  %v1236_v28 = vadd.f32 %v1235_v12, %v3986_v38  ;;  %v5980_v34 = vmax.f32 %v4440_v20, 0.0  ;;  %v1779_v38 = vld [vmem:[#allocation3 + $0x3e8] sm:$0xff] }
 0x178   :  { %1964 = vmatmul.mubr.f32.gmra.mxu0 %v5976_v27  ;;  %v982_v0 = vpop.f32.mrf.mxu0  ;;  %v1239_v45 = vpop.f32.mrf.mxu1  ;;  %v4465_v36 = vadd.f32 %v4228_v13, %v977_v21  ;;  %v4468_v11 = vadd.f32 %v4231_v1, %v1234_v54  ;;  %2221 = vmatmul.mubr.f32.gmra.mxu1 %v5977_v15  ;;  %v5979_v63 = vmax.f32 %v4447_v9, 0.0  ;;  %v1680_v15 = vld [vmem:[#allocation3 + $0xd0] sm:$0xff] }
 0x179   :  { %v4471_v35 = vadd.f32 %v4236_v47, %v979_v26  ;;  %2389 = vmatprep.subr.mxu0 %v6086_v62  ;;  %v4478_v48 = vadd.f32 %v4238_v22, %v1236_v28  ;;  %v983_v21 = vadd.f32 %v982_v0, %v3988_v43  ;;  %v1240_v54 = vadd.f32 %v1239_v45, %v3990_v44 }
 0x17a   :  { %6166 = vst [vmem:[#allocation92_spill] sm:$0xff] %v4465_v36  ;;  %6167 = vst [vmem:[#allocation93_spill] sm:$0xff] %v4468_v11  ;;  %2390 = vmatpush1.msra.mxu0 %v1683_v29  ;;  %2614 = vmatprep.subr.mxu1 %v6086_v62  ;;  %v984_v12 = vpop.f32.mrf.mxu0  ;;  %v1241_v26 = vpop.f32.mrf.mxu1 }
 0x17b   :  { %1969 = vmatprep.mubr.f32.mxu0 %v5978_v25  ;;  %2226 = vmatprep.mubr.f32.mxu1 %v5980_v34  ;;  %v985_v28 = vadd.f32 %v984_v12, %v3999_v52  ;;  %v1242_v29 = vadd.f32 %v1241_v26, %v4001_v53  ;;  %v5983_v43 = vmax.f32 %v4471_v35, 0.0  ;;  %v5981_v45 = vmax.f32 %v4478_v48, 0.0  ;;  %v1677_v12 = vld [vmem:[#allocation3 + $0xb8] sm:$0xff] }
 0x17c   :  { %2615 = vmatpush1.msra.mxu1 %v1779_v38  ;;  %1970 = vmatmul.mubr.f32.gmra.mxu0 %v5979_v63  ;;  %v988_v44 = vpop.f32.mrf.mxu0  ;;  %v1245_v0 = vpop.f32.mrf.mxu1  ;;  %v5982_v25 = vmax.f32 %v4465_v36, 0.0  ;;  %v6170_v53 = vmax.f32 %v4452_v46, 0.0  ;;  %v1776_v38 = vld [vmem:[#allocation3 + $0x3d0] sm:$0xff]  ;;  %v4506_v26 = vadd.f32 %v4228_v13, %v983_v21  ;;  %v4509_v63 = vadd.f32 %v4231_v1, %v1240_v54 }
 0x17d   :  { %v4496_v27 = vadd.f32 %v4236_v47, %v985_v28  ;;  %v4499_v52 = vadd.f32 %v4238_v22, %v1242_v29  ;;  %2391 = vmatprep.subr.mxu0 %v6086_v62  ;;  %v989_v28 = vadd.f32 %v988_v44, %v4003_v58  ;;  %2616 = vmatprep.subr.mxu1 %v6086_v62 }
 0x17e   :  { %2227 = vmatmul.mubr.f32.gmra.mxu1 %v6170_v53  ;;  %6171 = vst [vmem:[#allocation96_spill] sm:$0xff] %v4506_v26  ;;  %6172 = vst [vmem:[#allocation97_spill] sm:$0xff] %v4509_v63  ;;  %2392 = vmatpush1.msra.mxu0 %v1680_v15  ;;  %v990_v29 = vpop.f32.mrf.mxu0  ;;  %v1247_v34 = vpop.f32.mrf.mxu1  ;;  %v1246_v53 = vadd.f32 %v1245_v0, %v4005_v61 }
 0x17f   :  { %6168 = vst [vmem:[#allocation94_spill] sm:$0xff] %v4496_v27  ;;  %6169 = vst [vmem:[#allocation95_spill] sm:$0xff] %v4499_v52  ;;  %1975 = vmatprep.mubr.f32.mxu0 %v5983_v43  ;;  %2232 = vmatprep.mubr.f32.mxu1 %v5981_v45  ;;  %v991_v21 = vadd.f32 %v990_v29, %v4014_v4  ;;  %v1248_v54 = vadd.f32 %v1247_v34, %v4016_v7  ;;  %v5985_v15 = vmax.f32 %v4496_v27, 0.0  ;;  %v1773_v34 = vld [vmem:[#allocation3 + $0x3b8] sm:$0xff]  ;;  %v1671_v27 = vld [vmem:[#allocation3 + $0x88] sm:$0xff] }
 0x180   :  { %2617 = vmatpush1.msra.mxu1 %v1776_v38  ;;  %1976 = vmatmul.mubr.f32.gmra.mxu0 %v5982_v25  ;;  %v994_v58 = vpop.f32.mrf.mxu0  ;;  %v1251_v44 = vpop.f32.mrf.mxu1  ;;  %v5986_v61 = vmax.f32 %v4499_v52, 0.0  ;;  %v6175_v4 = vmax.f32 %v4468_v11, 0.0  ;;  %v5987_v38 = vmax.f32 %v4506_v26, 0.0  ;;  %v4537_v25 = vadd.f32 %v4228_v13, %v989_v28  ;;  %v6179_v28 = vld [vmem:[#allocation7_spill] sm:$0xff]  ;;  %v6186_v11 = vld [vmem:[#allocation9_spill] sm:$0xff] }
 0x181   :  { %v4525_v0 = vadd.f32 %v4236_v47, %v991_v21  ;;  %v4528_v45 = vadd.f32 %v4238_v22, %v1248_v54  ;;  %2393 = vmatprep.subr.mxu0 %v6086_v62  ;;  %v995_v7 = vadd.f32 %v994_v58, %v4018_v16  ;;  %v1252_v21 = vadd.f32 %v1251_v44, %v4020_v17  ;;  %v6178_v16 = vld [vmem:[#allocation6_spill] sm:$0xff]  ;;  %v6190_v52 = vld [vmem:[#allocation11_spill] sm:$0xff] }
 0x182   :  { %2233 = vmatmul.mubr.f32.gmra.mxu1 %v6175_v4  ;;  %6176 = vst [vmem:[#allocation100_spill] sm:$0xff] %v4537_v25  ;;  %2394 = vmatpush1.msra.mxu0 %v1677_v12  ;;  %v996_v54 = vpop.f32.mrf.mxu0  ;;  %v1253_v43 = vpop.f32.mrf.mxu1  ;;  %v4542_v4 = vadd.f32 %v4231_v1, %v1246_v53  ;;  %v1674_v12 = vld [vmem:[#allocation3 + $0xa0] sm:$0xff] }
 0x183   :  { %6173 = vst [vmem:[#allocation98_spill] sm:$0xff] %v4525_v0  ;;  %6174 = vst [vmem:[#allocation99_spill] sm:$0xff] %v4528_v45  ;;  %2618 = vmatprep.subr.mxu1 %v6086_v62  ;;  %1981 = vmatprep.mubr.f32.mxu0 %v5985_v15  ;;  %v997_v58 = vadd.f32 %v996_v54, %v6178_v16  ;;  %v1254_v29 = vadd.f32 %v1253_v43, %v6179_v28  ;;  %v6183_v43 = vmax.f32 %v4509_v63, 0.0  ;;  %v6189_v16 = vld [vmem:[#allocation10_spill] sm:$0xff]  ;;  %v6198_v63 = vld [vmem:[#allocation13_spill] sm:$0xff] }
 0x184   :  { %6177 = vst [vmem:[#allocation101_spill] sm:$0xff] %v4542_v4  ;;  %2238 = vmatprep.mubr.f32.mxu1 %v5986_v61  ;;  %2619 = vmatpush1.msra.mxu1 %v1773_v34  ;;  %v1000_v44 = vpop.f32.mrf.mxu0  ;;  %v1257_v53 = vpop.f32.mrf.mxu1  ;;  %v4555_v15 = vadd.f32 %v4228_v13, %v995_v7  ;;  %v1770_v34 = vld [vmem:[#allocation3 + $0x3a0] sm:$0xff]  ;;  %v4568_v28 = vadd.f32 %v4231_v1, %v1252_v21  ;;  %v6185_v7 = vld [vmem:[#allocation8_spill] sm:$0xff]  ;;  %v6188_v26 = vmax.f32 %v4528_v45, 0.0 }
 0x185   :  { %1982 = vmatmul.mubr.f32.gmra.mxu0 %v5987_v38  ;;  %v4558_v61 = vadd.f32 %v4236_v47, %v997_v58  ;;  %v4561_v54 = vadd.f32 %v4238_v22, %v1254_v29  ;;  %2395 = vmatprep.subr.mxu0 %v6086_v62  ;;  %v1001_v38 = vadd.f32 %v1000_v44, %v6185_v7 }
 0x186   :  { %6180 = vst [vmem:[#allocation6_spill] sm:$0xff] %v4555_v15  ;;  %2239 = vmatmul.mubr.f32.gmra.mxu1 %v6183_v43  ;;  %6184 = vst [vmem:[#allocation103_spill] sm:$0xff] %v4568_v28  ;;  %2396 = vmatpush1.msra.mxu0 %v1674_v12  ;;  %v1258_v58 = vadd.f32 %v1257_v53, %v6186_v11  ;;  %v1002_v29 = vpop.f32.mrf.mxu0  ;;  %v1259_v17 = vpop.f32.mrf.mxu1  ;;  %v6187_v43 = vmax.f32 %v4525_v0, 0.0  ;;  %v6191_v11 = vmax.f32 %v4537_v25, 0.0  ;;  %v6201_v25 = vld [vmem:[#allocation15_spill] sm:$0xff]  ;;  %v1668_v0 = vld [vmem:[#allocation3 + $0x70] sm:$0xff] }
 0x187   :  { %6181 = vst [vmem:[#allocation7_spill] sm:$0xff] %v4558_v61  ;;  %6182 = vst [vmem:[#allocation102_spill] sm:$0xff] %v4561_v54  ;;  %2620 = vmatprep.subr.mxu1 %v6086_v62  ;;  %2244 = vmatprep.mubr.f32.mxu1 %v6188_v26  ;;  %v1003_v21 = vadd.f32 %v1002_v29, %v6189_v16  ;;  %v1260_v12 = vadd.f32 %v1259_v17, %v6190_v52  ;;  %v5997_v44 = vmax.f32 %v4558_v61, 0.0  ;;  %v1767_v17 = vld [vmem:[#allocation3 + $0x388] sm:$0xff] }
 0x188   :  { %1987 = vmatprep.mubr.f32.mxu0 %v6187_v43  ;;  %2621 = vmatpush1.msra.mxu1 %v1770_v34  ;;  %v1006_v53 = vpop.f32.mrf.mxu0  ;;  %v1263_v7 = vpop.f32.mrf.mxu1  ;;  %v6194_v52 = vmax.f32 %v4542_v4, 0.0  ;;  %v4596_v16 = vadd.f32 %v4228_v13, %v1001_v38  ;;  %v4599_v29 = vadd.f32 %v4231_v1, %v1258_v58  ;;  %v6199_v34 = vmax.f32 %v4561_v54, 0.0  ;;  %v6200_v38 = vld [vmem:[#allocation14_spill] sm:$0xff]  ;;  %v6221_v54 = vld [vmem:[#allocation21_spill] sm:$0xff] }
 0x189   :  { %1988 = vmatmul.mubr.f32.gmra.mxu0 %v6191_v11  ;;  %v4586_v45 = vadd.f32 %v4236_v47, %v1003_v21  ;;  %v4589_v26 = vadd.f32 %v4238_v22, %v1260_v12  ;;  %2397 = vmatprep.subr.mxu0 %v6086_v62  ;;  %v6197_v21 = vld [vmem:[#allocation12_spill] sm:$0xff] }
 0x18a   :  { %2245 = vmatmul.mubr.f32.gmra.mxu1 %v6194_v52  ;;  %6195 = vst [vmem:[#allocation10_spill] sm:$0xff] %v4596_v16  ;;  %6196 = vst [vmem:[#allocation11_spill] sm:$0xff] %v4599_v29  ;;  %2398 = vmatpush1.msra.mxu0 %v1671_v27  ;;  %v1007_v11 = vadd.f32 %v1006_v53, %v6197_v21  ;;  %v1008_v12 = vpop.f32.mrf.mxu0  ;;  %v1265_v43 = vpop.f32.mrf.mxu1  ;;  %v1264_v52 = vadd.f32 %v1263_v7, %v6198_v63  ;;  %v6202_v53 = vmax.f32 %v4555_v15, 0.0 }
 0x18b   :  { %6192 = vst [vmem:[#allocation8_spill] sm:$0xff] %v4586_v45  ;;  %6193 = vst [vmem:[#allocation9_spill] sm:$0xff] %v4589_v26  ;;  %2622 = vmatprep.subr.mxu1 %v6086_v62  ;;  %1993 = vmatprep.mubr.f32.mxu0 %v5997_v44  ;;  %v1009_v4 = vadd.f32 %v1008_v12, %v6200_v38  ;;  %v1266_v58 = vadd.f32 %v1265_v43, %v6201_v25  ;;  %v6205_v12 = vmax.f32 %v4568_v28, 0.0  ;;  %v6206_v25 = vld [vmem:[#allocation16_spill] sm:$0xff] }
 0x18c   :  { %2250 = vmatprep.mubr.f32.mxu1 %v6199_v34  ;;  %2623 = vmatpush1.msra.mxu1 %v1767_v17  ;;  %v1012_v21 = vpop.f32.mrf.mxu0  ;;  %v1269_v36 = vpop.f32.mrf.mxu1  ;;  %v1764_v17 = vld [vmem:[#allocation3 + $0x370] sm:$0xff]  ;;  %v4627_v44 = vadd.f32 %v4228_v13, %v1007_v11  ;;  %v6213_v11 = vld [vmem:[#allocation19_spill] sm:$0xff] }
 0x18d   :  { %1994 = vmatmul.mubr.f32.gmra.mxu0 %v6202_v53  ;;  %v4615_v7 = vadd.f32 %v4236_v47, %v1009_v4  ;;  %v4618_v34 = vadd.f32 %v4238_v22, %v1266_v58  ;;  %2399 = vmatprep.subr.mxu0 %v6086_v62  ;;  %v1013_v43 = vadd.f32 %v1012_v21, %v6206_v25  ;;  %v6208_v4 = vld [vmem:[#allocation17_spill] sm:$0xff]  ;;  %v6210_v21 = vmax.f32 %v4586_v45, 0.0  ;;  %v6212_v53 = vld [vmem:[#allocation18_spill] sm:$0xff] }
 0x18e   :  { %2251 = vmatmul.mubr.f32.gmra.mxu1 %v6205_v12  ;;  %6207 = vst [vmem:[#allocation14_spill] sm:$0xff] %v4627_v44  ;;  %2400 = vmatpush1.msra.mxu0 %v1668_v0  ;;  %v1270_v63 = vadd.f32 %v1269_v36, %v6208_v4  ;;  %v1014_v58 = vpop.f32.mrf.mxu0  ;;  %v1271_v27 = vpop.f32.mrf.mxu1  ;;  %v4632_v12 = vadd.f32 %v4231_v1, %v1264_v52  ;;  %v6211_v25 = vmax.f32 %v4589_v26, 0.0  ;;  %v1665_v0 = vld [vmem:[#allocation3 + $0x58] sm:$0xff]  ;;  %v6214_v4 = vmax.f32 %v4596_v16, 0.0  ;;  %v6225_v26 = vld [vmem:[#allocation23_spill] sm:$0xff]  ;;  %v1662_v45 = vld [vmem:[#allocation3 + $0x40] sm:$0xff] }
 0x18f   :  { %6203 = vst [vmem:[#allocation12_spill] sm:$0xff] %v4615_v7  ;;  %6204 = vst [vmem:[#allocation13_spill] sm:$0xff] %v4618_v34  ;;  %2624 = vmatprep.subr.mxu1 %v6086_v62  ;;  %1999 = vmatprep.mubr.f32.mxu0 %v6210_v21  ;;  %v1015_v38 = vadd.f32 %v1014_v58, %v6212_v53  ;;  %v1272_v28 = vadd.f32 %v1271_v27, %v6213_v11  ;;  %v6218_v27 = vmax.f32 %v4599_v29, 0.0  ;;  %v6224_v58 = vld [vmem:[#allocation22_spill] sm:$0xff]  ;;  %v6233_v29 = vld [vmem:[#allocation25_spill] sm:$0xff] }
 0x190   :  { %6209 = vst [vmem:[#allocation15_spill] sm:$0xff] %v4632_v12  ;;  %2256 = vmatprep.mubr.f32.mxu1 %v6211_v25  ;;  %2625 = vmatpush1.msra.mxu1 %v1764_v17  ;;  %v1018_v15 = vpop.f32.mrf.mxu0  ;;  %v1275_v52 = vpop.f32.mrf.mxu1  ;;  %v4645_v21 = vadd.f32 %v4228_v13, %v1013_v43  ;;  %v1761_v17 = vld [vmem:[#allocation3 + $0x358] sm:$0xff]  ;;  %v4658_v11 = vadd.f32 %v4231_v1, %v1270_v63  ;;  %v6220_v43 = vld [vmem:[#allocation20_spill] sm:$0xff]  ;;  %v6223_v16 = vmax.f32 %v4618_v34, 0.0 }
 0x191   :  { %2000 = vmatmul.mubr.f32.gmra.mxu0 %v6214_v4  ;;  %v4648_v25 = vadd.f32 %v4236_v47, %v1015_v38  ;;  %v4651_v53 = vadd.f32 %v4238_v22, %v1272_v28  ;;  %2401 = vmatprep.subr.mxu0 %v6086_v62  ;;  %v1019_v4 = vadd.f32 %v1018_v15, %v6220_v43 }
 0x192   :  { %6215 = vst [vmem:[#allocation16_spill] sm:$0xff] %v4645_v21  ;;  %2257 = vmatmul.mubr.f32.gmra.mxu1 %v6218_v27  ;;  %6219 = vst [vmem:[#allocation19_spill] sm:$0xff] %v4658_v11  ;;  %2402 = vmatpush1.msra.mxu0 %v1665_v0  ;;  %v1276_v38 = vadd.f32 %v1275_v52, %v6221_v54  ;;  %v1020_v28 = vpop.f32.mrf.mxu0  ;;  %v1277_v36 = vpop.f32.mrf.mxu1  ;;  %v6222_v27 = vmax.f32 %v4615_v7, 0.0  ;;  %v6226_v54 = vmax.f32 %v4627_v44, 0.0  ;;  %v6236_v44 = vld [vmem:[#allocation27_spill] sm:$0xff] }
 0x193   :  { %6216 = vst [vmem:[#allocation17_spill] sm:$0xff] %v4648_v25  ;;  %6217 = vst [vmem:[#allocation18_spill] sm:$0xff] %v4651_v53  ;;  %2626 = vmatprep.subr.mxu1 %v6086_v62  ;;  %2262 = vmatprep.mubr.f32.mxu1 %v6223_v16  ;;  %v1021_v63 = vadd.f32 %v1020_v28, %v6224_v58  ;;  %v1278_v0 = vadd.f32 %v1277_v36, %v6225_v26  ;;  %v6010_v15 = vmax.f32 %v4648_v25, 0.0  ;;  %v1758_v36 = vld [vmem:[#allocation3 + $0x340] sm:$0xff]  ;;  %v1659_v7 = vld [vmem:[#allocation3 + $0x28] sm:$0xff] }
 0x194   :  { %2005 = vmatprep.mubr.f32.mxu0 %v6222_v27  ;;  %2627 = vmatpush1.msra.mxu1 %v1761_v17  ;;  %v1024_v52 = vpop.f32.mrf.mxu0  ;;  %v1281_v43 = vpop.f32.mrf.mxu1  ;;  %v6229_v26 = vmax.f32 %v4632_v12, 0.0  ;;  %v4686_v58 = vadd.f32 %v4228_v13, %v1019_v4  ;;  %v4689_v28 = vadd.f32 %v4231_v1, %v1276_v38  ;;  %v6234_v17 = vmax.f32 %v4651_v53, 0.0  ;;  %v6235_v4 = vld [vmem:[#allocation26_spill] sm:$0xff]  ;;  %v6256_v53 = vld [vmem:[#allocation33_spill] sm:$0xff] }
 0x195   :  { %2006 = vmatmul.mubr.f32.gmra.mxu0 %v6226_v54  ;;  %v4676_v34 = vadd.f32 %v4236_v47, %v1021_v63  ;;  %v4679_v16 = vadd.f32 %v4238_v22, %v1278_v0  ;;  %2403 = vmatprep.subr.mxu0 %v6086_v62  ;;  %v6232_v63 = vld [vmem:[#allocation24_spill] sm:$0xff] }
 0x196   :  { %2263 = vmatmul.mubr.f32.gmra.mxu1 %v6229_v26  ;;  %6230 = vst [vmem:[#allocation22_spill] sm:$0xff] %v4686_v58  ;;  %6231 = vst [vmem:[#allocation23_spill] sm:$0xff] %v4689_v28  ;;  %2404 = vmatpush1.msra.mxu0 %v1662_v45  ;;  %v1025_v54 = vadd.f32 %v1024_v52, %v6232_v63  ;;  %v1026_v0 = vpop.f32.mrf.mxu0  ;;  %v1283_v27 = vpop.f32.mrf.mxu1  ;;  %v1282_v26 = vadd.f32 %v1281_v43, %v6233_v29  ;;  %v6237_v52 = vmax.f32 %v4645_v21, 0.0 }
 0x197   :  { %6227 = vst [vmem:[#allocation20_spill] sm:$0xff] %v4676_v34  ;;  %6228 = vst [vmem:[#allocation21_spill] sm:$0xff] %v4679_v16  ;;  %2628 = vmatprep.subr.mxu1 %v6086_v62  ;;  %2011 = vmatprep.mubr.f32.mxu0 %v6010_v15  ;;  %v1027_v12 = vadd.f32 %v1026_v0, %v6235_v4  ;;  %v1284_v38 = vadd.f32 %v1283_v27, %v6236_v44  ;;  %v6240_v0 = vmax.f32 %v4658_v11, 0.0  ;;  %v6241_v44 = vld [vmem:[#allocation28_spill] sm:$0xff] }
 0x198   :  { %2268 = vmatprep.mubr.f32.mxu1 %v6234_v17  ;;  %2629 = vmatpush1.msra.mxu1 %v1758_v36  ;;  %v1030_v63 = vpop.f32.mrf.mxu0  ;;  %v1287_v61 = vpop.f32.mrf.mxu1  ;;  %v1755_v36 = vld [vmem:[#allocation3 + $0x328] sm:$0xff]  ;;  %v4717_v15 = vadd.f32 %v4228_v13, %v1025_v54 }
 0x199   :  { %2012 = vmatmul.mubr.f32.gmra.mxu0 %v6237_v52  ;;  %v4705_v43 = vadd.f32 %v4236_v47, %v1027_v12  ;;  %v4708_v17 = vadd.f32 %v4238_v22, %v1284_v38  ;;  %2405 = vmatprep.subr.mxu0 %v6086_v62  ;;  %v1031_v27 = vadd.f32 %v1030_v63, %v6241_v44  ;;  %v6243_v12 = vld [vmem:[#allocation29_spill] sm:$0xff]  ;;  %v6245_v63 = vmax.f32 %v4676_v34, 0.0  ;;  %v6247_v52 = vld [vmem:[#allocation30_spill] sm:$0xff]  ;;  %v6248_v54 = vld [vmem:[#allocation31_spill] sm:$0xff] }
 0x19a   :  { %2269 = vmatmul.mubr.f32.gmra.mxu1 %v6240_v0  ;;  %6242 = vst [vmem:[#allocation26_spill] sm:$0xff] %v4717_v15  ;;  %2406 = vmatpush1.msra.mxu0 %v1659_v7  ;;  %v1288_v29 = vadd.f32 %v1287_v61, %v6243_v12  ;;  %v1032_v38 = vpop.f32.mrf.mxu0  ;;  %v1289_v45 = vpop.f32.mrf.mxu1  ;;  %v4722_v0 = vadd.f32 %v4231_v1, %v1282_v26  ;;  %v6246_v44 = vmax.f32 %v4679_v16, 0.0  ;;  %v1656_v7 = vld [vmem:[#allocation3 + $0x10] sm:$0xff]  ;;  %v6249_v12 = vmax.f32 %v4686_v58, 0.0  ;;  %v6260_v16 = vld [vmem:[#allocation35_spill] sm:$0xff]  ;;  %v1749_v34 = vld [vmem:[#allocation3 + $0x2f8] sm:$0xff] }
 0x19b   :  { %6238 = vst [vmem:[#allocation24_spill] sm:$0xff] %v4705_v43  ;;  %6239 = vst [vmem:[#allocation25_spill] sm:$0xff] %v4708_v17  ;;  %2630 = vmatprep.subr.mxu1 %v6086_v62  ;;  %2017 = vmatprep.mubr.f32.mxu0 %v6245_v63  ;;  %v1033_v4 = vadd.f32 %v1032_v38, %v6247_v52  ;;  %v1290_v11 = vadd.f32 %v1289_v45, %v6248_v54  ;;  %v6253_v45 = vmax.f32 %v4689_v28, 0.0  ;;  %v6259_v38 = vld [vmem:[#allocation34_spill] sm:$0xff]  ;;  %v6268_v28 = vld [vmem:[#allocation37_spill] sm:$0xff] }
 0x19c   :  { %6244 = vst [vmem:[#allocation27_spill] sm:$0xff] %v4722_v0  ;;  %2274 = vmatprep.mubr.f32.mxu1 %v6246_v44  ;;  %2631 = vmatpush1.msra.mxu1 %v1755_v36  ;;  %v1036_v21 = vpop.f32.mrf.mxu0  ;;  %v1293_v26 = vpop.f32.mrf.mxu1  ;;  %v4735_v63 = vadd.f32 %v4228_v13, %v1031_v27  ;;  %v1752_v36 = vld [vmem:[#allocation3 + $0x310] sm:$0xff]  ;;  %v4748_v54 = vadd.f32 %v4231_v1, %v1288_v29  ;;  %v6258_v58 = vmax.f32 %v4708_v17, 0.0 }
 0x19d   :  { %2018 = vmatmul.mubr.f32.gmra.mxu0 %v6249_v12  ;;  %v4738_v44 = vadd.f32 %v4236_v47, %v1033_v4  ;;  %v4741_v52 = vadd.f32 %v4238_v22, %v1290_v11  ;;  %2407 = vmatprep.subr.mxu0 %v6086_v62  ;;  %v6255_v27 = vld [vmem:[#allocation32_spill] sm:$0xff]  ;;  %v1294_v4 = vadd.f32 %v1293_v26, %v6256_v53  ;;  %v6261_v53 = vmax.f32 %v4717_v15, 0.0  ;;  %v6271_v15 = vld [vmem:[#allocation39_spill] sm:$0xff] }
 0x19e   :  { %6250 = vst [vmem:[#allocation28_spill] sm:$0xff] %v4735_v63  ;;  %2275 = vmatmul.mubr.f32.gmra.mxu1 %v6253_v45  ;;  %6254 = vst [vmem:[#allocation31_spill] sm:$0xff] %v4748_v54  ;;  %2408 = vmatpush1.msra.mxu0 %v1656_v7  ;;  %v1037_v12 = vadd.f32 %v1036_v21, %v6255_v27  ;;  %v1038_v11 = vpop.f32.mrf.mxu0  ;;  %v1295_v61 = vpop.f32.mrf.mxu1  ;;  %v6257_v45 = vmax.f32 %v4705_v43, 0.0  ;;  %v1746_v43 = vld [vmem:[#allocation3 + $0x2e0] sm:$0xff] }
 0x19f   :  { %6251 = vst [vmem:[#allocation29_spill] sm:$0xff] %v4738_v44  ;;  %6252 = vst [vmem:[#allocation30_spill] sm:$0xff] %v4741_v52  ;;  %2632 = vmatprep.subr.mxu1 %v6086_v62  ;;  %2280 = vmatprep.mubr.f32.mxu1 %v6258_v58  ;;  %v1039_v29 = vadd.f32 %v1038_v11, %v6259_v38  ;;  %v1296_v7 = vadd.f32 %v1295_v61, %v6260_v16  ;;  %v6023_v21 = vmax.f32 %v4738_v44, 0.0  ;;  %v1845_v61 = vld [vmem:[#allocation3 + $0x5f8] sm:$0xff] }
 0x1a0   :  { %2023 = vmatprep.mubr.f32.mxu0 %v6257_v45  ;;  %2633 = vmatpush1.msra.mxu1 %v1752_v36  ;;  %v1042_v26 = vpop.f32.mrf.mxu0  ;;  %v1299_v27 = vpop.f32.mrf.mxu1  ;;  %v6264_v16 = vmax.f32 %v4722_v0, 0.0  ;;  %v4776_v38 = vadd.f32 %v4228_v13, %v1037_v12  ;;  %v4779_v11 = vadd.f32 %v4231_v1, %v1294_v4  ;;  %v6269_v36 = vmax.f32 %v4741_v52, 0.0  ;;  %v6270_v12 = vld [vmem:[#allocation38_spill] sm:$0xff]  ;;  %v6291_v52 = vld [vmem:[#allocation45_spill] sm:$0xff] }
 0x1a1   :  { %2024 = vmatmul.mubr.f32.gmra.mxu0 %v6261_v53  ;;  %v4766_v17 = vadd.f32 %v4236_v47, %v1039_v29  ;;  %v4769_v58 = vadd.f32 %v4238_v22, %v1296_v7  ;;  %2409 = vmatprep.subr.mxu0 %v6086_v62  ;;  %v6267_v29 = vld [vmem:[#allocation36_spill] sm:$0xff] }
 0x1a2   :  { %2281 = vmatmul.mubr.f32.gmra.mxu1 %v6264_v16  ;;  %6265 = vst [vmem:[#allocation34_spill] sm:$0xff] %v4776_v38  ;;  %6266 = vst [vmem:[#allocation35_spill] sm:$0xff] %v4779_v11  ;;  %2410 = vmatpush2.msra.mxu0 %v1749_v34  ;;  %v1043_v53 = vadd.f32 %v1042_v26, %v6267_v29  ;;  %v1044_v7 = vpop.f32.mrf.mxu0  ;;  %v1301_v45 = vpop.f32.mrf.mxu1  ;;  %v1300_v16 = vadd.f32 %v1299_v27, %v6268_v28  ;;  %v6272_v26 = vmax.f32 %v4735_v63, 0.0 }
 0x1a3   :  { %6262 = vst [vmem:[#allocation32_spill] sm:$0xff] %v4766_v17  ;;  %6263 = vst [vmem:[#allocation33_spill] sm:$0xff] %v4769_v58  ;;  %2634 = vmatprep.subr.mxu1 %v6086_v62  ;;  %2029 = vmatprep.mubr.f32.mxu0 %v6023_v21  ;;  %v1045_v0 = vadd.f32 %v1044_v7, %v6270_v12  ;;  %v1302_v4 = vadd.f32 %v1301_v45, %v6271_v15  ;;  %v6275_v7 = vmax.f32 %v4748_v54, 0.0  ;;  %v6276_v15 = vld [vmem:[#allocation40_spill] sm:$0xff] }
 0x1a4   :  { %2286 = vmatprep.mubr.f32.mxu1 %v6269_v36  ;;  %2635 = vmatpush2.msra.mxu1 %v1845_v61  ;;  %v1048_v29 = vpop.f32.mrf.mxu0  ;;  %v1305_v25 = vpop.f32.mrf.mxu1  ;;  %v1842_v61 = vld [vmem:[#allocation3 + $0x5e0] sm:$0xff]  ;;  %v4807_v21 = vadd.f32 %v4228_v13, %v1043_v53  ;;  %v6283_v53 = vld [vmem:[#allocation43_spill] sm:$0xff] }
 0x1a5   :  { %2030 = vmatmul.mubr.f32.gmra.mxu0 %v6272_v26  ;;  %v4795_v27 = vadd.f32 %v4236_v47, %v1045_v0  ;;  %v4798_v36 = vadd.f32 %v4238_v22, %v1302_v4  ;;  %2411 = vmatprep.subr.mxu0 %v6086_v62  ;;  %v1049_v45 = vadd.f32 %v1048_v29, %v6276_v15  ;;  %v6278_v0 = vld [vmem:[#allocation41_spill] sm:$0xff]  ;;  %v6280_v29 = vmax.f32 %v4766_v17, 0.0  ;;  %v6282_v26 = vld [vmem:[#allocation42_spill] sm:$0xff]  ;;  %v1740_v17 = vld [vmem:[#allocation3 + $0x2b0] sm:$0xff] }
 0x1a6   :  { %2287 = vmatmul.mubr.f32.gmra.mxu1 %v6275_v7  ;;  %6277 = vst [vmem:[#allocation38_spill] sm:$0xff] %v4807_v21  ;;  %2412 = vmatpush2.msra.mxu0 %v1746_v43  ;;  %v1306_v28 = vadd.f32 %v1305_v25, %v6278_v0  ;;  %v1050_v4 = vpop.f32.mrf.mxu0  ;;  %v1307_v34 = vpop.f32.mrf.mxu1  ;;  %v4812_v7 = vadd.f32 %v4231_v1, %v1300_v16  ;;  %v6281_v15 = vmax.f32 %v4769_v58, 0.0  ;;  %v1743_v43 = vld [vmem:[#allocation3 + $0x2c8] sm:$0xff]  ;;  %v6284_v0 = vmax.f32 %v4776_v38, 0.0 }
 0x1a7   :  { %6273 = vst [vmem:[#allocation36_spill] sm:$0xff] %v4795_v27  ;;  %6274 = vst [vmem:[#allocation37_spill] sm:$0xff] %v4798_v36  ;;  %2636 = vmatprep.subr.mxu1 %v6086_v62  ;;  %2035 = vmatprep.mubr.f32.mxu0 %v6280_v29  ;;  %v1051_v12 = vadd.f32 %v1050_v4, %v6282_v26  ;;  %v1308_v54 = vadd.f32 %v1307_v34, %v6283_v53  ;;  %v6288_v34 = vmax.f32 %v4779_v11, 0.0  ;;  %v6294_v4 = vld [vmem:[#allocation46_spill] sm:$0xff]  ;;  %v6295_v58 = vld [vmem:[#allocation47_spill] sm:$0xff] }
 0x1a8   :  { %6279 = vst [vmem:[#allocation39_spill] sm:$0xff] %v4812_v7  ;;  %2292 = vmatprep.mubr.f32.mxu1 %v6281_v15  ;;  %2637 = vmatpush2.msra.mxu1 %v1842_v61  ;;  %v1054_v63 = vpop.f32.mrf.mxu0  ;;  %v1311_v16 = vpop.f32.mrf.mxu1  ;;  %v4825_v29 = vadd.f32 %v4228_v13, %v1049_v45  ;;  %v1839_v61 = vld [vmem:[#allocation3 + $0x5c8] sm:$0xff]  ;;  %v4838_v53 = vadd.f32 %v4231_v1, %v1306_v28  ;;  %v6290_v45 = vld [vmem:[#allocation44_spill] sm:$0xff]  ;;  %v6293_v38 = vmax.f32 %v4798_v36, 0.0  ;;  %v6303_v11 = vld [vmem:[#allocation49_spill] sm:$0xff] }
 0x1a9   :  { %2036 = vmatmul.mubr.f32.gmra.mxu0 %v6284_v0  ;;  %v4828_v15 = vadd.f32 %v4236_v47, %v1051_v12  ;;  %v4831_v26 = vadd.f32 %v4238_v22, %v1308_v54  ;;  %2413 = vmatprep.subr.mxu0 %v6086_v62  ;;  %v1055_v0 = vadd.f32 %v1054_v63, %v6290_v45 }
 0x1aa   :  { %6285 = vst [vmem:[#allocation40_spill] sm:$0xff] %v4825_v29  ;;  %2293 = vmatmul.mubr.f32.gmra.mxu1 %v6288_v34  ;;  %6289 = vst [vmem:[#allocation43_spill] sm:$0xff] %v4838_v53  ;;  %2414 = vmatpush2.msra.mxu0 %v1743_v43  ;;  %v1312_v12 = vadd.f32 %v1311_v16, %v6291_v52  ;;  %v1056_v54 = vpop.f32.mrf.mxu0  ;;  %v1313_v25 = vpop.f32.mrf.mxu1  ;;  %v6292_v34 = vmax.f32 %v4795_v27, 0.0  ;;  %v6296_v52 = vmax.f32 %v4807_v21, 0.0  ;;  %v6306_v21 = vld [vmem:[#allocation51_spill] sm:$0xff]  ;;  %v1737_v27 = vld [vmem:[#allocation3 + $0x298] sm:$0xff] }
 0x1ab   :  { %6286 = vst [vmem:[#allocation41_spill] sm:$0xff] %v4828_v15  ;;  %6287 = vst [vmem:[#allocation42_spill] sm:$0xff] %v4831_v26  ;;  %2638 = vmatprep.subr.mxu1 %v6086_v62  ;;  %2298 = vmatprep.mubr.f32.mxu1 %v6293_v38  ;;  %v1057_v28 = vadd.f32 %v1056_v54, %v6294_v4  ;;  %v1314_v43 = vadd.f32 %v1313_v25, %v6295_v58  ;;  %v6036_v63 = vmax.f32 %v4828_v15, 0.0  ;;  %v1836_v25 = vld [vmem:[#allocation3 + $0x5b0] sm:$0xff] }
 0x1ac   :  { %2041 = vmatprep.mubr.f32.mxu0 %v6292_v34  ;;  %2639 = vmatpush2.msra.mxu1 %v1839_v61  ;;  %v1060_v16 = vpop.f32.mrf.mxu0  ;;  %v1317_v45 = vpop.f32.mrf.mxu1  ;;  %v6299_v58 = vmax.f32 %v4812_v7, 0.0  ;;  %v4866_v4 = vadd.f32 %v4228_v13, %v1055_v0  ;;  %v4869_v54 = vadd.f32 %v4231_v1, %v1312_v12  ;;  %v6304_v61 = vmax.f32 %v4831_v26, 0.0  ;;  %v6305_v0 = vld [vmem:[#allocation50_spill] sm:$0xff]  ;;  %v6326_v26 = vld [vmem:[#allocation57_spill] sm:$0xff] }
 0x1ad   :  { %2042 = vmatmul.mubr.f32.gmra.mxu0 %v6296_v52  ;;  %v4856_v36 = vadd.f32 %v4236_v47, %v1057_v28  ;;  %v4859_v38 = vadd.f32 %v4238_v22, %v1314_v43  ;;  %2415 = vmatprep.subr.mxu0 %v6086_v62  ;;  %v6302_v28 = vld [vmem:[#allocation48_spill] sm:$0xff] }
 0x1ae   :  { %2299 = vmatmul.mubr.f32.gmra.mxu1 %v6299_v58  ;;  %6300 = vst [vmem:[#allocation46_spill] sm:$0xff] %v4866_v4  ;;  %6301 = vst [vmem:[#allocation47_spill] sm:$0xff] %v4869_v54  ;;  %2416 = vmatpush2.msra.mxu0 %v1740_v17  ;;  %v1061_v52 = vadd.f32 %v1060_v16, %v6302_v28  ;;  %v1062_v43 = vpop.f32.mrf.mxu0  ;;  %v1319_v34 = vpop.f32.mrf.mxu1  ;;  %v1318_v58 = vadd.f32 %v1317_v45, %v6303_v11  ;;  %v6307_v16 = vmax.f32 %v4825_v29, 0.0 }
 0x1af   :  { %6297 = vst [vmem:[#allocation44_spill] sm:$0xff] %v4856_v36  ;;  %6298 = vst [vmem:[#allocation45_spill] sm:$0xff] %v4859_v38  ;;  %2640 = vmatprep.subr.mxu1 %v6086_v62  ;;  %2047 = vmatprep.mubr.f32.mxu0 %v6036_v63  ;;  %v1063_v7 = vadd.f32 %v1062_v43, %v6305_v0  ;;  %v1320_v12 = vadd.f32 %v1319_v34, %v6306_v21  ;;  %v6310_v43 = vmax.f32 %v4838_v53, 0.0  ;;  %v6311_v21 = vld [vmem:[#allocation52_spill] sm:$0xff] }
 0x1b0   :  { %2304 = vmatprep.mubr.f32.mxu1 %v6304_v61  ;;  %2641 = vmatpush2.msra.mxu1 %v1836_v25  ;;  %v1066_v28 = vpop.f32.mrf.mxu0  ;;  %v1323_v44 = vpop.f32.mrf.mxu1  ;;  %v1833_v25 = vld [vmem:[#allocation3 + $0x598] sm:$0xff]  ;;  %v4897_v63 = vadd.f32 %v4228_v13, %v1061_v52  ;;  %v6318_v52 = vld [vmem:[#allocation55_spill] sm:$0xff] }
 0x1b1   :  { %2048 = vmatmul.mubr.f32.gmra.mxu0 %v6307_v16  ;;  %v4885_v45 = vadd.f32 %v4236_v47, %v1063_v7  ;;  %v4888_v61 = vadd.f32 %v4238_v22, %v1320_v12  ;;  %2417 = vmatprep.subr.mxu0 %v6086_v62  ;;  %v1067_v34 = vadd.f32 %v1066_v28, %v6311_v21  ;;  %v6313_v7 = vld [vmem:[#allocation53_spill] sm:$0xff]  ;;  %v6315_v28 = vmax.f32 %v4856_v36, 0.0  ;;  %v6317_v16 = vld [vmem:[#allocation54_spill] sm:$0xff]  ;;  %v1731_v36 = vld [vmem:[#allocation3 + $0x268] sm:$0xff] }
 0x1b2   :  { %2305 = vmatmul.mubr.f32.gmra.mxu1 %v6310_v43  ;;  %6312 = vst [vmem:[#allocation50_spill] sm:$0xff] %v4897_v63  ;;  %2418 = vmatpush2.msra.mxu0 %v1737_v27  ;;  %v1324_v11 = vadd.f32 %v1323_v44, %v6313_v7  ;;  %v1068_v12 = vpop.f32.mrf.mxu0  ;;  %v1325_v17 = vpop.f32.mrf.mxu1  ;;  %v4902_v43 = vadd.f32 %v4231_v1, %v1318_v58  ;;  %v6316_v21 = vmax.f32 %v4859_v38, 0.0  ;;  %v1734_v27 = vld [vmem:[#allocation3 + $0x280] sm:$0xff]  ;;  %v6319_v7 = vmax.f32 %v4866_v4, 0.0  ;;  %v6330_v38 = vld [vmem:[#allocation59_spill] sm:$0xff] }
 0x1b3   :  { %6308 = vst [vmem:[#allocation48_spill] sm:$0xff] %v4885_v45  ;;  %6309 = vst [vmem:[#allocation49_spill] sm:$0xff] %v4888_v61  ;;  %2642 = vmatprep.subr.mxu1 %v6086_v62  ;;  %2053 = vmatprep.mubr.f32.mxu0 %v6315_v28  ;;  %v1069_v0 = vadd.f32 %v1068_v12, %v6317_v16  ;;  %v1326_v53 = vadd.f32 %v1325_v17, %v6318_v52  ;;  %v6323_v17 = vmax.f32 %v4869_v54, 0.0  ;;  %v6329_v12 = vld [vmem:[#allocation58_spill] sm:$0xff]  ;;  %v6338_v54 = vld [vmem:[#allocation61_spill] sm:$0xff] }
 0x1b4   :  { %6314 = vst [vmem:[#allocation51_spill] sm:$0xff] %v4902_v43  ;;  %2310 = vmatprep.mubr.f32.mxu1 %v6316_v21  ;;  %2643 = vmatpush2.msra.mxu1 %v1833_v25  ;;  %v1072_v29 = vpop.f32.mrf.mxu0  ;;  %v1329_v58 = vpop.f32.mrf.mxu1  ;;  %v4915_v28 = vadd.f32 %v4228_v13, %v1067_v34  ;;  %v1830_v25 = vld [vmem:[#allocation3 + $0x580] sm:$0xff]  ;;  %v4928_v52 = vadd.f32 %v4231_v1, %v1324_v11  ;;  %v6325_v34 = vld [vmem:[#allocation56_spill] sm:$0xff]  ;;  %v6328_v4 = vmax.f32 %v4888_v61, 0.0 }
 0x1b5   :  { %2054 = vmatmul.mubr.f32.gmra.mxu0 %v6319_v7  ;;  %v4918_v21 = vadd.f32 %v4236_v47, %v1069_v0  ;;  %v4921_v16 = vadd.f32 %v4238_v22, %v1326_v53  ;;  %2419 = vmatprep.subr.mxu0 %v6086_v62  ;;  %v1073_v7 = vadd.f32 %v1072_v29, %v6325_v34 }
 0x1b6   :  { %6320 = vst [vmem:[#allocation52_spill] sm:$0xff] %v4915_v28  ;;  %2311 = vmatmul.mubr.f32.gmra.mxu1 %v6323_v17  ;;  %6324 = vst [vmem:[#allocation55_spill] sm:$0xff] %v4928_v52  ;;  %2420 = vmatpush2.msra.mxu0 %v1734_v27  ;;  %v1330_v0 = vadd.f32 %v1329_v58, %v6326_v26  ;;  %v1074_v53 = vpop.f32.mrf.mxu0  ;;  %v1331_v44 = vpop.f32.mrf.mxu1  ;;  %v6327_v17 = vmax.f32 %v4885_v45, 0.0  ;;  %v6331_v26 = vmax.f32 %v4897_v63, 0.0  ;;  %v6341_v63 = vld [vmem:[#allocation63_spill] sm:$0xff]  ;;  %v1728_v45 = vld [vmem:[#allocation3 + $0x250] sm:$0xff] }
 0x1b7   :  { %6321 = vst [vmem:[#allocation53_spill] sm:$0xff] %v4918_v21  ;;  %6322 = vst [vmem:[#allocation54_spill] sm:$0xff] %v4921_v16  ;;  %2644 = vmatprep.subr.mxu1 %v6086_v62  ;;  %2316 = vmatprep.mubr.f32.mxu1 %v6328_v4  ;;  %v1075_v11 = vadd.f32 %v1074_v53, %v6329_v12  ;;  %v1332_v27 = vadd.f32 %v1331_v44, %v6330_v38  ;;  %v6049_v29 = vmax.f32 %v4918_v21, 0.0  ;;  %v1827_v44 = vld [vmem:[#allocation3 + $0x568] sm:$0xff] }
 0x1b8   :  { %2059 = vmatprep.mubr.f32.mxu0 %v6327_v17  ;;  %2645 = vmatpush2.msra.mxu1 %v1830_v25  ;;  %v1078_v58 = vpop.f32.mrf.mxu0  ;;  %v1335_v34 = vpop.f32.mrf.mxu1  ;;  %v6334_v38 = vmax.f32 %v4902_v43, 0.0  ;;  %v4956_v12 = vadd.f32 %v4228_v13, %v1073_v7  ;;  %v4959_v53 = vadd.f32 %v4231_v1, %v1330_v0  ;;  %v6339_v25 = vmax.f32 %v4921_v16, 0.0  ;;  %v6340_v7 = vld [vmem:[#allocation62_spill] sm:$0xff]  ;;  %v6360_v16 = vld [vmem:[#allocation69_spill] sm:$0xff] }
 0x1b9   :  { %2060 = vmatmul.mubr.f32.gmra.mxu0 %v6331_v26  ;;  %v4946_v61 = vadd.f32 %v4236_v47, %v1075_v11  ;;  %v4949_v4 = vadd.f32 %v4238_v22, %v1332_v27  ;;  %2421 = vmatprep.subr.mxu0 %v6086_v62  ;;  %v6337_v11 = vld [vmem:[#allocation60_spill] sm:$0xff] }
 0x1ba   :  { %2317 = vmatmul.mubr.f32.gmra.mxu1 %v6334_v38  ;;  %6335 = vst [vmem:[#allocation58_spill] sm:$0xff] %v4956_v12  ;;  %6336 = vst [vmem:[#allocation59_spill] sm:$0xff] %v4959_v53  ;;  %2422 = vmatpush2.msra.mxu0 %v1731_v36  ;;  %v1079_v26 = vadd.f32 %v1078_v58, %v6337_v11  ;;  %v1080_v27 = vpop.f32.mrf.mxu0  ;;  %v1337_v17 = vpop.f32.mrf.mxu1  ;;  %v1336_v38 = vadd.f32 %v1335_v34, %v6338_v54  ;;  %v6342_v58 = vmax.f32 %v4915_v28, 0.0 }
 0x1bb   :  { %6332 = vst [vmem:[#allocation56_spill] sm:$0xff] %v4946_v61  ;;  %6333 = vst [vmem:[#allocation57_spill] sm:$0xff] %v4949_v4  ;;  %2646 = vmatprep.subr.mxu1 %v6086_v62  ;;  %2065 = vmatprep.mubr.f32.mxu0 %v6049_v29  ;;  %v1081_v43 = vadd.f32 %v1080_v27, %v6340_v7  ;;  %v1338_v0 = vadd.f32 %v1337_v17, %v6341_v63  ;;  %v6345_v27 = vmax.f32 %v4928_v52, 0.0  ;;  %v6346_v63 = vld [vmem:[#allocation64_spill] sm:$0xff] }
 0x1bc   :  { %2322 = vmatprep.mubr.f32.mxu1 %v6339_v25  ;;  %2647 = vmatpush2.msra.mxu1 %v1827_v44  ;;  %v1084_v11 = vpop.f32.mrf.mxu0  ;;  %v1341_v15 = vpop.f32.mrf.mxu1  ;;  %v1824_v44 = vld [vmem:[#allocation3 + $0x550] sm:$0xff]  ;;  %v4987_v29 = vadd.f32 %v4228_v13, %v1079_v26  ;;  %v6353_v26 = vld [vmem:[#allocation67_spill] sm:$0xff] }
 0x1bd   :  { %2066 = vmatmul.mubr.f32.gmra.mxu0 %v6342_v58  ;;  %v4975_v34 = vadd.f32 %v4236_v47, %v1081_v43  ;;  %v4978_v25 = vadd.f32 %v4238_v22, %v1338_v0  ;;  %2423 = vmatprep.subr.mxu0 %v6086_v62  ;;  %v1085_v17 = vadd.f32 %v1084_v11, %v6346_v63  ;;  %v6348_v43 = vld [vmem:[#allocation65_spill] sm:$0xff]  ;;  %v6350_v11 = vmax.f32 %v4946_v61, 0.0  ;;  %v6352_v58 = vld [vmem:[#allocation66_spill] sm:$0xff] }
 0x1be   :  { %2323 = vmatmul.mubr.f32.gmra.mxu1 %v6345_v27  ;;  %6347 = vst [vmem:[#allocation62_spill] sm:$0xff] %v4987_v29  ;;  %2424 = vmatpush2.msra.mxu0 %v1728_v45  ;;  %v1342_v54 = vadd.f32 %v1341_v15, %v6348_v43  ;;  %v1086_v0 = vpop.f32.mrf.mxu0  ;;  %v1343_v36 = vpop.f32.mrf.mxu1  ;;  %v4992_v27 = vadd.f32 %v4231_v1, %v1336_v38  ;;  %v6351_v63 = vmax.f32 %v4949_v4, 0.0  ;;  %v1725_v45 = vld [vmem:[#allocation3 + $0x238] sm:$0xff]  ;;  %v6354_v43 = vmax.f32 %v4956_v12, 0.0  ;;  %v6364_v4 = vld [vmem:[#allocation71_spill] sm:$0xff]  ;;  %v1722_v61 = vld [vmem:[#allocation3 + $0x220] sm:$0xff] }
 0x1bf   :  { %6343 = vst [vmem:[#allocation60_spill] sm:$0xff] %v4975_v34  ;;  %6344 = vst [vmem:[#allocation61_spill] sm:$0xff] %v4978_v25  ;;  %2648 = vmatprep.subr.mxu1 %v6086_v62  ;;  %2071 = vmatprep.mubr.f32.mxu0 %v6350_v11  ;;  %v1087_v7 = vadd.f32 %v1086_v0, %v6352_v58  ;;  %v1344_v52 = vadd.f32 %v1343_v36, %v6353_v26  ;;  %v6357_v36 = vmax.f32 %v4959_v53, 0.0  ;;  %v6363_v0 = vld [vmem:[#allocation70_spill] sm:$0xff]  ;;  %v6372_v53 = vld [vmem:[#allocation73_spill] sm:$0xff] }
 0x1c0   :  { %6349 = vst [vmem:[#allocation63_spill] sm:$0xff] %v4992_v27  ;;  %2328 = vmatprep.mubr.f32.mxu1 %v6351_v63  ;;  %2649 = vmatpush2.msra.mxu1 %v1824_v44  ;;  %v1090_v28 = vpop.f32.mrf.mxu0  ;;  %v1347_v38 = vpop.f32.mrf.mxu1  ;;  %v5005_v11 = vadd.f32 %v4228_v13, %v1085_v17  ;;  %v1821_v44 = vld [vmem:[#allocation3 + $0x538] sm:$0xff]  ;;  %v5018_v26 = vadd.f32 %v4231_v1, %v1342_v54  ;;  %v6359_v17 = vld [vmem:[#allocation68_spill] sm:$0xff]  ;;  %v6362_v12 = vmax.f32 %v4978_v25, 0.0 }
 0x1c1   :  { %2072 = vmatmul.mubr.f32.gmra.mxu0 %v6354_v43  ;;  %v5008_v63 = vadd.f32 %v4236_v47, %v1087_v7  ;;  %v5011_v58 = vadd.f32 %v4238_v22, %v1344_v52  ;;  %2425 = vmatprep.subr.mxu0 %v6086_v62  ;;  %v1091_v43 = vadd.f32 %v1090_v28, %v6359_v17 }
 0x1c2   :  { %6355 = vst [vmem:[#allocation64_spill] sm:$0xff] %v5005_v11  ;;  %2329 = vmatmul.mubr.f32.gmra.mxu1 %v6357_v36  ;;  %6358 = vst [vmem:[#allocation66_spill] sm:$0xff] %v5018_v26  ;;  %2426 = vmatpush2.msra.mxu0 %v1725_v45  ;;  %v1348_v7 = vadd.f32 %v1347_v38, %v6360_v16  ;;  %v1092_v52 = vpop.f32.mrf.mxu0  ;;  %v1349_v15 = vpop.f32.mrf.mxu1  ;;  %v6361_v36 = vmax.f32 %v4975_v34, 0.0  ;;  %v6365_v16 = vmax.f32 %v4987_v29, 0.0  ;;  %v6375_v29 = vld [vmem:[#allocation75_spill] sm:$0xff] }
 0x1c3   :  { %6356 = vst [vmem:[#allocation65_spill] sm:$0xff] %v5011_v58  ;;  %2650 = vmatprep.subr.mxu1 %v6086_v62  ;;  %2334 = vmatprep.mubr.f32.mxu1 %v6362_v12  ;;  %v1093_v54 = vadd.f32 %v1092_v52, %v6363_v0  ;;  %v1350_v45 = vadd.f32 %v1349_v15, %v6364_v4  ;;  %v6062_v28 = vmax.f32 %v5008_v63, 0.0  ;;  %v6368_v4 = vmax.f32 %v4992_v27, 0.0  ;;  %v1818_v15 = vld [vmem:[#allocation3 + $0x520] sm:$0xff]  ;;  %v1719_v34 = vld [vmem:[#allocation3 + $0x208] sm:$0xff] }
 0x1c4   :  { %2077 = vmatprep.mubr.f32.mxu0 %v6361_v36  ;;  %2651 = vmatpush2.msra.mxu1 %v1821_v44  ;;  %v1096_v38 = vpop.f32.mrf.mxu0  ;;  %v1353_v17 = vpop.f32.mrf.mxu1  ;;  %v5046_v0 = vadd.f32 %v4228_v13, %v1091_v43  ;;  %v5049_v52 = vadd.f32 %v4231_v1, %v1348_v7  ;;  %v6373_v44 = vmax.f32 %v5011_v58, 0.0  ;;  %v6374_v43 = vld [vmem:[#allocation74_spill] sm:$0xff]  ;;  %v6391_v58 = vld [vmem:[#allocation81_spill] sm:$0xff] }
 0x1c5   :  { %2078 = vmatmul.mubr.f32.gmra.mxu0 %v6365_v16  ;;  %v5036_v25 = vadd.f32 %v4236_v47, %v1093_v54  ;;  %v5039_v12 = vadd.f32 %v4238_v22, %v1350_v45  ;;  %2427 = vmatprep.subr.mxu0 %v6086_v62  ;;  %v6371_v54 = vld [vmem:[#allocation72_spill] sm:$0xff] }
 0x1c6   :  { %2335 = vmatmul.mubr.f32.gmra.mxu1 %v6368_v4  ;;  %6369 = vst [vmem:[#allocation69_spill] sm:$0xff] %v5046_v0  ;;  %6370 = vst [vmem:[#allocation70_spill] sm:$0xff] %v5049_v52  ;;  %2428 = vmatpush2.msra.mxu0 %v1722_v61  ;;  %v1097_v16 = vadd.f32 %v1096_v38, %v6371_v54  ;;  %v1098_v45 = vpop.f32.mrf.mxu0  ;;  %v1355_v36 = vpop.f32.mrf.mxu1  ;;  %v1354_v4 = vadd.f32 %v1353_v17, %v6372_v53  ;;  %v6376_v38 = vmax.f32 %v5005_v11, 0.0 }
 0x1c7   :  { %6366 = vst [vmem:[#allocation67_spill] sm:$0xff] %v5036_v25  ;;  %6367 = vst [vmem:[#allocation68_spill] sm:$0xff] %v5039_v12  ;;  %2652 = vmatprep.subr.mxu1 %v6086_v62  ;;  %2083 = vmatprep.mubr.f32.mxu0 %v6062_v28  ;;  %v1099_v27 = vadd.f32 %v1098_v45, %v6374_v43  ;;  %v1356_v7 = vadd.f32 %v1355_v36, %v6375_v29  ;;  %v6379_v45 = vmax.f32 %v5018_v26, 0.0  ;;  %v6380_v29 = vld [vmem:[#allocation76_spill] sm:$0xff] }
 0x1c8   :  { %2340 = vmatprep.mubr.f32.mxu1 %v6373_v44  ;;  %2653 = vmatpush2.msra.mxu1 %v1818_v15  ;;  %v1102_v54 = vpop.f32.mrf.mxu0  ;;  %v1359_v21 = vpop.f32.mrf.mxu1  ;;  %v1815_v15 = vld [vmem:[#allocation3 + $0x508] sm:$0xff]  ;;  %v5077_v28 = vadd.f32 %v4228_v13, %v1097_v16 }
 0x1c9   :  { %2084 = vmatmul.mubr.f32.gmra.mxu0 %v6376_v38  ;;  %v5065_v17 = vadd.f32 %v4236_v47, %v1099_v27  ;;  %v5068_v44 = vadd.f32 %v4238_v22, %v1356_v7  ;;  %2429 = vmatprep.subr.mxu0 %v6086_v62  ;;  %v1103_v36 = vadd.f32 %v1102_v54, %v6380_v29  ;;  %v6382_v27 = vld [vmem:[#allocation77_spill] sm:$0xff]  ;;  %v6384_v54 = vmax.f32 %v5036_v25, 0.0  ;;  %v6386_v38 = vld [vmem:[#allocation78_spill] sm:$0xff]  ;;  %v6387_v16 = vld [vmem:[#allocation79_spill] sm:$0xff] }
 0x1ca   :  { %2341 = vmatmul.mubr.f32.gmra.mxu1 %v6379_v45  ;;  %6381 = vst [vmem:[#allocation73_spill] sm:$0xff] %v5077_v28  ;;  %2430 = vmatpush2.msra.mxu0 %v1719_v34  ;;  %v1360_v53 = vadd.f32 %v1359_v21, %v6382_v27  ;;  %v1104_v7 = vpop.f32.mrf.mxu0  ;;  %v1361_v61 = vpop.f32.mrf.mxu1  ;;  %v5082_v45 = vadd.f32 %v4231_v1, %v1354_v4  ;;  %v6385_v29 = vmax.f32 %v5039_v12, 0.0  ;;  %v1716_v34 = vld [vmem:[#allocation3 + $0x1f0] sm:$0xff]  ;;  %v6388_v27 = vmax.f32 %v5046_v0, 0.0  ;;  %v6395_v12 = vld [vmem:[#allocation83_spill] sm:$0xff]  ;;  %v1713_v25 = vld [vmem:[#allocation3 + $0x1d8] sm:$0xff] }
 0x1cb   :  { %6377 = vst [vmem:[#allocation71_spill] sm:$0xff] %v5065_v17  ;;  %6378 = vst [vmem:[#allocation72_spill] sm:$0xff] %v5068_v44  ;;  %2654 = vmatprep.subr.mxu1 %v6086_v62  ;;  %2089 = vmatprep.mubr.f32.mxu0 %v6384_v54  ;;  %v1105_v43 = vadd.f32 %v1104_v7, %v6386_v38  ;;  %v1362_v26 = vadd.f32 %v1361_v61, %v6387_v16  ;;  %v6389_v61 = vmax.f32 %v5049_v52, 0.0  ;;  %v6394_v7 = vld [vmem:[#allocation82_spill] sm:$0xff]  ;;  %v6399_v52 = vld [vmem:[#allocation85_spill] sm:$0xff] }
 0x1cc   :  { %6383 = vst [vmem:[#allocation74_spill] sm:$0xff] %v5082_v45  ;;  %2346 = vmatprep.mubr.f32.mxu1 %v6385_v29  ;;  %2655 = vmatpush2.msra.mxu1 %v1815_v15  ;;  %v1108_v11 = vpop.f32.mrf.mxu0  ;;  %v1365_v4 = vpop.f32.mrf.mxu1  ;;  %v5095_v54 = vadd.f32 %v4228_v13, %v1103_v36  ;;  %v1812_v15 = vld [vmem:[#allocation3 + $0x4f0] sm:$0xff]  ;;  %v5108_v16 = vadd.f32 %v4231_v1, %v1360_v53  ;;  %v6393_v0 = vmax.f32 %v5068_v44, 0.0 }
 0x1cd   :  { %2090 = vmatmul.mubr.f32.gmra.mxu0 %v6388_v27  ;;  %v5098_v29 = vadd.f32 %v4236_v47, %v1105_v43  ;;  %v5101_v38 = vadd.f32 %v4238_v22, %v1362_v26  ;;  %2431 = vmatprep.subr.mxu0 %v6086_v62  ;;  %v6390_v36 = vld [vmem:[#allocation80_spill] sm:$0xff]  ;;  %v1366_v43 = vadd.f32 %v1365_v4, %v6391_v58  ;;  %v6396_v58 = vmax.f32 %v5077_v28, 0.0  ;;  %v6402_v28 = vld [vmem:[#allocation90_spill] sm:$0xff] }
 0x1ce   :  { %2347 = vmatmul.mubr.f32.gmra.mxu1 %v6389_v61  ;;  %2432 = vmatpush2.msra.mxu0 %v1716_v34  ;;  %v1109_v27 = vadd.f32 %v1108_v11, %v6390_v36  ;;  %v1110_v26 = vpop.f32.mrf.mxu0  ;;  %v1367_v21 = vpop.f32.mrf.mxu1  ;;  %v6392_v61 = vmax.f32 %v5065_v17, 0.0  ;;  %v1710_v17 = vld [vmem:[#allocation3 + $0x1c0] sm:$0xff] }
 0x1cf   :  { %2656 = vmatprep.subr.mxu1 %v6086_v62  ;;  %2352 = vmatprep.mubr.f32.mxu1 %v6393_v0  ;;  %v1111_v53 = vadd.f32 %v1110_v26, %v6394_v7  ;;  %v1368_v34 = vadd.f32 %v1367_v21, %v6395_v12  ;;  %v1643_v11 = vmax.f32 %v5098_v29, 0.0  ;;  %v6397_v12 = vmax.f32 %v5082_v45, 0.0  ;;  %v1809_v21 = vld [vmem:[#allocation3 + $0x4d8] sm:$0xff] }
 0x1d0   :  { %2095 = vmatprep.mubr.f32.mxu0 %v6392_v61  ;;  %2657 = vmatpush2.msra.mxu1 %v1812_v15  ;;  %v1114_v4 = vpop.f32.mrf.mxu0  ;;  %v1371_v36 = vpop.f32.mrf.mxu1  ;;  %v5136_v7 = vadd.f32 %v4228_v13, %v1109_v27  ;;  %v5139_v26 = vadd.f32 %v4231_v1, %v1366_v43  ;;  %v6400_v15 = vmax.f32 %v5101_v38, 0.0  ;;  %v6401_v27 = vld [vmem:[#allocation89_spill] sm:$0xff] }
 0x1d1   :  { %2096 = vmatmul.mubr.f32.gmra.mxu0 %v6396_v58  ;;  %v5126_v44 = vadd.f32 %v4236_v47, %v1111_v53  ;;  %v5129_v0 = vadd.f32 %v4238_v22, %v1368_v34  ;;  %2433 = vmatprep.subr.mxu0 %v6086_v62  ;;  %v6398_v53 = vld [vmem:[#allocation84_spill] sm:$0xff] }
 0x1d2   :  { %2353 = vmatmul.mubr.f32.gmra.mxu1 %v6397_v12  ;;  %2434 = vmatpush2.msra.mxu0 %v1713_v25  ;;  %v1115_v58 = vadd.f32 %v1114_v4, %v6398_v53  ;;  %v1116_v34 = vpop.f32.mrf.mxu0  ;;  %v1373_v61 = vpop.f32.mrf.mxu1  ;;  %v1372_v12 = vadd.f32 %v1371_v36, %v6399_v52  ;;  %v6403_v4 = vmax.f32 %v5095_v54, 0.0 }
 0x1d3   :  { %2658 = vmatprep.subr.mxu1 %v6086_v62  ;;  %2101 = vmatprep.mubr.f32.mxu0 %v1643_v11  ;;  %v1117_v45 = vadd.f32 %v1116_v34, %v6401_v27  ;;  %v1374_v43 = vadd.f32 %v1373_v61, %v6402_v28  ;;  %v1647_v25 = vmax.f32 %v5126_v44, 0.0  ;;  %v1649_v53 = vmax.f32 %v5129_v0, 0.0  ;;  %v1806_v28 = vld [vmem:[#allocation3 + $0x4c0] sm:$0xff]  ;;  %v1800_v27 = vld [vmem:[#allocation3 + $0x490] sm:$0xff] }
 0x1d4   :  { %2358 = vmatprep.mubr.f32.mxu1 %v6400_v15  ;;  %2659 = vmatpush2.msra.mxu1 %v1809_v21  ;;  %v6404_v15 = vmax.f32 %v5108_v16, 0.0  ;;  %v1646_v61 = vmax.f32 %v5136_v7, 0.0  ;;  %v5165_v21 = vadd.f32 %v4228_v13, %v1115_v58 }
 0x1d5   :  { %2102 = vmatmul.mubr.f32.gmra.mxu0 %v6403_v4  ;;  %v5155_v52 = vadd.f32 %v4236_v47, %v1117_v45  ;;  %v5158_v36 = vadd.f32 %v4238_v22, %v1374_v43  ;;  %2435 = vmatprep.subr.mxu0 %v6086_v62  ;;  %v1648_v47 = vmax.f32 %v5139_v26, 0.0  ;;  %v5170_v45 = vadd.f32 %v4231_v1, %v1372_v12  ;;  %v1707_v22 = vld [vmem:[#allocation3 + $0x1a8] sm:$0xff]  ;;  %v1704_v12 = vld [vmem:[#allocation3 + $0x190] sm:$0xff] }
 0x1d6   :  { %2359 = vmatmul.mubr.f32.gmra.mxu1 %v6404_v15  ;;  %2436 = vmatpush2.msra.mxu0 %v1710_v17  ;;  %v1803_v1 = vld [vmem:[#allocation3 + $0x4a8] sm:$0xff]  ;;  %v1650_v17 = vmax.f32 %v5165_v21, 0.0  ;;  %v6405_v43 = vmax.f32 %v4249_v10, 0.0  ;;  %v6406_v4 = vmax.f32 %v4252_v2, 0.0  ;;  %v6407_v15 = vmax.f32 %v4243_v31, 0.0 }
 0x1d7   :  { %2660 = vmatprep.subr.mxu1 %v6086_v62  ;;  %2107 = vmatprep.mubr.f32.mxu0 %v1647_v25  ;;  %v1651_v34 = vmax.f32 %v5155_v52, 0.0  ;;  %v1653_v13 = vmax.f32 %v5158_v36, 0.0  ;;  %v1652_v58 = vmax.f32 %v5170_v45, 0.0  ;;  %v6412_v10 = vmax.f32 %v4263_v8, 0.0 }
 0x1d8   :  { %2364 = vmatprep.mubr.f32.mxu1 %v1649_v53  ;;  %2661 = vmatpush2.msra.mxu1 %v1806_v28  ;;  %v6408_v28 = vld [vmem:[#allocation91_spill] sm:$0xff]  ;;  %v6413_v2 = vmax.f32 %v4266_v19, 0.0  ;;  %v6415_v31 = vmax.f32 %v4297_v56, 0.0  ;;  %v6419_v8 = vmax.f32 %v4326_v49, 0.0  ;;  %v6420_v19 = vmax.f32 %v4320_v41, 0.0 }
 0x1d9   :  { %2108 = vmatmul.mubr.f32.gmra.mxu0 %v1646_v61  ;;  %2437 = vmatprep.subr.mxu0 %v6086_v62  ;;  %v6422_v56 = vmax.f32 %v4352_v51, 0.0  ;;  %v6426_v49 = vmax.f32 %v4381_v59, 0.0  ;;  %v6427_v41 = vmax.f32 %v4384_v60, 0.0  ;;  %v6429_v51 = vmax.f32 %v4391_v30, 0.0 }
 0x1da   :  { %2365 = vmatmul.mubr.f32.gmra.mxu1 %v1648_v47  ;;  %2438 = vmatpush2.msra.mxu0 %v1707_v22  ;;  %v6409_v22 = vmax.f32 %v6408_v28, 0.0  ;;  %v6433_v59 = vmax.f32 %v4420_v40, 0.0  ;;  %v6434_v60 = vmax.f32 %v4437_v55, 0.0  ;;  %v6436_v30 = vmax.f32 %v4447_v9, 0.0  ;;  %v6440_v40 = vld [vmem:[#allocation92_spill] sm:$0xff]  ;;  %v6442_v55 = vld [vmem:[#allocation93_spill] sm:$0xff] }
 0x1db   :  { %2662 = vmatprep.subr.mxu1 %v6086_v62  ;;  %2113 = vmatprep.mubr.f32.mxu0 %v1651_v34  ;;  %v6446_v9 = vld [vmem:[#allocation95_spill] sm:$0xff] }
 0x1dc   :  { %2370 = vmatprep.mubr.f32.mxu1 %v1653_v13  ;;  %2663 = vmatpush2.msra.mxu1 %v1803_v1  ;;  %v6410_v1 = vmax.f32 %v4269_v23, 0.0  ;;  %v6417_v23 = vmax.f32 %v4302_v14, 0.0  ;;  %v6424_v14 = vmax.f32 %v4349_v50, 0.0  ;;  %v6431_v50 = vmax.f32 %v4414_v39, 0.0 }
 0x1dd   :  { %2114 = vmatmul.mubr.f32.gmra.mxu0 %v1650_v17  ;;  %2439 = vmatprep.subr.mxu0 %v6086_v62  ;;  %v6438_v39 = vmax.f32 %v4471_v35, 0.0  ;;  %v6447_v28 = vmax.f32 %v6446_v9, 0.0  ;;  %v6450_v35 = vld [vmem:[#allocation97_spill] sm:$0xff]  ;;  %v6488_v9 = vld [vmem:[#allocation16_spill] sm:$0xff] }
 0x1de   :  { %2371 = vmatmul.mubr.f32.gmra.mxu1 %v1652_v58  ;;  %2440 = vmatpush2.msra.mxu0 %v1704_v12  ;;  %v6411_v12 = vmax.f32 %v4272_v24, 0.0  ;;  %v6418_v24 = vmax.f32 %v4323_v42, 0.0  ;;  %v6425_v42 = vmax.f32 %v4361_v3, 0.0  ;;  %v6432_v3 = vmax.f32 %v4408_v5, 0.0 }
 0x1df   :  { %2441 = vmatprep.mubr.f32.mxu0 %v6405_v43  ;;  %2666 = vmatprep.mubr.f32.mxu1 %v6406_v4  ;;  %v6439_v5 = vmax.f32 %v4478_v48, 0.0  ;;  %v6441_v43 = vmax.f32 %v6440_v40, 0.0  ;;  %v6443_v4 = vmax.f32 %v6442_v55, 0.0  ;;  %v6452_v48 = vld [vmem:[#allocation98_spill] sm:$0xff]  ;;  %v6482_v40 = vld [vmem:[#allocation15_spill] sm:$0xff]  ;;  %v6484_v55 = vld [vmem:[#allocation17_spill] sm:$0xff] }
 0x1e0   :  { %2664 = vmatprep.subr.mxu1 %v6086_v62  ;;  %v6414_v62 = vmax.f32 %v4294_v33, 0.0  ;;  %v6421_v33 = vmax.f32 %v4333_v57, 0.0  ;;  %v6428_v57 = vmax.f32 %v4378_v37, 0.0  ;;  %v6435_v37 = vmax.f32 %v4440_v20, 0.0  ;;  %v6444_v20 = vld [vmem:[#allocation94_spill] sm:$0xff] }
 0x1e1   :  { %2665 = vmatpush2.msra.mxu1 %v1800_v27  ;;  %2442 = vmatmul.mubr.f32.vlgmr.msra.gmra.mxu0 %v6407_v15  ;;  %v6416_v27 = vmax.f32 %v4287_v18, 0.0  ;;  %v6423_v18 = vmax.f32 %v4355_v32, 0.0  ;;  %v6430_v32 = vmax.f32 %v4411_v6, 0.0  ;;  %v6437_v6 = vmax.f32 %v4452_v46, 0.0  ;;  %v6448_v46 = vld [vmem:[#allocation96_spill] sm:$0xff] }
 0x1e2   :  { %2667 = vmatmul.mubr.f32.vlgmr.msra.gmra.mxu1 %v6409_v22  ;;  %2446 = vmatprep.mubr.f32.mxu0 %v6410_v1  ;;  %v6445_v15 = vmax.f32 %v6444_v20, 0.0  ;;  %v6449_v22 = vmax.f32 %v6448_v46, 0.0  ;;  %v6451_v1 = vmax.f32 %v6450_v35, 0.0  ;;  %v6486_v20 = vld [vmem:[#allocation18_spill] sm:$0xff] }
 0x1e3   :  { %2671 = vmatprep.mubr.f32.mxu1 %v6411_v12  ;;  %v6453_v12 = vmax.f32 %v6452_v48, 0.0  ;;  %v5317_v46 = vld [vmem:[%s5942_s6] sm:$0x7] }
 0x1e5   :  { %2447 = vmatmul.mubr.f32.gmra.mxu0 %v6412_v10  ;;  %v6454_v10 = vld [vmem:[#allocation99_spill] sm:$0xff] }
 0x1e6   :  { %2672 = vmatmul.mubr.f32.gmra.mxu1 %v6413_v2  ;;  %2451 = vmatprep.mubr.f32.mxu0 %v6414_v62  ;;  %v6455_v2 = vmax.f32 %v6454_v10, 0.0  ;;  %v6456_v62 = vld [vmem:[#allocation100_spill] sm:$0xff] }
 0x1e7   :  { %2676 = vmatprep.mubr.f32.mxu1 %v6415_v31  ;;  %v6457_v31 = vmax.f32 %v6456_v62, 0.0 }
 0x1e9   :  { %2452 = vmatmul.mubr.f32.gmra.mxu0 %v6416_v27  ;;  %v6458_v27 = vld [vmem:[#allocation101_spill] sm:$0xff] }
 0x1ea   :  { %2677 = vmatmul.mubr.f32.gmra.mxu1 %v6417_v23  ;;  %2456 = vmatprep.mubr.f32.mxu0 %v6418_v24  ;;  %v6459_v23 = vmax.f32 %v6458_v27, 0.0  ;;  %v6460_v24 = vld [vmem:[#allocation7_spill] sm:$0xff] }
 0x1eb   :  { %2681 = vmatprep.mubr.f32.mxu1 %v6419_v8  ;;  %v6461_v8 = vmax.f32 %v6460_v24, 0.0 }
 0x1ed   :  { %2457 = vmatmul.mubr.f32.gmra.mxu0 %v6420_v19  ;;  %v6462_v19 = vld [vmem:[#allocation102_spill] sm:$0xff] }
 0x1ee   :  { %2682 = vmatmul.mubr.f32.gmra.mxu1 %v6421_v33  ;;  %2461 = vmatprep.mubr.f32.mxu0 %v6422_v56  ;;  %v6463_v33 = vmax.f32 %v6462_v19, 0.0  ;;  %v6464_v56 = vld [vmem:[#allocation6_spill] sm:$0xff] }
 0x1ef   :  { %2686 = vmatprep.mubr.f32.mxu1 %v6423_v18  ;;  %v6465_v18 = vmax.f32 %v6464_v56, 0.0 }
 0x1f1   :  { %2462 = vmatmul.mubr.f32.gmra.mxu0 %v6424_v14  ;;  %v6466_v14 = vld [vmem:[#allocation103_spill] sm:$0xff] }
 0x1f2   :  { %2687 = vmatmul.mubr.f32.gmra.mxu1 %v6425_v42  ;;  %2466 = vmatprep.mubr.f32.mxu0 %v6426_v49  ;;  %v6467_v42 = vmax.f32 %v6466_v14, 0.0  ;;  %v6468_v49 = vld [vmem:[#allocation8_spill] sm:$0xff] }
 0x1f3   :  { %2691 = vmatprep.mubr.f32.mxu1 %v6427_v41  ;;  %v6469_v41 = vmax.f32 %v6468_v49, 0.0 }
 0x1f5   :  { %2467 = vmatmul.mubr.f32.gmra.mxu0 %v6428_v57  ;;  %v6470_v57 = vld [vmem:[#allocation9_spill] sm:$0xff] }
 0x1f6   :  { %2692 = vmatmul.mubr.f32.gmra.mxu1 %v6429_v51  ;;  %2471 = vmatprep.mubr.f32.mxu0 %v6430_v32  ;;  %v6471_v51 = vmax.f32 %v6470_v57, 0.0  ;;  %v6472_v32 = vld [vmem:[#allocation10_spill] sm:$0xff] }
 0x1f7   :  { %2696 = vmatprep.mubr.f32.mxu1 %v6431_v50  ;;  %v6473_v50 = vmax.f32 %v6472_v32, 0.0  ;;  %v5345_v57 = vld [vmem:[%s5943_s7] sm:$0x7] }
 0x1f9   :  { %2472 = vmatmul.mubr.f32.gmra.mxu0 %v6432_v3  ;;  %v6474_v3 = vld [vmem:[#allocation11_spill] sm:$0xff] }
 0x1fa   :  { %2697 = vmatmul.mubr.f32.gmra.mxu1 %v6433_v59  ;;  %2476 = vmatprep.mubr.f32.mxu0 %v6434_v60  ;;  %v6475_v59 = vmax.f32 %v6474_v3, 0.0  ;;  %v6476_v60 = vld [vmem:[#allocation12_spill] sm:$0xff] }
 0x1fb   :  { %2701 = vmatprep.mubr.f32.mxu1 %v6435_v37  ;;  %v6477_v37 = vmax.f32 %v6476_v60, 0.0 }
 0x1fd   :  { %2477 = vmatmul.mubr.f32.gmra.mxu0 %v6436_v30  ;;  %v6478_v30 = vld [vmem:[#allocation13_spill] sm:$0xff] }
 0x1fe   :  { %2702 = vmatmul.mubr.f32.gmra.mxu1 %v6437_v6  ;;  %2481 = vmatprep.mubr.f32.mxu0 %v6438_v39  ;;  %v6479_v6 = vmax.f32 %v6478_v30, 0.0  ;;  %v6480_v39 = vld [vmem:[#allocation14_spill] sm:$0xff] }
 0x1ff   :  { %2706 = vmatprep.mubr.f32.mxu1 %v6439_v5  ;;  %v6481_v5 = vmax.f32 %v6480_v39, 0.0 }
 0x201   :  { %2482 = vmatmul.mubr.f32.gmra.mxu0 %v6441_v43  ;;  %v6483_v43 = vmax.f32 %v6482_v40, 0.0 }
 0x202   :  { %2707 = vmatmul.mubr.f32.gmra.mxu1 %v6443_v4  ;;  %2486 = vmatprep.mubr.f32.mxu0 %v6445_v15  ;;  %v6485_v4 = vmax.f32 %v6484_v55, 0.0  ;;  %v6487_v15 = vmax.f32 %v6486_v20, 0.0 }
 0x203   :  { %2711 = vmatprep.mubr.f32.mxu1 %v6447_v28  ;;  %v6489_v28 = vmax.f32 %v6488_v9, 0.0 }
 0x205   :  { %2487 = vmatmul.mubr.f32.gmra.mxu0 %v6449_v22  ;;  %v6490_v22 = vld [vmem:[#allocation19_spill] sm:$0xff] }
 0x206   :  { %2712 = vmatmul.mubr.f32.gmra.mxu1 %v6451_v1  ;;  %2491 = vmatprep.mubr.f32.mxu0 %v6453_v12  ;;  %v6491_v35 = vmax.f32 %v6490_v22, 0.0  ;;  %v6492_v1 = vld [vmem:[#allocation20_spill] sm:$0xff]  ;;  %v6494_v12 = vld [vmem:[#allocation21_spill] sm:$0xff] }
 0x207   :  { %2716 = vmatprep.mubr.f32.mxu1 %v6455_v2  ;;  %v6493_v48 = vmax.f32 %v6492_v1, 0.0  ;;  %v6495_v10 = vmax.f32 %v6494_v12, 0.0  ;;  %v6496_v2 = vld [vmem:[#allocation86_spill] sm:$0xff]  ;;  %v6514_v22 = vld [vmem:[#allocation28_spill] sm:$0xff] }
 0x208   :  { %v5327_v62 = vrot.slane %v5317_v46, %v6496_v2  ;;  %v5358_v55 = vrot.slane %v5345_v57, %v6496_v2 }
 0x209   :  { %2492 = vmatmul.mubr.f32.gmra.mxu0 %v6457_v31  ;;  %v6497_v31 = vld [vmem:[#allocation22_spill] sm:$0xff] }
 0x20a   :  { %2717 = vmatmul.mubr.f32.gmra.mxu1 %v6459_v23  ;;  %2496 = vmatprep.mubr.f32.mxu0 %v6461_v8  ;;  %v6498_v27 = vmax.f32 %v6497_v31, 0.0  ;;  %v6499_v23 = vld [vmem:[#allocation23_spill] sm:$0xff]  ;;  %v6501_v8 = vld [vmem:[#allocation24_spill] sm:$0xff] }
 0x20b   :  { %2721 = vmatprep.mubr.f32.mxu1 %v6463_v33  ;;  %v6500_v24 = vmax.f32 %v6499_v23, 0.0  ;;  %v6502_v19 = vmax.f32 %v6501_v8, 0.0  ;;  %v6503_v33 = vld [vmem:[#allocation88_spill] sm:$0xff] }
 0x20c   :  { %v5337_v56 = vrot.slane %v5317_v46, %v6503_v33  ;;  %v5362_v9 = vrot.slane %v5345_v57, %v6503_v33 }
 0x20d   :  { %2497 = vmatmul.mubr.f32.gmra.mxu0 %v6465_v18  ;;  %v6504_v18 = vld [vmem:[#allocation25_spill] sm:$0xff] }
 0x20e   :  { %2722 = vmatmul.mubr.f32.gmra.mxu1 %v6467_v42  ;;  %2501 = vmatprep.mubr.f32.mxu0 %v6469_v41  ;;  %v6505_v14 = vmax.f32 %v6504_v18, 0.0 }
 0x20f   :  { %2726 = vmatprep.mubr.f32.mxu1 %v6471_v51  ;;  %v6506_v51 = vld [vmem:[#allocation26_spill] sm:$0xff] }
 0x210   :  { %v6507_v32 = vmax.f32 %v6506_v51, 0.0  ;;  %v6522_v51 = vld [vmem:[#allocation34_spill] sm:$0xff] }
 0x211   :  { %2502 = vmatmul.mubr.f32.gmra.mxu0 %v6473_v50 }
 0x212   :  { %2727 = vmatmul.mubr.f32.gmra.mxu1 %v6475_v59  ;;  %2506 = vmatprep.mubr.f32.mxu0 %v6477_v37  ;;  %v6508_v59 = vld [vmem:[#allocation27_spill] sm:$0xff]  ;;  %v6510_v37 = vld [vmem:[#allocation29_spill] sm:$0xff] }
 0x213   :  { %2731 = vmatprep.mubr.f32.mxu1 %v6479_v6  ;;  %v6509_v60 = vmax.f32 %v6508_v59, 0.0  ;;  %v6511_v30 = vmax.f32 %v6510_v37, 0.0 }
 0x215   :  { %2507 = vmatmul.mubr.f32.gmra.mxu0 %v6481_v5  ;;  %v6512_v5 = vld [vmem:[#allocation30_spill] sm:$0xff] }
 0x216   :  { %2732 = vmatmul.mubr.f32.gmra.mxu1 %v6483_v43  ;;  %2511 = vmatprep.mubr.f32.mxu0 %v6485_v4  ;;  %v6513_v40 = vmax.f32 %v6512_v5, 0.0 }
 0x217   :  { %2736 = vmatprep.mubr.f32.mxu1 %v6487_v15 }
 0x219   :  { %2512 = vmatmul.mubr.f32.gmra.mxu0 %v6489_v28 }
 0x21a   :  { %2737 = vmatmul.mubr.f32.gmra.mxu1 %v6491_v35  ;;  %2516 = vmatprep.mubr.f32.mxu0 %v6493_v48  ;;  %v6515_v35 = vmax.f32 %v6514_v22, 0.0  ;;  %v6516_v48 = vld [vmem:[#allocation31_spill] sm:$0xff] }
 0x21b   :  { %2741 = vmatprep.mubr.f32.mxu1 %v6495_v10  ;;  %v6517_v12 = vmax.f32 %v6516_v48, 0.0  ;;  %v6518_v10 = vld [vmem:[#allocation32_spill] sm:$0xff] }
 0x21c   :  { %v6519_v31 = vmax.f32 %v6518_v10, 0.0 }
 0x21d   :  { %2517 = vmatmul.mubr.f32.gmra.mxu0 %v6498_v27 }
 0x21e   :  { %2742 = vmatmul.mubr.f32.gmra.mxu1 %v6500_v24  ;;  %2521 = vmatprep.mubr.f32.mxu0 %v6502_v19  ;;  %v1929_v42 = vpop.f32.mrf.mxu0  ;;  %v6520_v24 = vld [vmem:[#allocation33_spill] sm:$0xff] }
 0x21f   :  { %2746 = vmatprep.mubr.f32.mxu1 %v6505_v14  ;;  %v1930_v49 = vadd.f32 %v1929_v42, %v5327_v62  ;;  %v6521_v8 = vmax.f32 %v6520_v24, 0.0 }
 0x220   :  { %v2186_v41 = vpop.f32.mrf.mxu1  ;;  %v1931_v50 = vpop.f32.mrf.mxu0 }
 0x221   :  { %2522 = vmatmul.mubr.f32.gmra.mxu0 %v6507_v32  ;;  %v2187_v3 = vadd.f32 %v2186_v41, %v1930_v49  ;;  %v1932_v6 = vadd.f32 %v1931_v50, %v5337_v56  ;;  %v6523_v32 = vmax.f32 %v6522_v51, 0.0 }
 0x222   :  { %2747 = vmatmul.mubr.f32.gmra.mxu1 %v6509_v60  ;;  %2526 = vmatprep.mubr.f32.mxu0 %v6511_v30  ;;  %v2188_v39 = vpop.f32.mrf.mxu1  ;;  %v6526_v60 = vld [vmem:[#allocation36_spill] sm:$0xff] }
 0x223   :  { %2751 = vmatprep.mubr.f32.mxu1 %v6513_v40  ;;  %v2827_v43 = vmax.f32 %v2187_v3, 0.0  ;;  %v2189_v4 = vadd.f32 %v2188_v39, %v1932_v6  ;;  %v1935_v20 = vpop.f32.mrf.mxu0  ;;  %v6524_v3 = vld [vmem:[#allocation35_spill] sm:$0xff]  ;;  %v6527_v37 = vmax.f32 %v6526_v60, 0.0  ;;  %v6528_v40 = vld [vmem:[#allocation37_spill] sm:$0xff]  ;;  %v6538_v60 = vld [vmem:[#allocation40_spill] sm:$0xff] }
 0x224   :  { %v2192_v15 = vpop.f32.mrf.mxu1  ;;  %v1936_v28 = vadd.f32 %v1935_v20, %v5327_v62  ;;  %v6525_v59 = vmax.f32 %v6524_v3, 0.0 }
 0x225   :  { %2527 = vmatmul.mubr.f32.gmra.mxu0 %v6515_v35  ;;  %v2828_v1 = vmax.f32 %v2189_v4, 0.0  ;;  %v1937_v2 = vpop.f32.mrf.mxu0  ;;  %v2940_v33 = vmul.f32 %v5358_v55, %v2827_v43  ;;  %v6529_v43 = vmax.f32 %v6528_v40, 0.0 }
 0x226   :  { %2752 = vmatmul.mubr.f32.gmra.mxu1 %v6517_v12  ;;  %2531 = vmatprep.mubr.f32.mxu0 %v6519_v31  ;;  %v2194_v27 = vpop.f32.mrf.mxu1  ;;  %v2193_v23 = vadd.f32 %v2192_v15, %v1936_v28  ;;  %v1938_v19 = vadd.f32 %v1937_v2, %v5337_v56  ;;  %v6530_v12 = vld [vmem:[#allocation38_spill] sm:$0xff]  ;;  %v6532_v2 = vld [vmem:[#allocation39_spill] sm:$0xff] }
 0x227   :  { %2756 = vmatprep.mubr.f32.mxu1 %v6521_v8  ;;  %v1941_v18 = vpop.f32.mrf.mxu0  ;;  %v2941_v14 = vmul.f32 %v5362_v9, %v2828_v1  ;;  %v6531_v10 = vmax.f32 %v6530_v12, 0.0 }
 0x228   :  { %v2195_v42 = vadd.f32 %v2194_v27, %v1938_v19  ;;  %v1942_v49 = vadd.f32 %v1941_v18, %v5327_v62  ;;  %v2198_v41 = vpop.f32.mrf.mxu1  ;;  %v2830_v50 = vmax.f32 %v2193_v23, 0.0  ;;  %v6533_v27 = vmax.f32 %v6532_v2, 0.0  ;;  %v6534_v23 = vld [vmem:[#allocation41_spill] sm:$0xff]  ;;  %v6536_v18 = vld [vmem:[#allocation42_spill] sm:$0xff] }
 0x229   :  { %2532 = vmatmul.mubr.f32.gmra.mxu0 %v6523_v32  ;;  %v1943_v30 = vpop.f32.mrf.mxu0  ;;  %v5383_v6 = vadd.f32 %v2941_v14, %v2940_v33  ;;  %v6535_v24 = vmax.f32 %v6534_v23, 0.0  ;;  %v6537_v14 = vmax.f32 %v6536_v18, 0.0  ;;  %v6546_v23 = vld [vmem:[#allocation46_spill] sm:$0xff] }
 0x22a   :  { %2757 = vmatmul.mubr.f32.gmra.mxu1 %v6525_v59  ;;  %2536 = vmatprep.mubr.f32.mxu0 %v6527_v37  ;;  %v2831_v39 = vmax.f32 %v2195_v42, 0.0  ;;  %v2199_v5 = vadd.f32 %v2198_v41, %v1942_v49  ;;  %v1944_v4 = vadd.f32 %v1943_v30, %v5337_v56  ;;  %v2200_v20 = vpop.f32.mrf.mxu1  ;;  %v2943_v31 = vmul.f32 %v5358_v55, %v2830_v50 }
 0x22b   :  { %2761 = vmatprep.mubr.f32.mxu1 %v6529_v43  ;;  %v1947_v15 = vpop.f32.mrf.mxu0  ;;  %v6539_v37 = vmax.f32 %v6538_v60, 0.0  ;;  %v6542_v43 = vld [vmem:[#allocation44_spill] sm:$0xff] }
 0x22c   :  { %v2944_v28 = vmul.f32 %v5362_v9, %v2831_v39  ;;  %v2833_v22 = vmax.f32 %v2199_v5, 0.0  ;;  %v2201_v35 = vadd.f32 %v2200_v20, %v1944_v4  ;;  %v1948_v1 = vadd.f32 %v1947_v15, %v5327_v62  ;;  %v2204_v48 = vpop.f32.mrf.mxu1  ;;  %v6540_v5 = vld [vmem:[#allocation43_spill] sm:$0xff]  ;;  %v6544_v15 = vld [vmem:[#allocation45_spill] sm:$0xff] }
 0x22d   :  { %2537 = vmatmul.mubr.f32.gmra.mxu0 %v6531_v10  ;;  %v1949_v8 = vpop.f32.mrf.mxu0  ;;  %v6541_v40 = vmax.f32 %v6540_v5, 0.0  ;;  %v6543_v4 = vmax.f32 %v6542_v43, 0.0  ;;  %v6554_v5 = vld [vmem:[#allocation50_spill] sm:$0xff] }
 0x22e   :  { %2762 = vmatmul.mubr.f32.gmra.mxu1 %v6533_v27  ;;  %2541 = vmatprep.mubr.f32.mxu0 %v6535_v24  ;;  %v2834_v19 = vmax.f32 %v2201_v35, 0.0  ;;  %v2205_v33 = vadd.f32 %v2204_v48, %v1948_v1  ;;  %v1950_v42 = vadd.f32 %v1949_v8, %v5337_v56  ;;  %v2206_v49 = vpop.f32.mrf.mxu1  ;;  %v5400_v41 = vadd.f32 %v2944_v28, %v2943_v31 }
 0x22f   :  { %2766 = vmatprep.mubr.f32.mxu1 %v6537_v14  ;;  %v2946_v51 = vmul.f32 %v5358_v55, %v2833_v22  ;;  %v1953_v3 = vpop.f32.mrf.mxu0  ;;  %v6545_v28 = vmax.f32 %v6544_v15, 0.0  ;;  %v6547_v24 = vmax.f32 %v6546_v23, 0.0  ;;  %v6550_v14 = vld [vmem:[#allocation48_spill] sm:$0xff] }
 0x230   :  { %v2836_v32 = vmax.f32 %v2205_v33, 0.0  ;;  %v2207_v50 = vadd.f32 %v2206_v49, %v1950_v42  ;;  %v2210_v59 = vpop.f32.mrf.mxu1  ;;  %v2947_v30 = vmul.f32 %v5362_v9, %v2834_v19  ;;  %v1954_v39 = vadd.f32 %v1953_v3, %v5327_v62  ;;  %v6548_v33 = vld [vmem:[#allocation47_spill] sm:$0xff] }
 0x231   :  { %2542 = vmatmul.mubr.f32.gmra.mxu0 %v6539_v37  ;;  %v1955_v22 = vpop.f32.mrf.mxu0  ;;  %v6549_v18 = vmax.f32 %v6548_v33, 0.0  ;;  %v6551_v42 = vmax.f32 %v6550_v14, 0.0 }
 0x232   :  { %2767 = vmatmul.mubr.f32.gmra.mxu1 %v6541_v40  ;;  %2546 = vmatprep.mubr.f32.mxu0 %v6543_v4  ;;  %v2837_v20 = vmax.f32 %v2207_v50, 0.0  ;;  %v2212_v35 = vpop.f32.mrf.mxu1  ;;  %v5413_v1 = vadd.f32 %v2947_v30, %v2946_v51  ;;  %v2211_v48 = vadd.f32 %v2210_v59, %v1954_v39  ;;  %v1956_v12 = vadd.f32 %v1955_v22, %v5337_v56  ;;  %v6552_v51 = vld [vmem:[#allocation49_spill] sm:$0xff] }
 0x233   :  { %2771 = vmatprep.mubr.f32.mxu1 %v6545_v28  ;;  %v2949_v10 = vmul.f32 %v5358_v55, %v2836_v32  ;;  %v1959_v2 = vpop.f32.mrf.mxu0  ;;  %v6553_v50 = vmax.f32 %v6552_v51, 0.0  ;;  %v6555_v40 = vmax.f32 %v6554_v5, 0.0  ;;  %v6556_v28 = vld [vmem:[#allocation51_spill] sm:$0xff] }
 0x234   :  { %v2950_v31 = vmul.f32 %v5362_v9, %v2837_v20  ;;  %v2216_v27 = vpop.f32.mrf.mxu1  ;;  %v2213_v8 = vadd.f32 %v2212_v35, %v1956_v12  ;;  %v1960_v19 = vadd.f32 %v1959_v2, %v5327_v62  ;;  %v2839_v49 = vmax.f32 %v2211_v48, 0.0  ;;  %v6558_v35 = vld [vmem:[#allocation53_spill] sm:$0xff] }
 0x235   :  { %2547 = vmatmul.mubr.f32.gmra.mxu0 %v6547_v24  ;;  %v1961_v32 = vpop.f32.mrf.mxu0  ;;  %v6557_v22 = vmax.f32 %v6556_v28, 0.0  ;;  %v6559_v48 = vmax.f32 %v6558_v35, 0.0 }
 0x236   :  { %2772 = vmatmul.mubr.f32.gmra.mxu1 %v6549_v18  ;;  %2551 = vmatprep.mubr.f32.mxu0 %v6551_v42  ;;  %v2218_v3 = vpop.f32.mrf.mxu1  ;;  %v5427_v59 = vadd.f32 %v2950_v31, %v2949_v10  ;;  %v2840_v60 = vmax.f32 %v2213_v8, 0.0  ;;  %v2217_v37 = vadd.f32 %v2216_v27, %v1960_v19  ;;  %v1962_v30 = vadd.f32 %v1961_v32, %v5337_v56  ;;  %v6560_v31 = vld [vmem:[#allocation54_spill] sm:$0xff]  ;;  %v6562_v18 = vld [vmem:[#allocation52_spill] sm:$0xff] }
 0x237   :  { %2776 = vmatprep.mubr.f32.mxu1 %v6553_v50  ;;  %v2952_v12 = vmul.f32 %v5358_v55, %v2839_v49  ;;  %v6561_v2 = vmax.f32 %v6560_v31, 0.0  ;;  %v6563_v14 = vmax.f32 %v6562_v18, 0.0 }
 0x238   :  { %v1965_v39 = vpop.f32.mrf.mxu0  ;;  %v2953_v43 = vmul.f32 %v5362_v9, %v2840_v60  ;;  %v2219_v4 = vadd.f32 %v2218_v3, %v1962_v30  ;;  %v2222_v15 = vpop.f32.mrf.mxu1  ;;  %v2842_v10 = vmax.f32 %v2217_v37, 0.0  ;;  %v6564_v3 = vld [vmem:[#allocation55_spill] sm:$0xff]  ;;  %v6566_v37 = vld [vmem:[#allocation56_spill] sm:$0xff] }
 0x239   :  { %2552 = vmatmul.mubr.f32.gmra.mxu0 %v6555_v40  ;;  %v1966_v20 = vadd.f32 %v1965_v39, %v5327_v62  ;;  %v6565_v60 = vmax.f32 %v6564_v3, 0.0  ;;  %v6567_v30 = vmax.f32 %v6566_v37, 0.0  ;;  %v6568_v40 = vld [vmem:[#allocation57_spill] sm:$0xff] }
 0x23a   :  { %2777 = vmatmul.mubr.f32.gmra.mxu1 %v6557_v22  ;;  %2556 = vmatprep.mubr.f32.mxu0 %v6559_v48  ;;  %v1967_v27 = vpop.f32.mrf.mxu0  ;;  %v2843_v23 = vmax.f32 %v2219_v4, 0.0  ;;  %v2224_v19 = vpop.f32.mrf.mxu1  ;;  %v5444_v42 = vadd.f32 %v2953_v43, %v2952_v12  ;;  %v2955_v39 = vmul.f32 %v5358_v55, %v2842_v10  ;;  %v6569_v4 = vmax.f32 %v6568_v40, 0.0  ;;  %v6570_v48 = vld [vmem:[#allocation58_spill] sm:$0xff] }
 0x23b   :  { %2781 = vmatprep.mubr.f32.mxu1 %v6561_v2  ;;  %v2223_v24 = vadd.f32 %v2222_v15, %v1966_v20  ;;  %v1968_v8 = vadd.f32 %v1967_v27, %v5337_v56  ;;  %v6571_v12 = vmax.f32 %v6570_v48, 0.0 }
 0x23c   :  { %v1971_v33 = vpop.f32.mrf.mxu0  ;;  %v2956_v51 = vmul.f32 %v5362_v9, %v2843_v23 }
 0x23d   :  { %2557 = vmatmul.mubr.f32.gmra.mxu0 %v6563_v14  ;;  %v2225_v50 = vadd.f32 %v2224_v19, %v1968_v8  ;;  %v1972_v49 = vadd.f32 %v1971_v33, %v5327_v62  ;;  %v2845_v5 = vmax.f32 %v2223_v24, 0.0  ;;  %v6572_v24 = vld [vmem:[#allocation59_spill] sm:$0xff]  ;;  %v6574_v19 = vld [vmem:[#allocation60_spill] sm:$0xff] }
 0x23e   :  { %v2228_v32 = vpop.f32.mrf.mxu1  ;;  %2782 = vmatmul.mubr.f32.gmra.mxu1 %v6565_v60  ;;  %2561 = vmatprep.mubr.f32.mxu0 %v6567_v30  ;;  %v1973_v43 = vpop.f32.mrf.mxu0  ;;  %v5458_v31 = vadd.f32 %v2956_v51, %v2955_v39  ;;  %v6573_v8 = vmax.f32 %v6572_v24, 0.0  ;;  %v6575_v33 = vmax.f32 %v6574_v19, 0.0  ;;  %v6578_v39 = vld [vmem:[#allocation62_spill] sm:$0xff] }
 0x23f   :  { %2786 = vmatprep.mubr.f32.mxu1 %v6569_v4  ;;  %v2846_v20 = vmax.f32 %v2225_v50, 0.0  ;;  %v2229_v15 = vadd.f32 %v2228_v32, %v1972_v49  ;;  %v1974_v28 = vadd.f32 %v1973_v43, %v5337_v56  ;;  %v2958_v18 = vmul.f32 %v5358_v55, %v2845_v5  ;;  %v6576_v50 = vld [vmem:[#allocation61_spill] sm:$0xff] }
 0x240   :  { %v2230_v22 = vpop.f32.mrf.mxu1  ;;  %v1977_v35 = vpop.f32.mrf.mxu0  ;;  %v6577_v49 = vmax.f32 %v6576_v50, 0.0  ;;  %v6579_v40 = vmax.f32 %v6578_v39, 0.0 }
 0x241   :  { %2562 = vmatmul.mubr.f32.gmra.mxu0 %v6571_v12  ;;  %v2959_v2 = vmul.f32 %v5362_v9, %v2846_v20  ;;  %v2231_v27 = vadd.f32 %v2230_v22, %v1974_v28  ;;  %v1978_v10 = vadd.f32 %v1977_v35, %v5327_v62  ;;  %v2848_v14 = vmax.f32 %v2229_v15, 0.0  ;;  %v6580_v28 = vld [vmem:[#allocation63_spill] sm:$0xff] }
 0x242   :  { %v2234_v23 = vpop.f32.mrf.mxu1  ;;  %2787 = vmatmul.mubr.f32.gmra.mxu1 %v6573_v8  ;;  %2566 = vmatprep.mubr.f32.mxu0 %v6575_v33  ;;  %v1979_v51 = vpop.f32.mrf.mxu0  ;;  %v6581_v22 = vmax.f32 %v6580_v28, 0.0  ;;  %v6582_v35 = vmax.f32 %v5008_v63, 0.0 }
 0x243   :  { %2791 = vmatprep.mubr.f32.mxu1 %v6577_v49  ;;  %v2849_v32 = vmax.f32 %v2231_v27, 0.0  ;;  %v2235_v3 = vadd.f32 %v2234_v23, %v1978_v10  ;;  %v1980_v60 = vadd.f32 %v1979_v51, %v5337_v56  ;;  %v5472_v4 = vadd.f32 %v2959_v2, %v2958_v18  ;;  %v6583_v27 = vld [vmem:[#allocation65_spill] sm:$0xff]  ;;  %v6585_v18 = vld [vmem:[#allocation64_spill] sm:$0xff] }
 0x244   :  { %v2236_v37 = vpop.f32.mrf.mxu1  ;;  %v2961_v48 = vmul.f32 %v5358_v55, %v2848_v14  ;;  %v6584_v10 = vmax.f32 %v6583_v27, 0.0  ;;  %v6586_v50 = vmax.f32 %v6585_v18, 0.0  ;;  %v6593_v27 = vld [vmem:[#allocation69_spill] sm:$0xff]  ;;  %v6597_v18 = vld [vmem:[#allocation71_spill] sm:$0xff] }
 0x245   :  { %v1983_v30 = vpop.f32.mrf.mxu0  ;;  %2567 = vmatmul.mubr.f32.gmra.mxu0 %v6579_v40  ;;  %v2962_v43 = vmul.f32 %v5362_v9, %v2849_v32  ;;  %v2237_v20 = vadd.f32 %v2236_v37, %v1980_v60  ;;  %v2851_v12 = vmax.f32 %v2235_v3, 0.0  ;;  %v6587_v3 = vld [vmem:[#allocation66_spill] sm:$0xff]  ;;  %v6589_v37 = vld [vmem:[#allocation67_spill] sm:$0xff] }
 0x246   :  { %v1984_v5 = vadd.f32 %v1983_v30, %v5327_v62  ;;  %v2240_v15 = vpop.f32.mrf.mxu1  ;;  %2792 = vmatmul.mubr.f32.gmra.mxu1 %v6581_v22  ;;  %2571 = vmatprep.mubr.f32.mxu0 %v6582_v35  ;;  %v6588_v60 = vmax.f32 %v6587_v3, 0.0  ;;  %v6590_v30 = vmax.f32 %v6589_v37, 0.0 }
 0x247   :  { %2796 = vmatprep.mubr.f32.mxu1 %v6584_v10  ;;  %v1985_v2 = vpop.f32.mrf.mxu0  ;;  %v2852_v23 = vmax.f32 %v2237_v20, 0.0  ;;  %v5486_v49 = vadd.f32 %v2962_v43, %v2961_v48  ;;  %v2964_v39 = vmul.f32 %v5358_v55, %v2851_v12  ;;  %v6591_v20 = vld [vmem:[#allocation68_spill] sm:$0xff]  ;;  %v6594_v10 = vmax.f32 %v6593_v27, 0.0 }
 0x248   :  { %v2241_v24 = vadd.f32 %v2240_v15, %v1984_v5  ;;  %v1986_v8 = vadd.f32 %v1985_v2, %v5337_v56  ;;  %v2242_v19 = vpop.f32.mrf.mxu1  ;;  %v6592_v5 = vmax.f32 %v6591_v20, 0.0 }
 0x249   :  { %v1989_v33 = vpop.f32.mrf.mxu0  ;;  %2572 = vmatmul.mubr.f32.gmra.mxu0 %v6586_v50  ;;  %v2965_v63 = vmul.f32 %v5362_v9, %v2852_v23  ;;  %v6598_v50 = vmax.f32 %v6597_v18, 0.0 }
 0x24a   :  { %v2243_v51 = vadd.f32 %v2242_v19, %v1986_v8  ;;  %v1990_v14 = vadd.f32 %v1989_v33, %v5327_v62  ;;  %v2246_v32 = vpop.f32.mrf.mxu1  ;;  %2797 = vmatmul.mubr.f32.gmra.mxu1 %v6588_v60  ;;  %2576 = vmatprep.mubr.f32.mxu0 %v6590_v30  ;;  %v2854_v40 = vmax.f32 %v2241_v24, 0.0  ;;  %v6595_v19 = vld [vmem:[#allocation70_spill] sm:$0xff] }
 0x24b   :  { %2801 = vmatprep.mubr.f32.mxu1 %v6592_v5  ;;  %v1991_v43 = vpop.f32.mrf.mxu0  ;;  %v5500_v2 = vadd.f32 %v2965_v63, %v2964_v39  ;;  %v6596_v33 = vmax.f32 %v6595_v19, 0.0  ;;  %v6601_v5 = vld [vmem:[#allocation73_spill] sm:$0xff] }
 0x24c   :  { %v2855_v15 = vmax.f32 %v2243_v51, 0.0  ;;  %v2247_v28 = vadd.f32 %v2246_v32, %v1990_v14  ;;  %v1992_v22 = vadd.f32 %v1991_v43, %v5337_v56  ;;  %v2248_v35 = vpop.f32.mrf.mxu1  ;;  %v2967_v51 = vmul.f32 %v5358_v55, %v2854_v40  ;;  %v6599_v32 = vld [vmem:[#allocation72_spill] sm:$0xff] }
 0x24d   :  { %v1995_v48 = vpop.f32.mrf.mxu0  ;;  %2577 = vmatmul.mubr.f32.gmra.mxu0 %v6594_v10  ;;  %v6600_v3 = vmax.f32 %v6599_v32, 0.0  ;;  %v6602_v43 = vmax.f32 %v6601_v5, 0.0 }
 0x24e   :  { %v2968_v23 = vmul.f32 %v5362_v9, %v2855_v15  ;;  %v2249_v8 = vadd.f32 %v2248_v35, %v1992_v22  ;;  %v1996_v12 = vadd.f32 %v1995_v48, %v5327_v62  ;;  %v2252_v24 = vpop.f32.mrf.mxu1  ;;  %2802 = vmatmul.mubr.f32.gmra.mxu1 %v6596_v33  ;;  %2581 = vmatprep.mubr.f32.mxu0 %v6598_v50  ;;  %v2857_v14 = vmax.f32 %v2247_v28, 0.0  ;;  %v6603_v48 = vld [vmem:[#allocation74_spill] sm:$0xff] }
 0x24f   :  { %2806 = vmatprep.mubr.f32.mxu1 %v6600_v3  ;;  %v1997_v63 = vpop.f32.mrf.mxu0  ;;  %v6604_v27 = vmax.f32 %v6603_v48, 0.0 }
 0x250   :  { %v2858_v60 = vmax.f32 %v2249_v8, 0.0  ;;  %v2253_v37 = vadd.f32 %v2252_v24, %v1996_v12  ;;  %v1998_v30 = vadd.f32 %v1997_v63, %v5337_v56  ;;  %v2254_v39 = vpop.f32.mrf.mxu1  ;;  %v5514_v15 = vadd.f32 %v2968_v23, %v2967_v51 }
 0x251   :  { %v2001_v20 = vpop.f32.mrf.mxu0  ;;  %2582 = vmatmul.mubr.f32.gmra.mxu0 %v6602_v43  ;;  %v2970_v10 = vmul.f32 %v5358_v55, %v2857_v14  ;;  %v6605_v12 = vmax.f32 %v5101_v38, 0.0  ;;  %v6606_v51 = vmax.f32 %v5095_v54, 0.0  ;;  %v6607_v38 = vmax.f32 %v5108_v16, 0.0 }
 0x252   :  { %v2971_v22 = vmul.f32 %v5362_v9, %v2858_v60  ;;  %v2255_v35 = vadd.f32 %v2254_v39, %v1998_v30  ;;  %v2002_v40 = vadd.f32 %v2001_v20, %v5327_v62  ;;  %v2258_v28 = vpop.f32.mrf.mxu1  ;;  %2807 = vmatmul.mubr.f32.gmra.mxu1 %v6604_v27  ;;  %2586 = vmatprep.mubr.f32.mxu0 %v1643_v11  ;;  %v2860_v8 = vmax.f32 %v2253_v37, 0.0 }
 0x253   :  { %2811 = vmatprep.mubr.f32.mxu1 %v6605_v12  ;;  %v2003_v23 = vpop.f32.mrf.mxu0 }
 0x254   :  { %v2861_v24 = vmax.f32 %v2255_v35, 0.0  ;;  %v2259_v19 = vadd.f32 %v2258_v28, %v2002_v40  ;;  %v2004_v33 = vadd.f32 %v2003_v23, %v5337_v56  ;;  %v2260_v18 = vpop.f32.mrf.mxu1  ;;  %v5528_v32 = vadd.f32 %v2971_v22, %v2970_v10 }
 0x255   :  { %v2007_v50 = vpop.f32.mrf.mxu0  ;;  %2587 = vmatmul.mubr.f32.gmra.mxu0 %v6606_v51  ;;  %v2973_v63 = vmul.f32 %v5358_v55, %v2860_v8 }
 0x256   :  { %v2974_v29 = vmul.f32 %v5362_v9, %v2861_v24  ;;  %v2261_v11 = vadd.f32 %v2260_v18, %v2004_v33  ;;  %v2008_v14 = vadd.f32 %v2007_v50, %v5327_v62  ;;  %v2264_v3 = vpop.f32.mrf.mxu1  ;;  %2812 = vmatmul.mubr.f32.gmra.mxu1 %v6607_v38  ;;  %2591 = vmatprep.mubr.f32.mxu0 %v1647_v25  ;;  %v2863_v60 = vmax.f32 %v2259_v19, 0.0 }
 0x257   :  { %2816 = vmatprep.mubr.f32.mxu1 %v1649_v53  ;;  %v2009_v54 = vpop.f32.mrf.mxu0 }
 0x258   :  { %v2864_v37 = vmax.f32 %v2261_v11, 0.0  ;;  %v2265_v30 = vadd.f32 %v2264_v3, %v2008_v14  ;;  %v2010_v39 = vadd.f32 %v2009_v54, %v5337_v56  ;;  %v2266_v20 = vpop.f32.mrf.mxu1  ;;  %v5542_v16 = vadd.f32 %v2974_v29, %v2973_v63 }
 0x259   :  { %v2013_v5 = vpop.f32.mrf.mxu0  ;;  %2592 = vmatmul.mubr.f32.gmra.mxu0 %v1646_v61  ;;  %v2976_v0 = vmul.f32 %v5358_v55, %v2863_v60 }
 0x25a   :  { %v2977_v44 = vmul.f32 %v5362_v9, %v2864_v37  ;;  %v2267_v25 = vadd.f32 %v2266_v20, %v2010_v39  ;;  %v2014_v43 = vadd.f32 %v2013_v5, %v5327_v62  ;;  %v2270_v22 = vpop.f32.mrf.mxu1  ;;  %2817 = vmatmul.mubr.f32.gmra.mxu1 %v1648_v47  ;;  %2596 = vmatprep.mubr.f32.mxu0 %v1651_v34  ;;  %v2866_v53 = vmax.f32 %v2265_v30, 0.0 }
 0x25b   :  { %2821 = vmatprep.mubr.f32.mxu1 %v1653_v13  ;;  %v2015_v7 = vpop.f32.mrf.mxu0 }
 0x25c   :  { %v2867_v61 = vmax.f32 %v2267_v25, 0.0  ;;  %v2271_v35 = vadd.f32 %v2270_v22, %v2014_v43  ;;  %v2016_v40 = vadd.f32 %v2015_v7, %v5337_v56  ;;  %v2272_v28 = vpop.f32.mrf.mxu1  ;;  %v5556_v26 = vadd.f32 %v2977_v44, %v2976_v0 }
 0x25d   :  { %v2019_v48 = vpop.f32.mrf.mxu0  ;;  %2597 = vmatmul.mubr.f32.gmra.mxu0 %v1650_v17  ;;  %v2979_v36 = vmul.f32 %v5358_v55, %v2866_v53 }
 0x25e   :  { %v2980_v52 = vmul.f32 %v5362_v9, %v2867_v61  ;;  %v2273_v47 = vadd.f32 %v2272_v28, %v2016_v40  ;;  %v2020_v34 = vadd.f32 %v2019_v48, %v5327_v62  ;;  %v2276_v27 = vpop.f32.mrf.mxu1  ;;  %2822 = vmatmul.mubr.f32.gmra.mxu1 %v1652_v58  ;;  %v2869_v13 = vmax.f32 %v2271_v35, 0.0 }
 0x25f   :  { %v2021_v10 = vpop.f32.mrf.mxu0 }
 0x260   :  { %v2870_v8 = vmax.f32 %v2273_v47, 0.0  ;;  %v2277_v12 = vadd.f32 %v2276_v27, %v2020_v34  ;;  %v2022_v21 = vadd.f32 %v2021_v10, %v5337_v56  ;;  %v2278_v17 = vpop.f32.mrf.mxu1  ;;  %v5564_v24 = vadd.f32 %v2980_v52, %v2979_v36 }
 0x261   :  { %v2025_v23 = vpop.f32.mrf.mxu0  ;;  %v2982_v45 = vmul.f32 %v5358_v55, %v2869_v13 }
 0x262   :  { %v2983_v19 = vmul.f32 %v5362_v9, %v2870_v8  ;;  %v2279_v33 = vadd.f32 %v2278_v17, %v2022_v21  ;;  %v2026_v18 = vadd.f32 %v2025_v23, %v5327_v62  ;;  %v2282_v50 = vpop.f32.mrf.mxu1  ;;  %v2872_v58 = vmax.f32 %v2277_v12, 0.0 }
 0x263   :  { %v2027_v51 = vpop.f32.mrf.mxu0 }
 0x264   :  { %v2873_v29 = vmax.f32 %v2279_v33, 0.0  ;;  %v2283_v11 = vadd.f32 %v2282_v50, %v2026_v18  ;;  %v2028_v14 = vadd.f32 %v2027_v51, %v5337_v56  ;;  %v2284_v3 = vpop.f32.mrf.mxu1  ;;  %v5570_v63 = vadd.f32 %v2983_v19, %v2982_v45 }
 0x265   :  { %v2031_v38 = vpop.f32.mrf.mxu0  ;;  %v2985_v39 = vmul.f32 %v5358_v55, %v2872_v58 }
 0x266   :  { %v2986_v60 = vmul.f32 %v5362_v9, %v2873_v29  ;;  %v2285_v54 = vadd.f32 %v2284_v3, %v2028_v14  ;;  %v2032_v37 = vadd.f32 %v2031_v38, %v5327_v62  ;;  %v2288_v30 = vpop.f32.mrf.mxu1  ;;  %v2875_v20 = vmax.f32 %v2283_v11, 0.0 }
 0x267   :  { %v2033_v5 = vpop.f32.mrf.mxu0 }
 0x268   :  { %v2876_v44 = vmax.f32 %v2285_v54, 0.0  ;;  %v2289_v25 = vadd.f32 %v2288_v30, %v2032_v37  ;;  %v2034_v43 = vadd.f32 %v2033_v5, %v5337_v56  ;;  %v2290_v22 = vpop.f32.mrf.mxu1  ;;  %v5576_v53 = vadd.f32 %v2986_v60, %v2985_v39 }
 0x269   :  { %v2037_v0 = vpop.f32.mrf.mxu0  ;;  %v2988_v28 = vmul.f32 %v5358_v55, %v2875_v20 }
 0x26a   :  { %v2989_v7 = vmul.f32 %v5362_v9, %v2876_v44  ;;  %v2291_v61 = vadd.f32 %v2290_v22, %v2034_v43  ;;  %v2038_v35 = vadd.f32 %v2037_v0, %v5327_v62  ;;  %v2294_v40 = vpop.f32.mrf.mxu1  ;;  %v2878_v48 = vmax.f32 %v2289_v25, 0.0 }
 0x26b   :  { %v2039_v52 = vpop.f32.mrf.mxu0 }
 0x26c   :  { %v2879_v47 = vmax.f32 %v2291_v61, 0.0  ;;  %v2295_v34 = vadd.f32 %v2294_v40, %v2038_v35  ;;  %v2040_v27 = vadd.f32 %v2039_v52, %v5337_v56  ;;  %v2296_v36 = vpop.f32.mrf.mxu1  ;;  %v5582_v10 = vadd.f32 %v2989_v7, %v2988_v28 }
 0x26d   :  { %v2043_v13 = vpop.f32.mrf.mxu0  ;;  %v2991_v23 = vmul.f32 %v5358_v55, %v2878_v48 }
 0x26e   :  { %v2992_v8 = vmul.f32 %v5362_v9, %v2879_v47  ;;  %v2297_v12 = vadd.f32 %v2296_v36, %v2040_v27  ;;  %v2044_v21 = vadd.f32 %v2043_v13, %v5327_v62  ;;  %v2300_v17 = vpop.f32.mrf.mxu1  ;;  %v2881_v19 = vmax.f32 %v2295_v34, 0.0 }
 0x26f   :  { %v2045_v33 = vpop.f32.mrf.mxu0 }
 0x270   :  { %v2882_v18 = vmax.f32 %v2297_v12, 0.0  ;;  %v2301_v50 = vadd.f32 %v2300_v17, %v2044_v21  ;;  %v2046_v45 = vadd.f32 %v2045_v33, %v5337_v56  ;;  %v2302_v58 = vpop.f32.mrf.mxu1  ;;  %v5588_v29 = vadd.f32 %v2992_v8, %v2991_v23 }
 0x271   :  { %v2049_v51 = vpop.f32.mrf.mxu0  ;;  %v2994_v60 = vmul.f32 %v5358_v55, %v2881_v19 }
 0x272   :  { %v2995_v11 = vmul.f32 %v5362_v9, %v2882_v18  ;;  %v2303_v14 = vadd.f32 %v2302_v58, %v2046_v45  ;;  %v2050_v3 = vadd.f32 %v2049_v51, %v5327_v62  ;;  %v2306_v38 = vpop.f32.mrf.mxu1  ;;  %v2884_v54 = vmax.f32 %v2301_v50, 0.0 }
 0x273   :  { %v2051_v37 = vpop.f32.mrf.mxu0 }
 0x274   :  { %v2885_v30 = vmax.f32 %v2303_v14, 0.0  ;;  %v2307_v39 = vadd.f32 %v2306_v38, %v2050_v3  ;;  %v2052_v20 = vadd.f32 %v2051_v37, %v5337_v56  ;;  %v2308_v5 = vpop.f32.mrf.mxu1  ;;  %v5594_v25 = vadd.f32 %v2995_v11, %v2994_v60 }
 0x275   :  { %v2055_v44 = vpop.f32.mrf.mxu0  ;;  %v2997_v61 = vmul.f32 %v5358_v55, %v2884_v54 }
 0x276   :  { %v2998_v43 = vmul.f32 %v5362_v9, %v2885_v30  ;;  %v2309_v22 = vadd.f32 %v2308_v5, %v2052_v20  ;;  %v2056_v0 = vadd.f32 %v2055_v44, %v5327_v62  ;;  %v2312_v7 = vpop.f32.mrf.mxu1  ;;  %v2887_v35 = vmax.f32 %v2307_v39, 0.0 }
 0x277   :  { %v2057_v40 = vpop.f32.mrf.mxu0 }
 0x278   :  { %v2888_v28 = vmax.f32 %v2309_v22, 0.0  ;;  %v2313_v48 = vadd.f32 %v2312_v7, %v2056_v0  ;;  %v2058_v52 = vadd.f32 %v2057_v40, %v5337_v56  ;;  %v2314_v47 = vpop.f32.mrf.mxu1  ;;  %v5600_v27 = vadd.f32 %v2998_v43, %v2997_v61 }
 0x279   :  { %v2061_v34 = vpop.f32.mrf.mxu0  ;;  %v3000_v21 = vmul.f32 %v5358_v55, %v2887_v35 }
 0x27a   :  { %v3001_v36 = vmul.f32 %v5362_v9, %v2888_v28  ;;  %v2315_v13 = vadd.f32 %v2314_v47, %v2058_v52  ;;  %v2062_v8 = vadd.f32 %v2061_v34, %v5327_v62  ;;  %v2318_v12 = vpop.f32.mrf.mxu1  ;;  %v2890_v17 = vmax.f32 %v2313_v48, 0.0 }
 0x27b   :  { %v2063_v23 = vpop.f32.mrf.mxu0 }
 0x27c   :  { %v2891_v19 = vmax.f32 %v2315_v13, 0.0  ;;  %v2319_v33 = vadd.f32 %v2318_v12, %v2062_v8  ;;  %v2064_v18 = vadd.f32 %v2063_v23, %v5337_v56  ;;  %v2320_v50 = vpop.f32.mrf.mxu1  ;;  %v5606_v58 = vadd.f32 %v3001_v36, %v3000_v21 }
 0x27d   :  { %v2067_v45 = vpop.f32.mrf.mxu0  ;;  %v3003_v38 = vmul.f32 %v5358_v55, %v2890_v17 }
 0x27e   :  { %v3004_v51 = vmul.f32 %v5362_v9, %v2891_v19  ;;  %v2321_v11 = vadd.f32 %v2320_v50, %v2064_v18  ;;  %v2068_v14 = vadd.f32 %v2067_v45, %v5327_v62  ;;  %v2324_v3 = vpop.f32.mrf.mxu1  ;;  %v2893_v60 = vmax.f32 %v2319_v33, 0.0 }
 0x27f   :  { %v2069_v54 = vpop.f32.mrf.mxu0 }
 0x280   :  { %v2894_v37 = vmax.f32 %v2321_v11, 0.0  ;;  %v2325_v30 = vadd.f32 %v2324_v3, %v2068_v14  ;;  %v2070_v39 = vadd.f32 %v2069_v54, %v5337_v56  ;;  %v2326_v20 = vpop.f32.mrf.mxu1  ;;  %v5612_v44 = vadd.f32 %v3004_v51, %v3003_v38 }
 0x281   :  { %v2073_v5 = vpop.f32.mrf.mxu0  ;;  %v3006_v61 = vmul.f32 %v5358_v55, %v2893_v60 }
 0x282   :  { %v3007_v43 = vmul.f32 %v5362_v9, %v2894_v37  ;;  %v2327_v22 = vadd.f32 %v2326_v20, %v2070_v39  ;;  %v2074_v0 = vadd.f32 %v2073_v5, %v5327_v62  ;;  %v2330_v7 = vpop.f32.mrf.mxu1  ;;  %v2896_v35 = vmax.f32 %v2325_v30, 0.0 }
 0x283   :  { %v2075_v40 = vpop.f32.mrf.mxu0 }
 0x284   :  { %v2897_v28 = vmax.f32 %v2327_v22, 0.0  ;;  %v2331_v48 = vadd.f32 %v2330_v7, %v2074_v0  ;;  %v2076_v52 = vadd.f32 %v2075_v40, %v5337_v56  ;;  %v2332_v47 = vpop.f32.mrf.mxu1  ;;  %v5618_v36 = vadd.f32 %v3007_v43, %v3006_v61 }
 0x285   :  { %v2079_v34 = vpop.f32.mrf.mxu0  ;;  %v3009_v17 = vmul.f32 %v5358_v55, %v2896_v35 }
 0x286   :  { %v3010_v13 = vmul.f32 %v5362_v9, %v2897_v28  ;;  %v2333_v8 = vadd.f32 %v2332_v47, %v2076_v52  ;;  %v2080_v12 = vadd.f32 %v2079_v34, %v5327_v62  ;;  %v2336_v21 = vpop.f32.mrf.mxu1  ;;  %v2899_v23 = vmax.f32 %v2331_v48, 0.0 }
 0x287   :  { %v2081_v19 = vpop.f32.mrf.mxu0 }
 0x288   :  { %v2900_v33 = vmax.f32 %v2333_v8, 0.0  ;;  %v2337_v18 = vadd.f32 %v2336_v21, %v2080_v12  ;;  %v2082_v50 = vadd.f32 %v2081_v19, %v5337_v56  ;;  %v2338_v45 = vpop.f32.mrf.mxu1  ;;  %v5624_v11 = vadd.f32 %v3010_v13, %v3009_v17 }
 0x289   :  { %v2085_v51 = vpop.f32.mrf.mxu0  ;;  %v3012_v54 = vmul.f32 %v5358_v55, %v2899_v23 }
 0x28a   :  { %v3013_v14 = vmul.f32 %v5362_v9, %v2900_v33  ;;  %v2339_v3 = vadd.f32 %v2338_v45, %v2082_v50  ;;  %v2086_v38 = vadd.f32 %v2085_v51, %v5327_v62  ;;  %v2342_v60 = vpop.f32.mrf.mxu1  ;;  %v2902_v37 = vmax.f32 %v2337_v18, 0.0 }
 0x28b   :  { %v2087_v30 = vpop.f32.mrf.mxu0 }
 0x28c   :  { %v2903_v39 = vmax.f32 %v2339_v3, 0.0  ;;  %v2343_v20 = vadd.f32 %v2342_v60, %v2086_v38  ;;  %v2088_v5 = vadd.f32 %v2087_v30, %v5337_v56  ;;  %v2344_v43 = vpop.f32.mrf.mxu1  ;;  %v5630_v0 = vadd.f32 %v3013_v14, %v3012_v54 }
 0x28d   :  { %v2091_v22 = vpop.f32.mrf.mxu0  ;;  %v3015_v28 = vmul.f32 %v5358_v55, %v2902_v37 }
 0x28e   :  { %v3016_v7 = vmul.f32 %v5362_v9, %v2903_v39  ;;  %v2345_v61 = vadd.f32 %v2344_v43, %v2088_v5  ;;  %v2092_v35 = vadd.f32 %v2091_v22, %v5327_v62  ;;  %v2348_v40 = vpop.f32.mrf.mxu1  ;;  %v2905_v48 = vmax.f32 %v2343_v20, 0.0 }
 0x28f   :  { %v2093_v52 = vpop.f32.mrf.mxu0 }
 0x290   :  { %v2906_v47 = vmax.f32 %v2345_v61, 0.0  ;;  %v2349_v34 = vadd.f32 %v2348_v40, %v2092_v35  ;;  %v2094_v13 = vadd.f32 %v2093_v52, %v5337_v56  ;;  %v2350_v8 = vpop.f32.mrf.mxu1  ;;  %v5636_v21 = vadd.f32 %v3016_v7, %v3015_v28 }
 0x291   :  { %v2097_v12 = vpop.f32.mrf.mxu0  ;;  %v3018_v18 = vmul.f32 %v5358_v55, %v2905_v48 }
 0x292   :  { %v3019_v17 = vmul.f32 %v5362_v9, %v2906_v47  ;;  %v2351_v23 = vadd.f32 %v2350_v8, %v2094_v13  ;;  %v2098_v19 = vadd.f32 %v2097_v12, %v5327_v62  ;;  %v2354_v33 = vpop.f32.mrf.mxu1  ;;  %v2908_v50 = vmax.f32 %v2349_v34, 0.0 }
 0x293   :  { %v2099_v45 = vpop.f32.mrf.mxu0 }
 0x294   :  { %v2909_v51 = vmax.f32 %v2351_v23, 0.0  ;;  %v2355_v14 = vadd.f32 %v2354_v33, %v2098_v19  ;;  %v2100_v3 = vadd.f32 %v2099_v45, %v5337_v56  ;;  %v2356_v38 = vpop.f32.mrf.mxu1  ;;  %v5642_v54 = vadd.f32 %v3019_v17, %v3018_v18  ;;  %v6608_v45 = vld [vmem:[#allocation87_spill] sm:$0xff] }
 0x295   :  { %v2103_v60 = vpop.f32.mrf.mxu0  ;;  %v3021_v5 = vmul.f32 %v5358_v55, %v2908_v50 }
 0x296   :  { %v3022_v37 = vmul.f32 %v5362_v9, %v2909_v51  ;;  %v2357_v30 = vadd.f32 %v2356_v38, %v2100_v3  ;;  %v2104_v39 = vadd.f32 %v2103_v60, %v5327_v62  ;;  %v2360_v20 = vpop.f32.mrf.mxu1  ;;  %v2911_v43 = vmax.f32 %v2355_v14, 0.0 }
 0x297   :  { %v2105_v22 = vpop.f32.mrf.mxu0  ;;  %v5656_v51 = vrot.slane %v5317_v46, %v6608_v45 }
 0x298   :  { %v2912_v7 = vmax.f32 %v2357_v30, 0.0  ;;  %v2361_v61 = vadd.f32 %v2360_v20, %v2104_v39  ;;  %v2106_v35 = vadd.f32 %v2105_v22, %v5337_v56  ;;  %v2362_v40 = vpop.f32.mrf.mxu1  ;;  %v5648_v48 = vadd.f32 %v3022_v37, %v3021_v5 }
 0x299   :  { %v2109_v28 = vpop.f32.mrf.mxu0  ;;  %v3024_v8 = vmul.f32 %v5358_v55, %v2911_v43 }
 0x29a   :  { %v3025_v52 = vmul.f32 %v5362_v9, %v2912_v7  ;;  %v2363_v47 = vadd.f32 %v2362_v40, %v2106_v35  ;;  %v2110_v34 = vadd.f32 %v2109_v28, %v5327_v62  ;;  %v2366_v13 = vpop.f32.mrf.mxu1  ;;  %v2914_v12 = vmax.f32 %v2361_v61, 0.0 }
 0x29b   :  { %v2111_v17 = vpop.f32.mrf.mxu0 }
 0x29c   :  { %v2915_v23 = vmax.f32 %v2363_v47, 0.0  ;;  %v2367_v19 = vadd.f32 %v2366_v13, %v2110_v34  ;;  %v2112_v33 = vadd.f32 %v2111_v17, %v5337_v56  ;;  %v2368_v18 = vpop.f32.mrf.mxu1  ;;  %v5658_v14 = vadd.f32 %v3025_v52, %v3024_v8 }
 0x29d   :  { %v2115_v50 = vpop.f32.mrf.mxu0  ;;  %v3027_v39 = vmul.f32 %v5358_v55, %v2914_v12 }
 0x29e   :  { %v3028_v3 = vmul.f32 %v5362_v9, %v2915_v23  ;;  %v2917_v38 = vmax.f32 %v2367_v19, 0.0  ;;  %v2369_v60 = vadd.f32 %v2368_v18, %v2112_v33  ;;  %v2116_v37 = vadd.f32 %v2115_v50, %v5327_v62  ;;  %v2372_v30 = vpop.f32.mrf.mxu1 }
 0x29f   :  { %v2117_v20 = vpop.f32.mrf.mxu0 }
 0x2a0   :  { %v2918_v5 = vmax.f32 %v2369_v60, 0.0  ;;  %v2373_v43 = vadd.f32 %v2372_v30, %v2116_v37  ;;  %v2118_v22 = vadd.f32 %v2117_v20, %v5337_v56  ;;  %v2374_v7 = vpop.f32.mrf.mxu1  ;;  %v3030_v46 = vmul.f32 %v5358_v55, %v2917_v38 }
 0x2a1   :  { %v2443_v61 = vpop.f32.mrf.mxu0  ;;  %v5665_v35 = vadd.f32 %v3028_v3, %v3027_v39  ;;  %v5671_v56 = vrot.slane %v5345_v57, %v6608_v45 }
 0x2a2   :  { %v3031_v40 = vmul.f32 %v5362_v9, %v2918_v5  ;;  %v2920_v28 = vmax.f32 %v2373_v43, 0.0  ;;  %v2375_v52 = vadd.f32 %v2374_v7, %v2118_v22  ;;  %v2444_v62 = vadd.f32 %v2443_v61, %v5656_v51  ;;  %v2668_v47 = vpop.f32.mrf.mxu1 }
 0x2a3   :  { %v2445_v34 = vpop.f32.mrf.mxu0 }
 0x2a4   :  { %v2921_v13 = vmax.f32 %v2375_v52, 0.0  ;;  %v2669_v8 = vadd.f32 %v2668_v47, %v2444_v62  ;;  %v2670_v12 = vpop.f32.mrf.mxu1  ;;  %v5673_v17 = vadd.f32 %v3031_v40, %v3030_v46  ;;  %v3033_v19 = vmul.f32 %v5358_v55, %v2920_v28 }
 0x2a5   :  { %v2448_v23 = vpop.f32.mrf.mxu0 }
 0x2a6   :  { %v3034_v33 = vmul.f32 %v5362_v9, %v2921_v13  ;;  %v2829_v18 = vmax.f32 %v2669_v8, 0.0  ;;  %v2449_v50 = vadd.f32 %v2448_v23, %v5656_v51  ;;  %v2673_v3 = vpop.f32.mrf.mxu1 }
 0x2a7   :  { %v2450_v38 = vpop.f32.mrf.mxu0 }
 0x2a8   :  { %v2674_v60 = vadd.f32 %v2673_v3, %v2449_v50  ;;  %v2675_v37 = vpop.f32.mrf.mxu1  ;;  %v2942_v30 = vmul.f32 %v5671_v56, %v2829_v18  ;;  %v5679_v39 = vadd.f32 %v3034_v33, %v3033_v19 }
 0x2a9   :  { %v2453_v57 = vpop.f32.mrf.mxu0 }
 0x2aa   :  { %v2832_v45 = vmax.f32 %v2674_v60, 0.0  ;;  %v2454_v20 = vadd.f32 %v2453_v57, %v5656_v51  ;;  %v2678_v5 = vpop.f32.mrf.mxu1  ;;  %v3037_v55 = vadd.f32 %v5383_v6, %v2942_v30 }
 0x2ab   :  { %v2455_v43 = vpop.f32.mrf.mxu0 }
 0x2ac   :  { %v2945_v9 = vmul.f32 %v5671_v56, %v2832_v45  ;;  %v2679_v22 = vadd.f32 %v2678_v5, %v2454_v20  ;;  %v2680_v7 = vpop.f32.mrf.mxu1  ;;  %3038 = vadd.xlane.f32.xlu0 %v3037_v55 }
 0x2ad   :  { %v2458_v46 = vpop.f32.mrf.mxu0 }
 0x2ae   :  { %v2835_v61 = vmax.f32 %v2679_v22, 0.0  ;;  %v2459_v40 = vadd.f32 %v2458_v46, %v5656_v51  ;;  %v2683_v28 = vpop.f32.mrf.mxu1  ;;  %v3041_v52 = vadd.f32 %v5400_v41, %v2945_v9 }
 0x2af   :  { %v2460_v62 = vpop.f32.mrf.mxu0 }
 0x2b0   :  { %v2684_v47 = vadd.f32 %v2683_v28, %v2459_v40  ;;  %v2685_v34 = vpop.f32.mrf.mxu1  ;;  %3042 = vadd.xlane.f32.xlu0 %v3041_v52  ;;  %v2948_v13 = vmul.f32 %v5671_v56, %v2835_v61 }
 0x2b1   :  { %v2463_v6 = vpop.f32.mrf.mxu0 }
 0x2b2   :  { %v2838_v8 = vmax.f32 %v2684_v47, 0.0  ;;  %v2464_v12 = vadd.f32 %v2463_v6, %v5656_v51  ;;  %v2688_v23 = vpop.f32.mrf.mxu1  ;;  %v3045_v19 = vadd.f32 %v5413_v1, %v2948_v13 }
 0x2b3   :  { %v2465_v33 = vpop.f32.mrf.mxu0 }
 0x2b4   :  { %v2951_v18 = vmul.f32 %v5671_v56, %v2838_v8  ;;  %v2689_v50 = vadd.f32 %v2688_v23, %v2464_v12  ;;  %v2690_v3 = vpop.f32.mrf.mxu1  ;;  %3046 = vadd.xlane.f32.xlu1 %v3045_v19 }
 0x2b5   :  { %v2468_v41 = vpop.f32.mrf.mxu0 }
 0x2b6   :  { %v2841_v38 = vmax.f32 %v2689_v50, 0.0  ;;  %v2469_v60 = vadd.f32 %v2468_v41, %v5656_v51  ;;  %v2693_v37 = vpop.f32.mrf.mxu1  ;;  %v3049_v30 = vadd.f32 %v5427_v59, %v2951_v18 }
 0x2b7   :  { %v2470_v57 = vpop.f32.mrf.mxu0 }
 0x2b8   :  { %v2954_v45 = vmul.f32 %v5671_v56, %v2841_v38  ;;  %v2694_v20 = vadd.f32 %v2693_v37, %v2469_v60  ;;  %v2695_v5 = vpop.f32.mrf.mxu1  ;;  %3050 = vadd.xlane.f32.xlu1 %v3049_v30 }
 0x2b9   :  { %v2473_v1 = vpop.f32.mrf.mxu0 }
 0x2ba   :  { %v2844_v55 = vmax.f32 %v2694_v20, 0.0  ;;  %v2474_v43 = vadd.f32 %v2473_v1, %v5656_v51  ;;  %v2698_v9 = vpop.f32.mrf.mxu1  ;;  %v3053_v22 = vadd.f32 %v5444_v42, %v2954_v45 }
 0x2bb   :  { %v2475_v7 = vpop.f32.mrf.mxu0 }
 0x2bc   :  { %v2957_v46 = vmul.f32 %v5671_v56, %v2844_v55  ;;  %v2699_v61 = vadd.f32 %v2698_v9, %v2474_v43  ;;  %v2700_v40 = vpop.f32.mrf.mxu1  ;;  %3054 = vadd.xlane.f32.xlu0 %v3053_v22 }
 0x2bd   :  { %v2478_v59 = vpop.f32.mrf.mxu0 }
 0x2be   :  { %v2847_v28 = vmax.f32 %v2699_v61, 0.0  ;;  %v2479_v52 = vadd.f32 %v2478_v59, %v5656_v51  ;;  %v2703_v62 = vpop.f32.mrf.mxu1  ;;  %v3057_v47 = vadd.f32 %v5458_v31, %v2957_v46 }
 0x2bf   :  { %v2480_v34 = vpop.f32.mrf.mxu0 }
 0x2c0   :  { %v2960_v13 = vmul.f32 %v5671_v56, %v2847_v28  ;;  %v2704_v6 = vadd.f32 %v2703_v62, %v2479_v52  ;;  %v2705_v8 = vpop.f32.mrf.mxu1  ;;  %3058 = vadd.xlane.f32.xlu1 %v3057_v47 }
 0x2c1   :  { %v2483_v42 = vpop.f32.mrf.mxu0 }
 0x2c2   :  { %v2850_v12 = vmax.f32 %v2704_v6, 0.0  ;;  %v2484_v23 = vadd.f32 %v2483_v42, %v5656_v51  ;;  %v2708_v19 = vpop.f32.mrf.mxu1  ;;  %v3061_v33 = vadd.f32 %v5472_v4, %v2960_v13 }
 0x2c3   :  { %v2485_v18 = vpop.f32.mrf.mxu0 }
 0x2c4   :  { %v2963_v50 = vmul.f32 %v5671_v56, %v2850_v12  ;;  %v2709_v3 = vadd.f32 %v2708_v19, %v2484_v23  ;;  %v2710_v41 = vpop.f32.mrf.mxu1  ;;  %3062 = vadd.xlane.f32.xlu0 %v3061_v33 }
 0x2c5   :  { %v2488_v31 = vpop.f32.mrf.mxu0 }
 0x2c6   :  { %v2853_v38 = vmax.f32 %v2709_v3, 0.0  ;;  %v2489_v60 = vadd.f32 %v2488_v31, %v5656_v51  ;;  %v2713_v37 = vpop.f32.mrf.mxu1  ;;  %v3065_v30 = vadd.f32 %v5486_v49, %v2963_v50 }
 0x2c7   :  { %v2490_v57 = vpop.f32.mrf.mxu0 }
 0x2c8   :  { %v2966_v45 = vmul.f32 %v5671_v56, %v2853_v38  ;;  %v2714_v20 = vadd.f32 %v2713_v37, %v2489_v60  ;;  %v2715_v5 = vpop.f32.mrf.mxu1  ;;  %3066 = vadd.xlane.f32.xlu1 %v3065_v30 }
 0x2c9   :  { %v2493_v4 = vpop.f32.mrf.mxu0 }
 0x2ca   :  { %v2856_v1 = vmax.f32 %v2714_v20, 0.0  ;;  %v2494_v55 = vadd.f32 %v2493_v4, %v5656_v51  ;;  %v2718_v43 = vpop.f32.mrf.mxu1  ;;  %v3069_v9 = vadd.f32 %v5500_v2, %v2966_v45 }
 0x2cb   :  { %v2495_v22 = vpop.f32.mrf.mxu0 }
 0x2cc   :  { %v2969_v7 = vmul.f32 %v5671_v56, %v2856_v1  ;;  %v2719_v46 = vadd.f32 %v2718_v43, %v2494_v55  ;;  %v2720_v61 = vpop.f32.mrf.mxu1  ;;  %3070 = vadd.xlane.f32.xlu0 %v3069_v9 }
 0x2cd   :  { %v2498_v49 = vpop.f32.mrf.mxu0 }
 0x2ce   :  { %v2859_v40 = vmax.f32 %v2719_v46, 0.0  ;;  %v2499_v59 = vadd.f32 %v2498_v49, %v5656_v51  ;;  %v2723_v28 = vpop.f32.mrf.mxu1  ;;  %v3073_v52 = vadd.f32 %v5514_v15, %v2969_v7 }
 0x2cf   :  { %v2500_v62 = vpop.f32.mrf.mxu0 }
 0x2d0   :  { %v2972_v47 = vmul.f32 %v5671_v56, %v2859_v40  ;;  %v2724_v34 = vadd.f32 %v2723_v28, %v2499_v59  ;;  %v2725_v13 = vpop.f32.mrf.mxu1  ;;  %3074 = vadd.xlane.f32.xlu1 %v3073_v52 }
 0x2d1   :  { %v2503_v2 = vpop.f32.mrf.mxu0 }
 0x2d2   :  { %v2862_v6 = vmax.f32 %v2724_v34, 0.0  ;;  %v2504_v8 = vadd.f32 %v2503_v2, %v5656_v51  ;;  %v2728_v42 = vpop.f32.mrf.mxu1  ;;  %v3077_v12 = vadd.f32 %v5528_v32, %v2972_v47 }
 0x2d3   :  { %v2505_v23 = vpop.f32.mrf.mxu0 }
 0x2d4   :  { %v2975_v19 = vmul.f32 %v5671_v56, %v2862_v6  ;;  %v2729_v33 = vadd.f32 %v2728_v42, %v2504_v8  ;;  %v2730_v18 = vpop.f32.mrf.mxu1  ;;  %3078 = vadd.xlane.f32.xlu0 %v3077_v12 }
 0x2d5   :  { %v2508_v15 = vpop.f32.mrf.mxu0 }
 0x2d6   :  { %v2865_v50 = vmax.f32 %v2729_v33, 0.0  ;;  %v2509_v3 = vadd.f32 %v2508_v15, %v5656_v51  ;;  %v2733_v41 = vpop.f32.mrf.mxu1  ;;  %v3081_v31 = vadd.f32 %v5542_v16, %v2975_v19 }
 0x2d7   :  { %v2510_v38 = vpop.f32.mrf.mxu0 }
 0x2d8   :  { %v2978_v60 = vmul.f32 %v5671_v56, %v2865_v50  ;;  %v2734_v37 = vadd.f32 %v2733_v41, %v2509_v3  ;;  %v2735_v30 = vpop.f32.mrf.mxu1  ;;  %3082 = vadd.xlane.f32.xlu1 %v3081_v31 }
 0x2d9   :  { %v2513_v32 = vpop.f32.mrf.mxu0 }
 0x2da   :  { %v2868_v57 = vmax.f32 %v2734_v37, 0.0  ;;  %v2514_v45 = vadd.f32 %v2513_v32, %v5656_v51  ;;  %v2738_v20 = vpop.f32.mrf.mxu1  ;;  %v3085_v5 = vadd.f32 %v5556_v26, %v2978_v60 }
 0x2db   :  { %v2515_v4 = vpop.f32.mrf.mxu0 }
 0x2dc   :  { %v2981_v1 = vmul.f32 %v5671_v56, %v2868_v57  ;;  %v2739_v55 = vadd.f32 %v2738_v20, %v2514_v45  ;;  %v2740_v43 = vpop.f32.mrf.mxu1  ;;  %3086 = vadd.xlane.f32.xlu0 %v3085_v5 }
 0x2dd   :  { %v2518_v16 = vpop.f32.mrf.mxu0 }
 0x2de   :  { %v2871_v9 = vmax.f32 %v2739_v55, 0.0  ;;  %v2519_v22 = vadd.f32 %v2518_v16, %v5656_v51  ;;  %v2743_v7 = vpop.f32.mrf.mxu1  ;;  %v3089_v46 = vadd.f32 %v5564_v24, %v2981_v1 }
 0x2df   :  { %v2520_v61 = vpop.f32.mrf.mxu0 }
 0x2e0   :  { %v2984_v49 = vmul.f32 %v5671_v56, %v2871_v9  ;;  %v2744_v40 = vadd.f32 %v2743_v7, %v2519_v22  ;;  %v2745_v59 = vpop.f32.mrf.mxu1  ;;  %3090 = vadd.xlane.f32.xlu1 %v3089_v46 }
 0x2e1   :  { %v2523_v26 = vpop.f32.mrf.mxu0 }
 0x2e2   :  { %v2874_v28 = vmax.f32 %v2744_v40, 0.0  ;;  %v2524_v52 = vadd.f32 %v2523_v26, %v5656_v51  ;;  %v2748_v62 = vpop.f32.mrf.mxu1  ;;  %v3093_v47 = vadd.f32 %v5570_v63, %v2984_v49 }
 0x2e3   :  { %v2525_v34 = vpop.f32.mrf.mxu0 }
 0x2e4   :  { %v2987_v13 = vmul.f32 %v5671_v56, %v2874_v28  ;;  %v2749_v2 = vadd.f32 %v2748_v62, %v2524_v52  ;;  %v2750_v6 = vpop.f32.mrf.mxu1  ;;  %3094 = vadd.xlane.f32.xlu0 %v3093_v47 }
 0x2e5   :  { %v2528_v24 = vpop.f32.mrf.mxu0 }
 0x2e6   :  { %v2877_v8 = vmax.f32 %v2749_v2, 0.0  ;;  %v2529_v42 = vadd.f32 %v2528_v24, %v5656_v51  ;;  %v2753_v12 = vpop.f32.mrf.mxu1  ;;  %v3097_v23 = vadd.f32 %v5576_v53, %v2987_v13 }
 0x2e7   :  { %v2530_v19 = vpop.f32.mrf.mxu0 }
 0x2e8   :  { %v2990_v33 = vmul.f32 %v5671_v56, %v2877_v8  ;;  %v2754_v18 = vadd.f32 %v2753_v12, %v2529_v42  ;;  %v2755_v15 = vpop.f32.mrf.mxu1  ;;  %3098 = vadd.xlane.f32.xlu1 %v3097_v23 }
 0x2e9   :  { %v2533_v63 = vpop.f32.mrf.mxu0 }
 0x2ea   :  { %v2880_v50 = vmax.f32 %v2754_v18, 0.0  ;;  %v2534_v3 = vadd.f32 %v2533_v63, %v5656_v51  ;;  %v2758_v41 = vpop.f32.mrf.mxu1  ;;  %v3101_v31 = vadd.f32 %v5582_v10, %v2990_v33 }
 0x2eb   :  { %v2535_v38 = vpop.f32.mrf.mxu0 }
 0x2ec   :  { %v2993_v60 = vmul.f32 %v5671_v56, %v2880_v50  ;;  %v2759_v37 = vadd.f32 %v2758_v41, %v2534_v3  ;;  %v2760_v30 = vpop.f32.mrf.mxu1  ;;  %3102 = vadd.xlane.f32.xlu0 %v3101_v31 }
 0x2ed   :  { %v2538_v53 = vpop.f32.mrf.mxu0 }
 0x2ee   :  { %v2883_v32 = vmax.f32 %v2759_v37, 0.0  ;;  %v2539_v57 = vadd.f32 %v2538_v53, %v5656_v51  ;;  %v2763_v45 = vpop.f32.mrf.mxu1  ;;  %v3105_v20 = vadd.f32 %v5588_v29, %v2993_v60 }
 0x2ef   :  { %v2540_v5 = vpop.f32.mrf.mxu0 }
 0x2f0   :  { %v2996_v4 = vmul.f32 %v5671_v56, %v2883_v32  ;;  %v2764_v1 = vadd.f32 %v2763_v45, %v2539_v57  ;;  %v2765_v55 = vpop.f32.mrf.mxu1  ;;  %3106 = vadd.xlane.f32.xlu1 %v3105_v20 }
 0x2f1   :  { %v2543_v10 = vpop.f32.mrf.mxu0 }
 0x2f2   :  { %v2886_v43 = vmax.f32 %v2764_v1, 0.0  ;;  %v2544_v16 = vadd.f32 %v2543_v10, %v5656_v51  ;;  %v2768_v9 = vpop.f32.mrf.mxu1  ;;  %v3109_v22 = vadd.f32 %v5594_v25, %v2996_v4 }
 0x2f3   :  { %v2545_v7 = vpop.f32.mrf.mxu0 }
 0x2f4   :  { %v2999_v46 = vmul.f32 %v5671_v56, %v2886_v43  ;;  %v2769_v61 = vadd.f32 %v2768_v9, %v2544_v16  ;;  %v2770_v49 = vpop.f32.mrf.mxu1  ;;  %3110 = vadd.xlane.f32.xlu0 %v3109_v22 }
 0x2f5   :  { %v2548_v29 = vpop.f32.mrf.mxu0 }
 0x2f6   :  { %v2889_v40 = vmax.f32 %v2769_v61, 0.0  ;;  %v2549_v59 = vadd.f32 %v2548_v29, %v5656_v51  ;;  %v2773_v26 = vpop.f32.mrf.mxu1  ;;  %v3113_v28 = vadd.f32 %v5600_v27, %v2999_v46 }
 0x2f7   :  { %v2550_v52 = vpop.f32.mrf.mxu0 }
 0x2f8   :  { %v3002_v62 = vmul.f32 %v5671_v56, %v2889_v40  ;;  %v2774_v47 = vadd.f32 %v2773_v26, %v2549_v59  ;;  %v2775_v34 = vpop.f32.mrf.mxu1  ;;  %3114 = vadd.xlane.f32.xlu1 %v3113_v28 }
 0x2f9   :  { %v2553_v25 = vpop.f32.mrf.mxu0 }
 0x2fa   :  { %v2892_v13 = vmax.f32 %v2774_v47, 0.0  ;;  %v2554_v2 = vadd.f32 %v2553_v25, %v5656_v51  ;;  %v2778_v6 = vpop.f32.mrf.mxu1  ;;  %v3117_v24 = vadd.f32 %v5606_v58, %v3002_v62 }
 0x2fb   :  { %v2555_v8 = vpop.f32.mrf.mxu0 }
 0x2fc   :  { %v3005_v42 = vmul.f32 %v5671_v56, %v2892_v13  ;;  %v2779_v12 = vadd.f32 %v2778_v6, %v2554_v2  ;;  %v2780_v23 = vpop.f32.mrf.mxu1  ;;  %3118 = vadd.xlane.f32.xlu0 %v3117_v24 }
 0x2fd   :  { %v2558_v27 = vpop.f32.mrf.mxu0 }
 0x2fe   :  { %v2895_v19 = vmax.f32 %v2779_v12, 0.0  ;;  %v2559_v33 = vadd.f32 %v2558_v27, %v5656_v51  ;;  %v2783_v18 = vpop.f32.mrf.mxu1  ;;  %v3121_v15 = vadd.f32 %v5612_v44, %v3005_v42 }
 0x2ff   :  { %v2560_v63 = vpop.f32.mrf.mxu0 }
 0x300   :  { %v3008_v50 = vmul.f32 %v5671_v56, %v2895_v19  ;;  %v2784_v3 = vadd.f32 %v2783_v18, %v2559_v33  ;;  %v2785_v41 = vpop.f32.mrf.mxu1  ;;  %3122 = vadd.xlane.f32.xlu1 %v3121_v15 }
 0x301   :  { %v2563_v58 = vpop.f32.mrf.mxu0 }
 0x302   :  { %v2898_v31 = vmax.f32 %v2784_v3, 0.0  ;;  %v2564_v38 = vadd.f32 %v2563_v58, %v5656_v51  ;;  %v2788_v60 = vpop.f32.mrf.mxu1  ;;  %v3125_v37 = vadd.f32 %v5618_v36, %v3008_v50 }
 0x303   :  { %v2565_v30 = vpop.f32.mrf.mxu0 }
 0x304   :  { %v3011_v53 = vmul.f32 %v5671_v56, %v2898_v31  ;;  %v2789_v32 = vadd.f32 %v2788_v60, %v2564_v38  ;;  %v2790_v57 = vpop.f32.mrf.mxu1  ;;  %3126 = vadd.xlane.f32.xlu0 %v3125_v37 }
 0x305   :  { %v2568_v44 = vpop.f32.mrf.mxu0 }
 0x306   :  { %v2901_v45 = vmax.f32 %v2789_v32, 0.0  ;;  %v2569_v20 = vadd.f32 %v2568_v44, %v5656_v51  ;;  %v2793_v5 = vpop.f32.mrf.mxu1  ;;  %v3129_v4 = vadd.f32 %v5624_v11, %v3011_v53 }
 0x307   :  { %v2570_v1 = vpop.f32.mrf.mxu0 }
 0x308   :  { %v3014_v55 = vmul.f32 %v5671_v56, %v2901_v45  ;;  %v2794_v10 = vadd.f32 %v2793_v5, %v2569_v20  ;;  %v2795_v43 = vpop.f32.mrf.mxu1  ;;  %3130 = vadd.xlane.f32.xlu1 %v3129_v4 }
 0x309   :  { %v2573_v36 = vpop.f32.mrf.mxu0  ;;  %v5774_v43 = vld [vmem:[#allocation2] ss:$0 sm:$0xff] }
 0x30a   :  { %v2904_v16 = vmax.f32 %v2794_v10, 0.0  ;;  %v2574_v9 = vadd.f32 %v2573_v36, %v5656_v51  ;;  %v2798_v22 = vpop.f32.mrf.mxu1  ;;  %v3133_v7 = vadd.f32 %v5630_v0, %v3014_v55 }
 0x30b   :  { %v2575_v46 = vpop.f32.mrf.mxu0 }
 0x30c   :  { %v3017_v61 = vmul.f32 %v5671_v56, %v2904_v16  ;;  %v2799_v49 = vadd.f32 %v2798_v22, %v2574_v9  ;;  %v2800_v29 = vpop.f32.mrf.mxu1  ;;  %3134 = vadd.xlane.f32.xlu0 %v3133_v7 }
 0x30d   :  { %v2578_v11 = vpop.f32.mrf.mxu0 }
 0x30e   :  { %v2907_v40 = vmax.f32 %v2799_v49, 0.0  ;;  %v2579_v59 = vadd.f32 %v2578_v11, %v5656_v51  ;;  %v2803_v26 = vpop.f32.mrf.mxu1  ;;  %v3137_v28 = vadd.f32 %v5636_v21, %v3017_v61 }
 0x30f   :  { %v2580_v52 = vpop.f32.mrf.mxu0 }
 0x310   :  { %v3020_v62 = vmul.f32 %v5671_v56, %v2907_v40  ;;  %v2804_v47 = vadd.f32 %v2803_v26, %v2579_v59  ;;  %v2805_v34 = vpop.f32.mrf.mxu1  ;;  %3138 = vadd.xlane.f32.xlu1 %v3137_v28 }
 0x311   :  { %v2583_v0 = vpop.f32.mrf.mxu0 }
 0x312   :  { %v2910_v25 = vmax.f32 %v2804_v47, 0.0  ;;  %v2584_v13 = vadd.f32 %v2583_v0, %v5656_v51  ;;  %v2808_v2 = vpop.f32.mrf.mxu1  ;;  %v3141_v6 = vadd.f32 %v5642_v54, %v3020_v62 }
 0x313   :  { %v2585_v24 = vpop.f32.mrf.mxu0 }
 0x314   :  { %v3023_v8 = vmul.f32 %v5671_v56, %v2910_v25  ;;  %v2809_v42 = vadd.f32 %v2808_v2, %v2584_v13  ;;  %v2810_v12 = vpop.f32.mrf.mxu1  ;;  %3142 = vadd.xlane.f32.xlu0 %v3141_v6 }
 0x315   :  { %v2588_v21 = vpop.f32.mrf.mxu0 }
 0x316   :  { %v2913_v23 = vmax.f32 %v2809_v42, 0.0  ;;  %v2589_v27 = vadd.f32 %v2588_v21, %v5656_v51  ;;  %v2813_v19 = vpop.f32.mrf.mxu1  ;;  %v3145_v33 = vadd.f32 %v5648_v48, %v3023_v8 }
 0x317   :  { %v2590_v18 = vpop.f32.mrf.mxu0 }
 0x318   :  { %v3026_v15 = vmul.f32 %v5671_v56, %v2913_v23  ;;  %v2814_v63 = vadd.f32 %v2813_v19, %v2589_v27  ;;  %v2815_v50 = vpop.f32.mrf.mxu1  ;;  %3146 = vadd.xlane.f32.xlu1 %v3145_v33 }
 0x319   :  { %v2593_v54 = vpop.f32.mrf.mxu0 }
 0x31a   :  { %v2916_v3 = vmax.f32 %v2814_v63, 0.0  ;;  %v2594_v41 = vadd.f32 %v2593_v54, %v5656_v51  ;;  %v2818_v58 = vpop.f32.mrf.mxu1  ;;  %v3149_v31 = vadd.f32 %v5658_v14, %v3026_v15 }
 0x31b   :  { %v2595_v38 = vpop.f32.mrf.mxu0 }
 0x31c   :  { %v3029_v60 = vmul.f32 %v5671_v56, %v2916_v3  ;;  %v2819_v37 = vadd.f32 %v2818_v58, %v2594_v41  ;;  %v2820_v30 = vpop.f32.mrf.mxu1  ;;  %3150 = vadd.xlane.f32.xlu0 %v3149_v31 }
 0x31d   :  { %v2598_v48 = vpop.f32.mrf.mxu0 }
 0x31e   :  { %v2919_v53 = vmax.f32 %v2819_v37, 0.0  ;;  %v2599_v32 = vadd.f32 %v2598_v48, %v5656_v51  ;;  %v2823_v57 = vpop.f32.mrf.mxu1  ;;  %v3153_v44 = vadd.f32 %v5665_v35, %v3029_v60 }
 0x31f   :  { %v2600_v45 = vpop.f32.mrf.mxu0 }
 0x320   :  { %v3032_v20 = vmul.f32 %v5671_v56, %v2919_v53  ;;  %v2824_v5 = vadd.f32 %v2823_v57, %v2599_v32  ;;  %v2825_v4 = vpop.f32.mrf.mxu1  ;;  %3154 = vadd.xlane.f32.xlu1 %v3153_v44 }
 0x322   :  { %v2922_v14 = vmax.f32 %v2824_v5, 0.0  ;;  %v3157_v1 = vadd.f32 %v5673_v17, %v3032_v20 }
 0x324   :  { %v3035_v55 = vmul.f32 %v5671_v56, %v2922_v14  ;;  %3158 = vadd.xlane.f32.xlu0 %v3157_v1 }
 0x326   :  { %v3161_v10 = vadd.f32 %v5679_v39, %v3035_v55 }
 0x328   :  { %3162 = vadd.xlane.f32.xlu1 %v3161_v10 }
 0x335   :  { %v3039_v51 = vpop.xlane.xlu0 %3038 }
 0x336   :  { %v3171_v35 = vadd.f32 %v5774_v43, %v3039_v51 }
 0x338   :  { %3204 = vst.msk [vmem:[%s5945_s9] sm:$0xff] %vm3203_vm4, %v3171_v35 }
 0x339   :  { %v3043_v36 = vpop.xlane.xlu0 %3042 }
 0x33a   :  { %v3172_v17 = vadd.f32 %v5774_v43, %v3043_v36 }
 0x33c   :  { %3205 = vst.msk [vmem:[%s5945_s9 + $0x8] sm:$0xff] %vm3203_vm4, %v3172_v17 }
 0x33d   :  { %v3047_v56 = vpop.xlane.xlu1 %3046 }
 0x33e   :  { %v3173_v39 = vadd.f32 %v5774_v43, %v3047_v56 }
 0x340   :  { %3206 = vst.msk [vmem:[%s5945_s9 + $0x10] sm:$0xff] %vm3203_vm4, %v3173_v39 }
 0x341   :  { %v3051_v16 = vpop.xlane.xlu1 %3050 }
 0x342   :  { %v3174_v9 = vadd.f32 %v5774_v43, %v3051_v16 }
 0x344   :  { %3207 = vst.msk [vmem:[%s5945_s9 + $0x18] sm:$0xff] %vm3203_vm4, %v3174_v9 }
 0x345   :  { %v3055_v22 = vpop.xlane.xlu0 %3054 }
 0x346   :  { %v3175_v7 = vadd.f32 %v5774_v43, %v3055_v22 }
 0x348   :  { %3208 = vst.msk [vmem:[%s5945_s9 + $0x20] sm:$0xff] %vm3203_vm4, %v3175_v7 }
 0x349   :  { %v3059_v46 = vpop.xlane.xlu1 %3058 }
 0x34a   :  { %v3176_v61 = vadd.f32 %v5774_v43, %v3059_v46 }
 0x34c   :  { %3209 = vst.msk [vmem:[%s5945_s9 + $0x28] sm:$0xff] %vm3203_vm4, %v3176_v61 }
 0x34d   :  { %v3063_v49 = vpop.xlane.xlu0 %3062 }
 0x34e   :  { %v3177_v29 = vadd.f32 %v5774_v43, %v3063_v49 }
 0x350   :  { %3210 = vst.msk [vmem:[%s5945_s9 + $0x30] sm:$0xff] %vm3203_vm4, %v3177_v29 }
 0x351   :  { %v3067_v11 = vpop.xlane.xlu1 %3066 }
 0x352   :  { %v3178_v40 = vadd.f32 %v5774_v43, %v3067_v11 }
 0x354   :  { %3211 = vst.msk [vmem:[%s5945_s9 + $0x38] sm:$0xff] %vm3203_vm4, %v3178_v40 }
 0x355   :  { %v3071_v59 = vpop.xlane.xlu0 %3070 }
 0x356   :  { %v3179_v26 = vadd.f32 %v5774_v43, %v3071_v59 }
 0x358   :  { %3212 = vst.msk [vmem:[%s5945_s9 + $0x40] sm:$0xff] %vm3203_vm4, %v3179_v26 }
 0x359   :  { %v3075_v28 = vpop.xlane.xlu1 %3074 }
 0x35a   :  { %v3180_v52 = vadd.f32 %v5774_v43, %v3075_v28 }
 0x35c   :  { %3213 = vst.msk [vmem:[%s5945_s9 + $0x48] sm:$0xff] %vm3203_vm4, %v3180_v52 }
 0x35d   :  { %v3079_v62 = vpop.xlane.xlu0 %3078 }
 0x35e   :  { %v3181_v47 = vadd.f32 %v5774_v43, %v3079_v62 }
 0x360   :  { %3214 = vst.msk [vmem:[%s5945_s9 + $0x50] sm:$0xff] %vm3203_vm4, %v3181_v47 }
 0x361   :  { %v3083_v34 = vpop.xlane.xlu1 %3082 }
 0x362   :  { %v3182_v0 = vadd.f32 %v5774_v43, %v3083_v34 }
 0x364   :  { %3215 = vst.msk [vmem:[%s5945_s9 + $0x58] sm:$0xff] %vm3203_vm4, %v3182_v0 }
 0x365   :  { %v3087_v25 = vpop.xlane.xlu0 %3086 }
 0x366   :  { %v3183_v13 = vadd.f32 %v5774_v43, %v3087_v25 }
 0x368   :  { %3216 = vst.msk [vmem:[%s5945_s9 + $0x60] sm:$0xff] %vm3203_vm4, %v3183_v13 }
 0x369   :  { %v3091_v2 = vpop.xlane.xlu1 %3090 }
 0x36a   :  { %v3184_v6 = vadd.f32 %v5774_v43, %v3091_v2 }
 0x36c   :  { %3217 = vst.msk [vmem:[%s5945_s9 + $0x68] sm:$0xff] %vm3203_vm4, %v3184_v6 }
 0x36d   :  { %v3095_v24 = vpop.xlane.xlu0 %3094 }
 0x36e   :  { %v3185_v8 = vadd.f32 %v5774_v43, %v3095_v24 }
 0x370   :  { %3218 = vst.msk [vmem:[%s5945_s9 + $0x70] sm:$0xff] %vm3203_vm4, %v3185_v8 }
 0x371   :  { %v3099_v42 = vpop.xlane.xlu1 %3098 }
 0x372   :  { %v3186_v12 = vadd.f32 %v5774_v43, %v3099_v42 }
 0x374   :  { %3219 = vst.msk [vmem:[%s5945_s9 + $0x78] sm:$0xff] %vm3203_vm4, %v3186_v12 }
 0x375   :  { %v3103_v21 = vpop.xlane.xlu0 %3102 }
 0x376   :  { %v3187_v23 = vadd.f32 %v5774_v43, %v3103_v21 }
 0x378   :  { %3220 = vst.msk [vmem:[%s5945_s9 + $0x80] sm:$0xff] %vm3203_vm4, %v3187_v23 }
 0x379   :  { %v3107_v27 = vpop.xlane.xlu1 %3106 }
 0x37a   :  { %v3188_v19 = vadd.f32 %v5774_v43, %v3107_v27 }
 0x37c   :  { %3221 = vst.msk [vmem:[%s5945_s9 + $0x88] sm:$0xff] %vm3203_vm4, %v3188_v19 }
 0x37d   :  { %v3111_v33 = vpop.xlane.xlu0 %3110 }
 0x37e   :  { %v3189_v18 = vadd.f32 %v5774_v43, %v3111_v33 }
 0x380   :  { %3222 = vst.msk [vmem:[%s5945_s9 + $0x90] sm:$0xff] %vm3203_vm4, %v3189_v18 }
 0x381   :  { %v3115_v15 = vpop.xlane.xlu1 %3114 }
 0x382   :  { %v3190_v63 = vadd.f32 %v5774_v43, %v3115_v15 }
 0x384   :  { %3223 = vst.msk [vmem:[%s5945_s9 + $0x98] sm:$0xff] %vm3203_vm4, %v3190_v63 }
 0x385   :  { %v3119_v50 = vpop.xlane.xlu0 %3118 }
 0x386   :  { %v3191_v54 = vadd.f32 %v5774_v43, %v3119_v50 }
 0x388   :  { %3224 = vst.msk [vmem:[%s5945_s9 + $0xa0] sm:$0xff] %vm3203_vm4, %v3191_v54 }
 0x389   :  { %v3123_v3 = vpop.xlane.xlu1 %3122 }
 0x38a   :  { %v3192_v41 = vadd.f32 %v5774_v43, %v3123_v3 }
 0x38c   :  { %3225 = vst.msk [vmem:[%s5945_s9 + $0xa8] sm:$0xff] %vm3203_vm4, %v3192_v41 }
 0x38d   :  { %v3127_v58 = vpop.xlane.xlu0 %3126 }
 0x38e   :  { %v3193_v31 = vadd.f32 %v5774_v43, %v3127_v58 }
 0x390   :  { %3226 = vst.msk [vmem:[%s5945_s9 + $0xb0] sm:$0xff] %vm3203_vm4, %v3193_v31 }
 0x391   :  { %v3131_v38 = vpop.xlane.xlu1 %3130 }
 0x392   :  { %v3194_v60 = vadd.f32 %v5774_v43, %v3131_v38 }
 0x394   :  { %3227 = vst.msk [vmem:[%s5945_s9 + $0xb8] sm:$0xff] %vm3203_vm4, %v3194_v60 }
 0x395   :  { %v3135_v37 = vpop.xlane.xlu0 %3134 }
 0x396   :  { %v3195_v30 = vadd.f32 %v5774_v43, %v3135_v37 }
 0x398   :  { %3228 = vst.msk [vmem:[%s5945_s9 + $0xc0] sm:$0xff] %vm3203_vm4, %v3195_v30 }
 0x399   :  { %v3139_v48 = vpop.xlane.xlu1 %3138 }
 0x39a   :  { %v3196_v53 = vadd.f32 %v5774_v43, %v3139_v48 }
 0x39c   :  { %3229 = vst.msk [vmem:[%s5945_s9 + $0xc8] sm:$0xff] %vm3203_vm4, %v3196_v53 }
 0x39d   :  { %v3143_v32 = vpop.xlane.xlu0 %3142 }
 0x39e   :  { %v3197_v57 = vadd.f32 %v5774_v43, %v3143_v32 }
 0x3a0   :  { %3230 = vst.msk [vmem:[%s5945_s9 + $0xd0] sm:$0xff] %vm3203_vm4, %v3197_v57 }
 0x3a1   :  { %v3147_v44 = vpop.xlane.xlu1 %3146 }
 0x3a2   :  { %v3198_v45 = vadd.f32 %v5774_v43, %v3147_v44 }
 0x3a4   :  { %3231 = vst.msk [vmem:[%s5945_s9 + $0xd8] sm:$0xff] %vm3203_vm4, %v3198_v45 }
 0x3a5   :  { %v3151_v20 = vpop.xlane.xlu0 %3150 }
 0x3a6   :  { %v3199_v5 = vadd.f32 %v5774_v43, %v3151_v20 }
 0x3a8   :  { %3232 = vst.msk [vmem:[%s5945_s9 + $0xe0] sm:$0xff] %vm3203_vm4, %v3199_v5 }
 0x3a9   :  { %v3155_v4 = vpop.xlane.xlu1 %3154 }
 0x3aa   :  { %v3200_v14 = vadd.f32 %v5774_v43, %v3155_v4 }
 0x3ac   :  { %3233 = vst.msk [vmem:[%s5945_s9 + $0xe8] sm:$0xff] %vm3203_vm4, %v3200_v14 }
 0x3ad   :  { %v3159_v1 = vpop.xlane.xlu0 %3158 }
 0x3ae   :  { %v3201_v55 = vadd.f32 %v5774_v43, %v3159_v1 }
 0x3b0   :  { %3234 = vst.msk [vmem:[%s5945_s9 + $0xf0] sm:$0xff] %vm3203_vm4, %v3201_v55 }
 0x3b1   :  { %v3163_v10 = vpop.xlane.xlu1 %3162 }
 0x3b2   :  { %v3202_v51 = vadd.f32 %v5774_v43, %v3163_v10 }
 0x3b4   :  { %3235 = vst.msk [vmem:[%s5945_s9 + $0xf8] sm:$0xff] %vm3203_vm4, %v3202_v51 }
 0x3b5   :  { %3240 = vsyncpa [#allocation4], 1 }

</bundles_post_ra>
